<compile_context>
chip_gen: v5e
topology: v5e:2x2
jax: 0.10.0
libtpu: 0.0.40
codegen_flags: <defaults>
</compile_context>

<pallas_src>
import math
import functools

import jax
import jax.numpy as jnp
from jax.experimental import pallas as pl
from jax.experimental.pallas import tpu as pltpu

LATENT_DIM = 512
LR_MUL = 0.01
NEG_SLOPE = 0.2
ACT_SCALE = math.sqrt(2.0)
N_LAYERS = 4
EQ_SCALE = (1.0 / math.sqrt(LATENT_DIM)) * LR_MUL

# bf16 weight storage halves weight-streaming HBM traffic.  EQ_SCALE is folded in before
# the cast so stored magnitudes are O(0.05).  Set jnp.float32 for bit-closer numerics.
WEIGHT_DTYPE = jnp.bfloat16


def _levels_mapper_kernel(counts_ref, x_ref, w_ref, b_ref, o_ref, *, n_pad):
    """One grid step == one Mapper (PixelNorm + N_LAYERS EqualLinear + fused leaky-relu).

    counts_ref : (3,) int32 SMEM      true style count per mapper (PixelNorm denominator)
    x_ref      : (1, B, n_pad, D)     zero-padded style slice of this mapper
    w_ref      : (1, 4, D, D) bf16    all 4 weights, pre-transposed (in,out), EQ_SCALE folded
    b_ref      : (1, 4, 1, D) f32     all 4 biases, lr_mul folded
    o_ref      : (1, B, n_pad, D)     output (padded rows are garbage; wrapper slices them off)
    """
    m = pl.program_id(0)
    _, b_sz, _, d = x_ref.shape

    x = x_ref[0].astype(jnp.float32)                               # (B, n_pad, D)

    # PixelNorm over the style axis (PyTorch dim=1 of the (B, Ni, D) slice -- exactly what
    # the reference module computes on a 3-D input).  Padded rows are zero, so rescaling
    # the mean's denominator to the true style count makes the padding exact.
    corr = jnp.float32(n_pad) / counts_ref[m].astype(jnp.float32)
    ms = jnp.mean(x * x, axis=1, keepdims=True) * corr             # (B, 1, D)
    h = (x * jax.lax.rsqrt(ms + 1e-8)).reshape(b_sz * n_pad, d)    # (B*n_pad, D) f32

    # 4x (EqualLinear + fused leaky-relu), unrolled.  Weights already carry the transpose
    # and EQ_SCALE fold, so the MXU consumes them straight from VMEM; only the tiny
    # activation is cast to the weight dtype.  One dense dot per layer.
    for l in range(N_LAYERS):
        w = w_ref[0, l]                                            # (D, D) bf16
        b = b_ref[0, l].astype(jnp.float32)                        # (1, D)
        y = jnp.dot(h.astype(w.dtype), w,
                    preferred_element_type=jnp.float32) + b        # (B*n_pad, D) f32
        h = jnp.where(y >= 0.0, y, NEG_SLOPE * y) * ACT_SCALE

    o_ref[...] = h.reshape(1, b_sz, n_pad, d).astype(o_ref.dtype)


def _run_levels_mapper(counts, x_stacked, w_stack, b_stack):
    """counts: (3,) i32. x_stacked: (3,B,n_pad,D). w_stack: (3,4,D,D). b_stack: (3,4,1,D)."""
    n_map, batch, n_pad, d = x_stacked.shape
    n_layers = w_stack.shape[1]
    return pl.pallas_call(
        functools.partial(_levels_mapper_kernel, n_pad=n_pad),
        out_shape=jax.ShapeDtypeStruct((n_map, batch, n_pad, d), x_stacked.dtype),
        grid_spec=pltpu.PrefetchScalarGridSpec(
            num_scalar_prefetch=1,
            grid=(n_map,),
            in_specs=[
                pl.BlockSpec((1, batch, n_pad, d), lambda m, counts: (m, 0, 0, 0)),
                pl.BlockSpec((1, n_layers, d, d), lambda m, counts: (m, 0, 0, 0)),  # 2 MiB/mapper
                pl.BlockSpec((1, n_layers, 1, d), lambda m, counts: (m, 0, 0, 0)),  # 8 KiB/mapper
            ],
            out_specs=pl.BlockSpec((1, batch, n_pad, d), lambda m, counts: (m, 0, 0, 0)),
        ),
        compiler_params=pltpu.CompilerParams(
            dimension_semantics=("parallel",),   # independent mappers; v7x megacore split
        ),
    )(counts, x_stacked, w_stack, b_stack)


def prepare_levels_mapper_params(raw_params, weight_dtype=WEIGHT_DTYPE):
    """One-time parameter prep (module-init analog -- NOT in the per-call path).

    raw_params: {"coarse"|"medium"|"fine": (list of 4 (out,in) weights as stored by the
    PyTorch module (randn(out,in)/lr_mul), list of 4 (out,) biases)}.
    Returns (w_stack, b_stack) with transpose + EQ_SCALE + lr_mul folds done once.
    """
    names = ("coarse", "medium", "fine")
    w_stack = jnp.stack([
        jnp.stack([(w.T * EQ_SCALE).astype(weight_dtype) for w in raw_params[n][0]])
        for n in names])                                           # (3, 4, D, D)
    b_stack = jnp.stack([
        jnp.stack([(b * LR_MUL).reshape(1, -1).astype(jnp.float32) for b in raw_params[n][1]])
        for n in names])                                           # (3, 4, 1, D)
    return w_stack, b_stack


@jax.jit
def levels_mapper_forward(x, w_stack, b_stack):
    """x: (B, N, 512) with N >= 9.  One fused pallas_call for all three mappers."""
    _, n, _ = x.shape
    spans = ((0, 4), (4, 8), (8, n))
    counts = tuple(hi - lo for lo, hi in spans)
    n_pad = max(8, ((max(counts) + 7) // 8) * 8)    # sublane-aligned common style count
    x_stacked = jnp.stack([
        jnp.pad(x[:, lo:hi, :], ((0, 0), (0, n_pad - (hi - lo)), (0, 0)))
        for lo, hi in spans])                                      # (3, B, n_pad, D)
    counts_arr = jnp.asarray(counts, dtype=jnp.int32)
    out_pad = _run_levels_mapper(counts_arr, x_stacked, w_stack, b_stack)
    return jnp.concatenate([out_pad[i, :, :c, :] for i, c in enumerate(counts)], axis=1)


# ----------------------------- pure-JAX references ------------------------------------
def _reference_levels_mapper(x, raw_params):
    """Faithful f32 mirror of the PyTorch LevelsMapper (raw weights, scale applied in f32)."""
    def mapper(h, ws, bs):
        h = h * jax.lax.rsqrt(jnp.mean(h * h, axis=1, keepdims=True) + 1e-8)   # PixelNorm dim=1
        for w, b in zip(ws, bs):
            y = jnp.einsum("bnd,od->bno", h, w * EQ_SCALE,
                           precision=jax.lax.Precision.HIGHEST)
            y = y + (b * LR_MUL)[None, None, :]
            h = jnp.where(y >= 0.0, y, NEG_SLOPE * y) * ACT_SCALE
        return h
    n = x.shape[1]
    return jnp.concatenate([mapper(x[:, 0:4, :], *raw_params["coarse"]),
                            mapper(x[:, 4:8, :], *raw_params["medium"]),
                            mapper(x[:, 8:n, :], *raw_params["fine"])], axis=1)


def _reference_from_prepped(x, w_stack, b_stack):
    """Same math but from the prepped (bf16-stored) weights -- isolates kernel error."""
    def mapper(h, ws, bs):
        h = h * jax.lax.rsqrt(jnp.mean(h * h, axis=1, keepdims=True) + 1e-8)
        for i in range(ws.shape[0]):
            y = jnp.einsum("bnd,do->bno", h, ws[i].astype(jnp.float32),
                           precision=jax.lax.Precision.HIGHEST)
            y = y + bs[i][None]
            h = jnp.where(y >= 0.0, y, NEG_SLOPE * y) * ACT_SCALE
        return h
    n = x.shape[1]
    return jnp.concatenate([mapper(x[:, 0:4, :], w_stack[0], b_stack[0]),
                            mapper(x[:, 4:8, :], w_stack[1], b_stack[1]),
                            mapper(x[:, 8:n, :], w_stack[2], b_stack[2])], axis=1)


if __name__ == "__main__":
    B, N = 2, 18        # W+ latent: 18 styles of 512 (coarse 4 / medium 4 / fine 10)
    key = jax.random.PRNGKey(0)
    k_x, k_p = jax.random.split(key)
    x = jax.random.normal(k_x, (B, N, LATENT_DIM), dtype=jnp.float32)

    # Parameters as in the PyTorch __init__ (weight = randn(out, in) / lr_mul).  The module
    # initializes biases to zero; use small random biases here so the bias path is exercised.
    raw_params = {}
    pkeys = jax.random.split(k_p, 3 * N_LAYERS * 2)
    ki = 0
    for name in ("coarse", "medium", "fine"):
        ws, bs = [], []
        for _ in range(N_LAYERS):
            ws.append(jax.random.normal(pkeys[ki], (LATENT_DIM, LATENT_DIM),
                                        dtype=jnp.float32) / LR_MUL)
            bs.append(jax.random.normal(pkeys[ki + 1], (LATENT_DIM,), dtype=jnp.float32))
            ki += 2
        raw_params[name] = (ws, bs)

    # One-time prep (init-time): transpose + EQ_SCALE / lr_mul folds + bf16 cast + stacking.
    w_stack, b_stack = prepare_levels_mapper_params(raw_params)

    out = jax.block_until_ready(levels_mapper_forward(x, w_stack, b_stack))
    assert out.shape == (B, N, LATENT_DIM)

    # (1) vs a reference using the identically-quantized (bf16-stored) weights: isolates
    #     kernel correctness; only the tiny bf16 cast of the activation differs.
    ref_q = _reference_from_prepped(x, w_stack, b_stack)
    assert jnp.allclose(out, ref_q, atol=2e-2, rtol=2e-2), "mismatch vs prepped-weight reference"

    # (2) vs the faithful f32 PyTorch-equivalent reference; tolerance covers bf16 weight
    #     storage (~0.4% relative per value, 4 layers deep).
    ref = _reference_levels_mapper(x, raw_params)
    assert jnp.allclose(out, ref, atol=5e-2, rtol=5e-2), "mismatch vs f32 reference"

    print("KERNEL_OK")
</pallas_src>

<mosaic_0001>
module attributes {stable_mosaic.version = 11 : i64} {
  func.func @_levels_mapper_kernel(%arg0: i32, %arg1: memref<3xi32, #tpu.memory_space<smem>>, %arg2: memref<1x2x16x512xf32, #tpu.memory_space<vmem>>, %arg3: memref<1x4x512x512xbf16, #tpu.memory_space<vmem>>, %arg4: memref<1x4x1x512xf32, #tpu.memory_space<vmem>>, %arg5: memref<1x2x16x512xf32, #tpu.memory_space<vmem>>) attributes {dimension_semantics = [#tpu.dimension_semantics<parallel>], iteration_bounds = array<i64: 3>, scalar_prefetch = 1 : i64, scratch_operands = 0 : i64, tpu.core_type = #tpu.core_type<tc>, window_params = [{transform_indices = @transform_0, window_bounds = array<i64: 1, 2, 16, 512>}, {transform_indices = @transform_1, window_bounds = array<i64: 1, 4, 512, 512>}, {transform_indices = @transform_2, window_bounds = array<i64: 1, 4, 1, 512>}, {transform_indices = @transform_3, window_bounds = array<i64: 1, 2, 16, 512>}]} {
    %c0 = arith.constant 0 : index
    %c0_0 = arith.constant 0 : index
    %c0_1 = arith.constant 0 : index
    %c0_2 = arith.constant 0 : index
    %0 = vector.load %arg2[%c0, %c0_0, %c0_1, %c0_2] : memref<1x2x16x512xf32, #tpu.memory_space<vmem>>, vector<1x2x16x512xf32>
    %1 = vector.shape_cast %0 : vector<1x2x16x512xf32> to vector<2x16x512xf32>
    %2 = arith.index_cast %arg0 : i32 to index
    %3 = memref.load %arg1[%2] : memref<3xi32, #tpu.memory_space<smem>>
    %4 = arith.sitofp %3 : i32 to f32
    %cst = arith.constant 1.600000e+01 : f32
    %5 = arith.divf %cst, %4 : f32
    %6 = arith.mulf %1, %1 : vector<2x16x512xf32>
    %cst_3 = arith.constant dense<0.000000e+00> : vector<2x512xf32>
    %7 = vector.multi_reduction <add>, %6, %cst_3 [1] : vector<2x16x512xf32> to vector<2x512xf32>
    %8 = vector.shape_cast %7 : vector<2x512xf32> to vector<2x1x512xf32>
    %cst_4 = arith.constant 1.600000e+01 : f32
    %9 = vector.broadcast %cst_4 : f32 to vector<2x1x512xf32>
    %10 = arith.divf %8, %9 : vector<2x1x512xf32>
    %11 = vector.broadcast %5 : f32 to vector<2x1x512xf32>
    %12 = arith.mulf %10, %11 : vector<2x1x512xf32>
    %cst_5 = arith.constant 9.99999993E-9 : f32
    %13 = vector.broadcast %cst_5 : f32 to vector<2x1x512xf32>
    %14 = arith.addf %12, %13 : vector<2x1x512xf32>
    %15 = math.rsqrt %14 : vector<2x1x512xf32>
    %16 = vector.broadcast %15 : vector<2x1x512xf32> to vector<2x16x512xf32>
    %17 = arith.mulf %1, %16 : vector<2x16x512xf32>
    %18 = vector.shape_cast %17 : vector<2x16x512xf32> to vector<32x512xf32>
    %c0_6 = arith.constant 0 : index
    %c0_7 = arith.constant 0 : index
    %c0_8 = arith.constant 0 : index
    %c0_9 = arith.constant 0 : index
    %19 = vector.load %arg3[%c0_6, %c0_7, %c0_8, %c0_9] : memref<1x4x512x512xbf16, #tpu.memory_space<vmem>>, vector<1x1x512x512xbf16>
    %20 = vector.shape_cast %19 : vector<1x1x512x512xbf16> to vector<512x512xbf16>
    %c0_10 = arith.constant 0 : index
    %c0_11 = arith.constant 0 : index
    %c0_12 = arith.constant 0 : index
    %c0_13 = arith.constant 0 : index
    %21 = vector.load %arg4[%c0_10, %c0_11, %c0_12, %c0_13] : memref<1x4x1x512xf32, #tpu.memory_space<vmem>>, vector<1x1x1x512xf32>
    %22 = vector.shape_cast %21 : vector<1x1x1x512xf32> to vector<1x512xf32>
    %23 = arith.truncf %18 : vector<32x512xf32> to vector<32x512xbf16>
    %cst_14 = arith.constant dense<0.000000e+00> : vector<32x512xf32>
    %24 = tpu.matmul %23, %20, %cst_14 {dimension_numbers = #tpu.dot_dimension_numbers<[1], [0], [0], [1], [0, 0, 1, 1], [], []>} : vector<32x512xbf16>, vector<512x512xbf16>, vector<32x512xf32> -> vector<32x512xf32>
    %25 = vector.broadcast %22 : vector<1x512xf32> to vector<32x512xf32>
    %26 = arith.addf %24, %25 : vector<32x512xf32>
    %cst_15 = arith.constant 0.000000e+00 : f32
    %27 = vector.broadcast %cst_15 : f32 to vector<32x512xf32>
    %28 = arith.cmpf oge, %26, %27 : vector<32x512xf32>
    %cst_16 = arith.constant 2.000000e-01 : f32
    %29 = vector.broadcast %cst_16 : f32 to vector<32x512xf32>
    %30 = arith.mulf %29, %26 : vector<32x512xf32>
    %31 = arith.select %28, %26, %30 : vector<32x512xi1>, vector<32x512xf32>
    %cst_17 = arith.constant 1.41421354 : f32
    %32 = vector.broadcast %cst_17 : f32 to vector<32x512xf32>
    %33 = arith.mulf %31, %32 : vector<32x512xf32>
    %c0_18 = arith.constant 0 : index
    %c1 = arith.constant 1 : index
    %c0_19 = arith.constant 0 : index
    %c0_20 = arith.constant 0 : index
    %34 = vector.load %arg3[%c0_18, %c1, %c0_19, %c0_20] : memref<1x4x512x512xbf16, #tpu.memory_space<vmem>>, vector<1x1x512x512xbf16>
    %35 = vector.shape_cast %34 : vector<1x1x512x512xbf16> to vector<512x512xbf16>
    %c0_21 = arith.constant 0 : index
    %c1_22 = arith.constant 1 : index
    %c0_23 = arith.constant 0 : index
    %c0_24 = arith.constant 0 : index
    %36 = vector.load %arg4[%c0_21, %c1_22, %c0_23, %c0_24] : memref<1x4x1x512xf32, #tpu.memory_space<vmem>>, vector<1x1x1x512xf32>
    %37 = vector.shape_cast %36 : vector<1x1x1x512xf32> to vector<1x512xf32>
    %38 = arith.truncf %33 : vector<32x512xf32> to vector<32x512xbf16>
    %cst_25 = arith.constant dense<0.000000e+00> : vector<32x512xf32>
    %39 = tpu.matmul %38, %35, %cst_25 {dimension_numbers = #tpu.dot_dimension_numbers<[1], [0], [0], [1], [0, 0, 1, 1], [], []>} : vector<32x512xbf16>, vector<512x512xbf16>, vector<32x512xf32> -> vector<32x512xf32>
    %40 = vector.broadcast %37 : vector<1x512xf32> to vector<32x512xf32>
    %41 = arith.addf %39, %40 : vector<32x512xf32>
    %cst_26 = arith.constant 0.000000e+00 : f32
    %42 = vector.broadcast %cst_26 : f32 to vector<32x512xf32>
    %43 = arith.cmpf oge, %41, %42 : vector<32x512xf32>
    %cst_27 = arith.constant 2.000000e-01 : f32
    %44 = vector.broadcast %cst_27 : f32 to vector<32x512xf32>
    %45 = arith.mulf %44, %41 : vector<32x512xf32>
    %46 = arith.select %43, %41, %45 : vector<32x512xi1>, vector<32x512xf32>
    %cst_28 = arith.constant 1.41421354 : f32
    %47 = vector.broadcast %cst_28 : f32 to vector<32x512xf32>
    %48 = arith.mulf %46, %47 : vector<32x512xf32>
    %c0_29 = arith.constant 0 : index
    %c2 = arith.constant 2 : index
    %c0_30 = arith.constant 0 : index
    %c0_31 = arith.constant 0 : index
    %49 = vector.load %arg3[%c0_29, %c2, %c0_30, %c0_31] : memref<1x4x512x512xbf16, #tpu.memory_space<vmem>>, vector<1x1x512x512xbf16>
    %50 = vector.shape_cast %49 : vector<1x1x512x512xbf16> to vector<512x512xbf16>
    %c0_32 = arith.constant 0 : index
    %c2_33 = arith.constant 2 : index
    %c0_34 = arith.constant 0 : index
    %c0_35 = arith.constant 0 : index
    %51 = vector.load %arg4[%c0_32, %c2_33, %c0_34, %c0_35] : memref<1x4x1x512xf32, #tpu.memory_space<vmem>>, vector<1x1x1x512xf32>
    %52 = vector.shape_cast %51 : vector<1x1x1x512xf32> to vector<1x512xf32>
    %53 = arith.truncf %48 : vector<32x512xf32> to vector<32x512xbf16>
    %cst_36 = arith.constant dense<0.000000e+00> : vector<32x512xf32>
    %54 = tpu.matmul %53, %50, %cst_36 {dimension_numbers = #tpu.dot_dimension_numbers<[1], [0], [0], [1], [0, 0, 1, 1], [], []>} : vector<32x512xbf16>, vector<512x512xbf16>, vector<32x512xf32> -> vector<32x512xf32>
    %55 = vector.broadcast %52 : vector<1x512xf32> to vector<32x512xf32>
    %56 = arith.addf %54, %55 : vector<32x512xf32>
    %cst_37 = arith.constant 0.000000e+00 : f32
    %57 = vector.broadcast %cst_37 : f32 to vector<32x512xf32>
    %58 = arith.cmpf oge, %56, %57 : vector<32x512xf32>
    %cst_38 = arith.constant 2.000000e-01 : f32
    %59 = vector.broadcast %cst_38 : f32 to vector<32x512xf32>
    %60 = arith.mulf %59, %56 : vector<32x512xf32>
    %61 = arith.select %58, %56, %60 : vector<32x512xi1>, vector<32x512xf32>
    %cst_39 = arith.constant 1.41421354 : f32
    %62 = vector.broadcast %cst_39 : f32 to vector<32x512xf32>
    %63 = arith.mulf %61, %62 : vector<32x512xf32>
    %c0_40 = arith.constant 0 : index
    %c3 = arith.constant 3 : index
    %c0_41 = arith.constant 0 : index
    %c0_42 = arith.constant 0 : index
    %64 = vector.load %arg3[%c0_40, %c3, %c0_41, %c0_42] : memref<1x4x512x512xbf16, #tpu.memory_space<vmem>>, vector<1x1x512x512xbf16>
    %65 = vector.shape_cast %64 : vector<1x1x512x512xbf16> to vector<512x512xbf16>
    %c0_43 = arith.constant 0 : index
    %c3_44 = arith.constant 3 : index
    %c0_45 = arith.constant 0 : index
    %c0_46 = arith.constant 0 : index
    %66 = vector.load %arg4[%c0_43, %c3_44, %c0_45, %c0_46] : memref<1x4x1x512xf32, #tpu.memory_space<vmem>>, vector<1x1x1x512xf32>
    %67 = vector.shape_cast %66 : vector<1x1x1x512xf32> to vector<1x512xf32>
    %68 = arith.truncf %63 : vector<32x512xf32> to vector<32x512xbf16>
    %cst_47 = arith.constant dense<0.000000e+00> : vector<32x512xf32>
    %69 = tpu.matmul %68, %65, %cst_47 {dimension_numbers = #tpu.dot_dimension_numbers<[1], [0], [0], [1], [0, 0, 1, 1], [], []>} : vector<32x512xbf16>, vector<512x512xbf16>, vector<32x512xf32> -> vector<32x512xf32>
    %70 = vector.broadcast %67 : vector<1x512xf32> to vector<32x512xf32>
    %71 = arith.addf %69, %70 : vector<32x512xf32>
    %cst_48 = arith.constant 0.000000e+00 : f32
    %72 = vector.broadcast %cst_48 : f32 to vector<32x512xf32>
    %73 = arith.cmpf oge, %71, %72 : vector<32x512xf32>
    %cst_49 = arith.constant 2.000000e-01 : f32
    %74 = vector.broadcast %cst_49 : f32 to vector<32x512xf32>
    %75 = arith.mulf %74, %71 : vector<32x512xf32>
    %76 = arith.select %73, %71, %75 : vector<32x512xi1>, vector<32x512xf32>
    %cst_50 = arith.constant 1.41421354 : f32
    %77 = vector.broadcast %cst_50 : f32 to vector<32x512xf32>
    %78 = arith.mulf %76, %77 : vector<32x512xf32>
    %79 = vector.shape_cast %78 : vector<32x512xf32> to vector<1x2x16x512xf32>
    %c0_51 = arith.constant 0 : index
    %c0_52 = arith.constant 0 : index
    %c0_53 = arith.constant 0 : index
    %c0_54 = arith.constant 0 : index
    %80 = vector.load %arg5[%c0_51, %c0_52, %c0_53, %c0_54] : memref<1x2x16x512xf32, #tpu.memory_space<vmem>>, vector<1x2x16x512xf32>
    tpu.vector_store %arg5[%c0_51, %c0_52, %c0_53, %c0_54], %79 {strides = array<i32>} : memref<1x2x16x512xf32, #tpu.memory_space<vmem>>, vector<1x2x16x512xf32>,
    return
  }
  func.func @transform_0(%arg0: i32, %arg1: memref<3xi32, #tpu.memory_space<smem>>) -> (i32, i32, i32, i32) {
    %c0_i32 = arith.constant 0 : i32
    %c0_i32_0 = arith.constant 0 : i32
    %c0_i32_1 = arith.constant 0 : i32
    %c0_i32_2 = arith.constant 0 : i32
    return %arg0, %c0_i32, %c0_i32_0, %c0_i32_1 : i32, i32, i32, i32
  }
  func.func @transform_1(%arg0: i32, %arg1: memref<3xi32, #tpu.memory_space<smem>>) -> (i32, i32, i32, i32) {
    %c0_i32 = arith.constant 0 : i32
    %c0_i32_0 = arith.constant 0 : i32
    %c0_i32_1 = arith.constant 0 : i32
    %c0_i32_2 = arith.constant 0 : i32
    return %arg0, %c0_i32, %c0_i32_0, %c0_i32_1 : i32, i32, i32, i32
  }
  func.func @transform_2(%arg0: i32, %arg1: memref<3xi32, #tpu.memory_space<smem>>) -> (i32, i32, i32, i32) {
    %c0_i32 = arith.constant 0 : i32
    %c0_i32_0 = arith.constant 0 : i32
    %c0_i32_1 = arith.constant 0 : i32
    %c0_i32_2 = arith.constant 0 : i32
    return %arg0, %c0_i32, %c0_i32_0, %c0_i32_1 : i32, i32, i32, i32
  }
  func.func @transform_3(%arg0: i32, %arg1: memref<3xi32, #tpu.memory_space<smem>>) -> (i32, i32, i32, i32) {
    %c0_i32 = arith.constant 0 : i32
    %c0_i32_0 = arith.constant 0 : i32
    %c0_i32_1 = arith.constant 0 : i32
    %c0_i32_2 = arith.constant 0 : i32
    return %arg0, %c0_i32, %c0_i32_0, %c0_i32_1 : i32, i32, i32, i32
  }
}

</mosaic_0001>

<bundles_post_ra>
// kernel: levels_mapper_forward.1
= control target key start
LH: loop header
LB: loop body
LE: loop exit
PB: predicated region body
PF: predicated region fallthrough
CT: control target
= control target key end

     0   :  { %s8391_s18 = smov [#allocation3]   ;;  %s10389_s0 = inlined_call_operand.hbm [shape: s32[3], index: 0, kind: input, shape index: {}]   ;;  %s10390_s1 = inlined_call_operand.vmem [shape: f32[3,2,16,512], index: 1, kind: input, shape index: {}]   ;;  %s10391_s2 = inlined_call_operand.hbm [shape: bf16[3,4,512,512], index: 2, kind: input, shape index: {}]   ;;  %s10392_s3 = inlined_call_operand.hbm [shape: f32[3,4,1,512], index: 3, kind: input, shape index: {}]   ;;  %s10393_s4 = inlined_call_operand.vmem [shape: f32[3,2,16,512], index: 4, kind: output, shape index: {}]  }
   0x1   :  { %s10_s17 = sshll.u32 %s10389_s0, 4  ;;  %s11_s17 = int_to_ptr.hbm [resolvable:$true] %s10_s17 }
   0x2   :  { %13 = dma.hbm_to_smem %s11_s17, 16, %s8391_s18, [#allocation2] }
   0x3   :  { %8365 = dma.done.wait [#allocation2], 16 }
   0x4   :  { %8366 = vsyncadd [#allocation2], 4294967280 }
   0x5   :  { %16 = sfence }
   0x6   :  { %17 = vsyncpa [#allocation5], 0 }
   0x7   :  { %19 = vsyncpa [#allocation5 + $0x1], 0 }
   0x8   :  { %20 = vsyncpa [#allocation7], 0 }
   0x9   :  { %22 = vsyncpa [#allocation7 + $0x1], 0  ;;  %s8425_s19 = smov 0   ;;  %s8427_s20 = smov 0  }
   0xa   :  { %s8429_s21 = smov 0   ;;  %s8431_s22 = smov 0  }
   0xb LB: > { %s8444_s0 = sadd.s32 4294967295, %s8389_s22   ;;  %s8447_s23 = sadd.s32 1, %s8389_s22   ;;  %s8389_s22 = sphi %s8431_s22, %s10407_s22   ;;  %s8385_s21 = sphi %s8429_s21, %s10406_s21   ;;  %s8381_s20 = sphi %s8427_s20, %s10405_s20   ;;  %s8377_s19 = sphi %s8425_s19, %s10404_s19  }
   0xc   : > { %s58_s24 = ssub.s32 %s8389_s22, %s8447_s23  ;;  %s61_s25 = sadd.s32 1, %s8385_s21 }
   0xd   : > { %p59_p0 = scmp.eq.s32.totalorder %s58_s24, 0  ;;  %p68_p1 = scmp.ne.s32.totalorder %s8385_s21, %s8381_s20 }
   0xe   : > { %p69_p2 = scmp.eq.s32.totalorder %s8389_s22, 0  ;;  %p74_p3 = scmp.ne.s32.totalorder %s8381_s20, %s8377_s19 }
   0xf   : > { %s8457_s26 = scalar_select %p59_p0, %s8385_s21, %s61_s25  }
  0x10   : > { %p8459_p4 = por %p69_p2, %p68_p1  ;;  %p75_p5 = scmp.eq.s32.totalorder %s8444_s0, 0 }
  0x11   : > { %p8218_p6 = scmp.lt.s32.totalorder %s8389_s22, 3  ;;  %s8470_s29 = sand.u32 1, %s8385_s21  }
  0x12   : > { %p8465_p7 = por %p75_p5, %p74_p3  ;;  %s5241_s30 = sshll.u32 %s8470_s29, 12 }
  0x13   : > { %s7690_s5 = sshll.u32 %s8389_s22, 12  ;;  %s162_s9 = scalar_lea.vmem [#allocation4], %s5241_s30 }
  0x14   : > { %s167_s8 = scalar_lea.hbm %s10391_s2, %s7690_s5  ;;  %s170_s10 = sshll.u32 %s162_s9, 4  ;;  %s171_s10 = int_to_ptr.vmem [resolvable:$true] %s170_s10 }
  0x15   : > { %s168_s11 = sshll.u32 %s167_s8, 4  ;;  %p8479_p8 = pnand %p8218_p6, %p8459_p4  ;;  %s169_s11 = int_to_ptr.hbm [resolvable:$true] %s168_s11 }
  0x16   : > { %p5246_p9 = scmp.ge.s32.totalorder %s8389_s22, 1  ;;  %s159_s13 = scalar_lea.sflag [#allocation5], %s8470_s29 }
  0x17   : > { %s8289_s14 = sshra.s32 %s169_s11, 4  ;;  %p8293_p11 = pneg %p8479_p8  ;;  %s8290_s14 = int_to_ptr.hbm [resolvable:$true] %s8289_s14 }
  0x18   : > { %s8291_s15 = scalar_lea.hbm %s8290_s14, 4096  ;;  %s8296_s18 = scalar_lea.hbm %s10391_s2, 12288 }
  0x19   : > { %p8292_p10 = scmp.ne.s32.totalorder %s8290_s14, %s8291_s15  ;;  %p8297_p0 = scmp.lt.s32.totalorder %s8290_s14, %s10391_s2 }
  0x1a   : > { %p8298_p1 = scmp.lt.s32.totalorder %s8296_s18, %s8291_s15 }
  0x1b   : > { %p8294_p12 = pnand %p8293_p11, %p8292_p10 }
  0x1c   : > { %p8299_p2 = por %p8298_p1, %p8297_p0 }
  0x1d   : > { %p8295_p13 = pneg %p8294_p12 }
  0x1f   : > { %p8300_p3 = pnand %p8299_p2, %p8295_p13 }
  0x21   : > { %8303 = shalt.err (!%p8300_p3)
}
  0x22   : > { %s8392_s25 = smov 256   ;;  %s8393_s27 = smov 16  }
  0x23   : > { %8214 = dma.hbm_to_vmem [thread:$0]  (!%p8479_p8), %s169_s11, 65536, %s171_s10, %s159_s13, %s8392_s25, %s8392_s25, %s8393_s27  }
  0x24   : > { %p199_p4 = scmp.lt.s32.totalorder %s8389_s22, 4  ;;  %s5244_s30 = sshll.u32 %s8470_s29, 4 }
  0x25   : > { %s5245_s5 = sshll.u32 %s8389_s22, 4  ;;  %s184_s14 = scalar_lea.vmem [#allocation6], %s5244_s30 }
  0x26   : > { %p8503_p5 = pnand %p5246_p9, %p199_p4  ;;  %s188_s9 = scalar_lea.hbm %s10392_s3, %s5245_s5 }
  0x27   : > { %s191_s15 = sshll.u32 %s184_s14, 4  ;;  %s189_s16 = sshll.u32 %s188_s9, 4  ;;  %s192_s15 = int_to_ptr.vmem [resolvable:$true] %s191_s15  ;;  %s190_s16 = int_to_ptr.hbm [resolvable:$true] %s189_s16 }
  0x28   : > { %s181_s17 = scalar_lea.sflag [#allocation7], %s8470_s29  ;;  %s8319_s10 = sshra.s32 %s190_s16, 4  ;;  %s8320_s10 = int_to_ptr.hbm [resolvable:$true] %s8319_s10 }
  0x29   : > { %s8321_s11 = scalar_lea.hbm %s8320_s10, 16  ;;  %s8326_s18 = scalar_lea.hbm %s10392_s3, 48 }
  0x2a   : > { %p8322_p6 = scmp.ne.s32.totalorder %s8320_s10, %s8321_s11  ;;  %p8327_p12 = scmp.lt.s32.totalorder %s8320_s10, %s10392_s3 }
  0x2b   : > { %p8328_p13 = scmp.lt.s32.totalorder %s8326_s18, %s8321_s11 }
  0x2c   : > { %p8324_p9 = pnand %p8322_p6, %p8293_p11 }
  0x2d   : > { %p8329_p0 = por %p8328_p13, %p8327_p12 }
  0x2e   : > { %p8325_p10 = pneg %p8324_p9 }
  0x30   : > { %p8330_p1 = pnand %p8329_p0, %p8325_p10 }
  0x32   : > { %8333 = shalt.err (!%p8330_p1)
}
  0x33   : > { %s8394_s29 = smov 64   ;;  %s8395_s25 = smov 4  }
  0x34   : > { %8217 = dma.hbm_to_vmem [thread:$0]  (!%p8479_p8), %s190_s16, 256, %s192_s15, %s181_s17, %s8394_s29, %s8394_s29, %s8395_s25  }
  0x35   : > { %203 = sbr.rel (%p8503_p5) target bundleno = 1166 (0x48e), region = 32  ;;  %s205_s27 = sand.u32 (!%p8503_p5), 1, %s8381_s20  }
  0x36   : > { %s5247_s30 = sshll.u32 (!%p8503_p5), %s205_s27, 12  ;;  %s206_s5 = scalar_lea.sflag (!%p8503_p5), [#allocation5], %s205_s27 }
  0x37   : > { %s8525_s7 = scalar_lea.vmem (!%p8503_p5), [#allocation4], %s5247_s30 }
  0x3a   : > { %8368 = dma.done.wait (%p8465_p7), %s206_s5, 65536  }
  0x3b   : > { %8370 = vsyncadd (%p8465_p7), %s206_s5, 4294901760  ;;  %s5248_s8 = sshll.u32 %s205_s27, 4  ;;  %s216_s9 = scalar_lea.sflag [#allocation7], %s205_s27 }
  0x3c   : > { %s8531_s12 = scalar_lea.vmem [#allocation6], %s5248_s8 }
  0x3d   : > { %8372 = dma.done.wait (%p8465_p7), %s216_s9, 256  }
  0x3e   : > { %8374 = vsyncadd (%p8465_p7), %s216_s9, 4294967040  ;;  %s279_s6 = sld [smem:[#allocation3 + %s8444_s0]]  ;;  %v5367_v0 = vld [vmem:[%s8525_s7 + $0xe0] sm:$0xf]  ;;  %v7723_v1 = vld [vmem:[%s8525_s7 + $0xec] sm:$0xf0] }
  0x3f   : > { %v5495_v2 = vld [vmem:[%s8525_s7 + $0x1e0] sm:$0xf]  ;;  %v5368_v3 = vor.u32 %v7723_v1, %v5367_v0  ;;  %v7755_v4 = vld [vmem:[%s8525_s7 + $0x1ec] sm:$0xf0]  ;;  %p253_p7 = scmp.lt.s32.totalorder %s8444_s0, 2  ;;  %v8396_v28 = vmov 16.0  }
  0x40   : > { %v5623_v5 = vld [vmem:[%s8525_s7 + $0x2e0] sm:$0xf]  ;;  %v7787_v6 = vld [vmem:[%s8525_s7 + $0x2ec] sm:$0xf0]  ;;  %v5496_v8 = vor.u32 %v7755_v4, %v5495_v2 }
  0x41   : > { %v5624_v9 = vor.u32 %v7787_v6, %v5623_v5  ;;  %v5751_v10 = vld [vmem:[%s8525_s7 + $0x3e0] sm:$0xf]  ;;  %v7819_v11 = vld [vmem:[%s8525_s7 + $0x3ec] sm:$0xf0]  ;;  %1284 = vmatpush.bf16.msra.mxu0 %v5368_v3  ;;  %s10409_s0 = smov (!%p253_p7, %s8444_s0), 2 }
  0x42   : > { %1303 = vmatpush.bf16.msra.mxu1 %v5496_v8  ;;  %v5752_v12 = vor.u32 %v7819_v11, %v5751_v10  ;;  %s7691_s28 = sshll.u32 %s10409_s0, 7  ;;  %v5351_v1 = vld [vmem:[%s8525_s7 + $0xc0] sm:$0xf]  ;;  %v7719_v2 = vld [vmem:[%s8525_s7 + $0xcc] sm:$0xf0] }
  0x43   : > { %1322 = vmatpush.bf16.msra.mxu2 %v5624_v9  ;;  %s8556_s17 = scalar_lea.vmem %s10390_s1, %s7691_s28  ;;  %v5479_v3 = vld [vmem:[%s8525_s7 + $0x1c0] sm:$0xf]  ;;  %v5352_v4 = vor.u32 %v7719_v2, %v5351_v1  ;;  %v7751_v5 = vld [vmem:[%s8525_s7 + $0x1cc] sm:$0xf0]  ;;  %s10355_s18 = scalar_lea.vmem %s10393_s4, %s7691_s28 }
  0x44   : > { %s280_s14 = scvt.s32.f32 %s279_s6  ;;  %1341 = vmatpush.bf16.msra.mxu3 %v5752_v12  ;;  %v8559_v23 = vld [vmem:[%s8556_s17] sm:$0xff]  ;;  %v8565_v25 = vld [vmem:[%s8556_s17 + $0x8] sm:$0xff]  ;;  %v8579_v32 = vld [vmem:[%s8556_s17 + $0x10] sm:$0xff]  ;;  %v5480_v8 = vor.u32 %v7751_v5, %v5479_v3 }
  0x45   : > { %v8562_v24 = vld [vmem:[%s8556_s17 + $0x20] sm:$0xff]  ;;  %v298_v26 = vmul.f32 %v8559_v23, %v8559_v23  ;;  %v8572_v29 = vld [vmem:[%s8556_s17 + $0x28] sm:$0xff]  ;;  %v299_v30 = vmul.f32 %v8565_v25, %v8565_v25  ;;  %v8582_v33 = vld [vmem:[%s8556_s17 + $0x30] sm:$0xff]  ;;  %v300_v40 = vmul.f32 %v8579_v32, %v8579_v32  ;;  %1285 = vmatpush.bf16.msra.mxu0 %v5352_v4 }
  0x46   : > { %v281_v7 = vstv %s280_s14  ;;  %v302_v27 = vmul.f32 %v8562_v24, %v8562_v24  ;;  %v303_v31 = vmul.f32 %v8572_v29, %v8572_v29  ;;  %v8585_v34 = vld [vmem:[%s8556_s17 + $0x18] sm:$0xff]  ;;  %v8591_v37 = vld [vmem:[%s8556_s17 + $0x40] sm:$0xff]  ;;  %v304_v41 = vmul.f32 %v8582_v33, %v8582_v33  ;;  %v8609_v47 = vld [vmem:[%s8556_s17 + $0x48] sm:$0xff]  ;;  %1304 = vmatpush.bf16.msra.mxu1 %v5480_v8 }
  0x47   : > { %8257 = vrcp.f32 %v281_v7  ;;  %v293_v15 = vand.u32 2147483648, %v281_v7  ;;  %vm287_vm0 = vweird.f32 %v281_v7  ;;  %v291_v17 = vand.u32 2147483647, %v281_v7  ;;  %v8588_v36 = vld [vmem:[%s8556_s17 + $0x38] sm:$0xff]  ;;  %v8594_v38 = vld [vmem:[%s8556_s17 + $0x60] sm:$0xff]  ;;  %v8612_v48 = vld [vmem:[%s8556_s17 + $0x68] sm:$0xff] }
  0x48   : > { %8259 = vrcp.f32 %v8396_v28  ;;  %v314_v35 = vadd.f32 %v302_v27, %v298_v26  ;;  %v321_v39 = vadd.f32 %v303_v31, %v299_v30  ;;  %v301_v42 = vmul.f32 %v8585_v34, %v8585_v34  ;;  %v5607_v6 = vld [vmem:[%s8525_s7 + $0x2c0] sm:$0xf]  ;;  %v7815_v11 = vld [vmem:[%s8525_s7 + $0x3cc] sm:$0xf0] }
  0x49   : > { %v294_v19 = vor.u32 1.1754944e-38, %v293_v15  ;;  %vm292_vm3 = vcmp.eq.f32.partialorder %v291_v17, 8.507059e+37  ;;  %v305_v44 = vmul.f32 %v8588_v36, %v8588_v36  ;;  %v306_v45 = vmul.f32 %v8591_v37, %v8591_v37  ;;  %v5735_v10 = vld [vmem:[%s8525_s7 + $0x3c0] sm:$0xf]  ;;  %v7811_v28 = vld [vmem:[%s8525_s7 + $0x3ac] sm:$0xf0] }
  0x4a   : > { %v315_v43 = vrot.slane %v314_v35, 4  ;;  %v310_v46 = vmul.f32 %v8594_v38, %v8594_v38  ;;  %v322_v50 = vrot.slane %v321_v39, 4  ;;  %v8616_v51 = vadd.f32 %v304_v41, %v300_v40  ;;  %v5335_v15 = vld [vmem:[%s8525_s7 + $0xa0] sm:$0xf]  ;;  %v7743_v40 = vld [vmem:[%s8525_s7 + $0x18c] sm:$0xf0] }
  0x4b   : > { %v307_v52 = vmul.f32 %v8609_v47, %v8609_v47  ;;  %v311_v53 = vmul.f32 %v8612_v48, %v8612_v48  ;;  %v8627_v56 = vadd.f32 %v305_v44, %v301_v42  ;;  %v5463_v17 = vld [vmem:[%s8525_s7 + $0x1a0] sm:$0xf]  ;;  %v8663_v41 = vld [vmem:[%s8556_s17 + $0x50] sm:$0xff] }
  0x4c   : > { %v8622_v54 = vadd.f32 %v315_v43, %v314_v35  ;;  %v8629_v57 = vadd.f32 %v310_v46, %v306_v45  ;;  %v8631_v58 = vadd.f32 %v322_v50, %v321_v39  ;;  %v329_v59 = vrot.slane %v8616_v51, 4  ;;  %v5719_v27 = vld [vmem:[%s8525_s7 + $0x3a0] sm:$0xf]  ;;  %v7711_v35 = vld [vmem:[%s8525_s7 + $0x8c] sm:$0xf0]  ;;  %v8669_v43 = vld [vmem:[%s8556_s17 + $0x58] sm:$0xff] }
  0x4d   : > { %v8258_v13 = vpop.eup %8257  ;;  %v8634_v60 = vadd.f32 %v311_v53, %v307_v52  ;;  %v336_v63 = vrot.slane %v8627_v56, 4  ;;  %v5319_v30 = vld [vmem:[%s8525_s7 + $0x80] sm:$0xf]  ;;  %v5720_v31 = vor.u32 %v7811_v28, %v5719_v27  ;;  %v8666_v42 = vld [vmem:[%s8556_s17 + $0x70] sm:$0xff]  ;;  %v8675_v52 = vld [vmem:[%s8556_s17 + $0x78] sm:$0xff] }
  0x4e   : > { %v283_v14 = vmul.f32 %v8258_v13, %v281_v7  ;;  %vm288_vm1 = vweird.f32 %v8258_v13  ;;  %v8614_v49 = vpop.eup %8259  ;;  %v317_v61 = vrot.slane %v8622_v54, 2  ;;  %v343_v0 = vrot.slane %v8629_v57, 4  ;;  %v7783_v7 = vld [vmem:[%s8525_s7 + $0x2cc] sm:$0xf0]  ;;  %v5447_v39 = vld [vmem:[%s8525_s7 + $0x180] sm:$0xf] }
  0x4f   : > { %vm289_vm2 = vmor %vm287_vm0, %vm288_vm1  ;;  %v8625_v55 = vmul.f32 16.0, %v8614_v49  ;;  %v5608_v9 = vor.u32 %v7783_v7, %v5607_v6  ;;  %v324_v12 = vrot.slane %v8631_v58, 2  ;;  %v5320_v44 = vor.u32 %v7711_v35, %v5319_v30  ;;  %v5575_v45 = vld [vmem:[%s8525_s7 + $0x280] sm:$0xf]  ;;  %v7775_v46 = vld [vmem:[%s8525_s7 + $0x28c] sm:$0xf0] }
  0x50   : > { %v284_v16 = vsub.f32 1.0, %v283_v14  ;;  %v5736_v14 = vor.u32 %v7815_v11, %v5735_v10  ;;  %v5703_v50 = vld [vmem:[%s8525_s7 + $0x380] sm:$0xf]  ;;  %v5448_v53 = vor.u32 %v7743_v40, %v5447_v39  ;;  %v5576_v1 = vor.u32 %v7775_v46, %v5575_v45  ;;  %v7807_v2 = vld [vmem:[%s8525_s7 + $0x38c] sm:$0xf0] }
  0x51   : > { %v372_v62 = vsub.f32 1.0, %v8625_v55  ;;  %1323 = vmatpush.bf16.msra.mxu2 %v5608_v9  ;;  %v5303_v3 = vld [vmem:[%s8525_s7 + $0x60] sm:$0xf]  ;;  %v7707_v4 = vld [vmem:[%s8525_s7 + $0x6c] sm:$0xf0]  ;;  %v5704_v5 = vor.u32 %v7807_v2, %v5703_v50  ;;  %v8709_v35 = vadd.f32 %v317_v61, %v8622_v54  ;;  %v8717_v46 = vadd.f32 %v324_v12, %v8631_v58 }
  0x52   : > { %v285_v18 = vmul.f32 %v8258_v13, %v284_v16  ;;  %v7715_v16 = vld [vmem:[%s8525_s7 + $0xac] sm:$0xf0]  ;;  %1342 = vmatpush.bf16.msra.mxu3 %v5736_v14  ;;  %v5431_v6 = vld [vmem:[%s8525_s7 + $0x160] sm:$0xf]  ;;  %v330_v14 = vadd.f32 %v329_v59, %v8616_v51  ;;  %vm375_vm4 = vweird.f32 %v8614_v49 }
  0x53   : > { %v7739_v7 = vld [vmem:[%s8525_s7 + $0x16c] sm:$0xf0]  ;;  %v5559_v8 = vld [vmem:[%s8525_s7 + $0x260] sm:$0xf] }
  0x54   : > { %v286_v20 = vadd.f32 %v8258_v13, %v285_v18  ;;  %v5336_v18 = vor.u32 %v7715_v16, %v5335_v15  ;;  %v7771_v9 = vld [vmem:[%s8525_s7 + $0x26c] sm:$0xf0]  ;;  %v5687_v10 = vld [vmem:[%s8525_s7 + $0x360] sm:$0xf]  ;;  %v337_v15 = vadd.f32 %v336_v63, %v8627_v56  ;;  %v5304_v16 = vor.u32 %v7707_v4, %v5303_v3 }
  0x55   : > { %v7803_v11 = vld [vmem:[%s8525_s7 + $0x36c] sm:$0xf0]  ;;  %v5432_v51 = vor.u32 %v7739_v7, %v5431_v6  ;;  %v5560_v56 = vor.u32 %v7771_v9, %v5559_v8  ;;  %v5287_v59 = vld [vmem:[%s8525_s7 + $0x40] sm:$0xf]  ;;  %v331_v39 = vrot.slane %v330_v14, 2  ;;  %v319_v6 = vrot.slane %v8709_v35, 1 }
  0x56   : > { %v290_v21 = vsel %vm289_vm2, %v8258_v13, %v286_v20  ;;  %v350_v13 = vrot.slane %v8634_v60, 4  ;;  %v5591_v20 = vld [vmem:[%s8525_s7 + $0x2a0] sm:$0xf]  ;;  %1286 = vmatpush.bf16.msra.mxu0 %v5336_v18  ;;  %1343 = vmatpush.bf16.msra.mxu3 %v5720_v31  ;;  %v312_v18 = vmul.f32 %v8666_v42, %v8666_v42  ;;  %v7703_v63 = vld [vmem:[%s8525_s7 + $0x4c] sm:$0xf0]  ;;  %v338_v40 = vrot.slane %v337_v15, 2 }
  0x57   : > { %v295_v22 = vsel %vm292_vm3, %v294_v19, %v290_v21  ;;  %v7747_v19 = vld [vmem:[%s8525_s7 + $0x1ac] sm:$0xf0]  ;;  %v5543_v27 = vld [vmem:[%s8525_s7 + $0x240] sm:$0xf]  ;;  %v5288_v45 = vor.u32 %v7703_v63, %v5287_v59  ;;  %v332_v7 = vadd.f32 %v331_v39, %v330_v14 }
  0x58   : > { %8205 = vpush %v295_v22  ;;  %v7779_v21 = vld [vmem:[%s8525_s7 + $0x2ac] sm:$0xf0]  ;;  %v5464_v22 = vor.u32 %v7747_v19, %v5463_v17  ;;  %v308_v17 = vmul.f32 %v8663_v41, %v8663_v41  ;;  %v309_v19 = vmul.f32 %v8669_v43, %v8669_v43  ;;  %v5671_v30 = vld [vmem:[%s8525_s7 + $0x340] sm:$0xf]  ;;  %v351_v54 = vadd.f32 %v350_v13, %v8634_v60 }
  0x59   : > { %v5592_v26 = vor.u32 %v7779_v21, %v5591_v20  ;;  %v5415_v20 = vld [vmem:[%s8525_s7 + $0x140] sm:$0xf]  ;;  %v313_v21 = vmul.f32 %v8675_v52, %v8675_v52  ;;  %v7767_v28 = vld [vmem:[%s8525_s7 + $0x24c] sm:$0xf0]  ;;  %v373_v60 = vmul.f32 %v8614_v49, %v372_v62 }
  0x5a   : > { %1305 = vmatpush.bf16.msra.mxu1 %v5464_v22  ;;  %1287 = vmatpush.bf16.msra.mxu0 %v5320_v44  ;;  %v5688_v22 = vor.u32 %v7803_v11, %v5687_v10  ;;  %v7799_v31 = vld [vmem:[%s8525_s7 + $0x34c] sm:$0xf0]  ;;  %v344_v44 = vadd.f32 %v343_v0, %v8629_v57  ;;  %v356_v61 = vadd.f32 %v312_v18, %v308_v17  ;;  %v5271_v50 = vld [vmem:[%s8525_s7 + $0x20] sm:$0xf]  ;;  %v326_v11 = vrot.slane %v8717_v46, 1 }
  0x5b   : > { %1324 = vmatpush.bf16.msra.mxu2 %v5592_v26  ;;  %1344 = vmatpush.bf16.msra.mxu3 %v5704_v5  ;;  %v7735_v26 = vld [vmem:[%s8525_s7 + $0x14c] sm:$0xf0]  ;;  %v5544_v0 = vor.u32 %v7767_v28, %v5543_v27  ;;  %v363_v2 = vadd.f32 %v313_v21, %v309_v19  ;;  %v5672_v3 = vor.u32 %v7799_v31, %v5671_v30  ;;  %v5527_v12 = vld [vmem:[%s8525_s7 + $0x220] sm:$0xf]  ;;  %v352_v55 = vrot.slane %v351_v54, 2 }
  0x5c   : > { %v5416_v57 = vor.u32 %v7735_v26, %v5415_v20  ;;  %v7731_v58 = vld [vmem:[%s8525_s7 + $0x12c] sm:$0xf0]  ;;  %v5655_v13 = vld [vmem:[%s8525_s7 + $0x320] sm:$0xf]  ;;  %v345_v8 = vrot.slane %v344_v44, 2  ;;  %v357_v14 = vrot.slane %v356_v61, 4  ;;  %v374_v21 = vadd.f32 %v8614_v49, %v373_v60 }
  0x5d   : > { %v7763_v4 = vld [vmem:[%s8525_s7 + $0x22c] sm:$0xf0]  ;;  %v5255_v10 = vld [vmem:[%s8525_s7] sm:$0xf]  ;;  %v333_v26 = vrot.slane %v332_v7, 1 }
  0x5e   : > { %1306 = vmatpush.bf16.msra.mxu1 %v5448_v53  ;;  %1288 = vmatpush.bf16.msra.mxu0 %v5304_v16  ;;  %v7699_v53 = vld [vmem:[%s8525_s7 + $0x2c] sm:$0xf0]  ;;  %v339_v16 = vadd.f32 %v338_v40, %v337_v15  ;;  %v5528_v17 = vor.u32 %v7763_v4, %v5527_v12  ;;  %v5383_v19 = vld [vmem:[%s8525_s7 + $0x100] sm:$0xf]  ;;  %v346_v27 = vadd.f32 %v345_v8, %v344_v44 }
  0x5f   : > { %1325 = vmatpush.bf16.msra.mxu2 %v5576_v1  ;;  %v5399_v1 = vld [vmem:[%s8525_s7 + $0x120] sm:$0xf]  ;;  %1345 = vmatpush.bf16.msra.mxu3 %v5688_v22  ;;  %v7795_v5 = vld [vmem:[%s8525_s7 + $0x32c] sm:$0xf0]  ;;  %v5272_v9 = vor.u32 %v7699_v53, %v5271_v50  ;;  %v358_v28 = vadd.f32 %v357_v14, %v356_v61  ;;  %v353_v40 = vadd.f32 %v352_v55, %v351_v54  ;;  %v5369_v55 = vld [vmem:[%s8525_s7 + $0xf0] sm:$0xf0] }
  0x60   : > { %v5400_v62 = vor.u32 %v7731_v58, %v5399_v1  ;;  %v7695_v18 = vld [vmem:[%s8525_s7 + $0xc] sm:$0xf0]  ;;  %v5511_v63 = vld [vmem:[%s8525_s7 + $0x200] sm:$0xf]  ;;  %v340_v39 = vrot.slane %v339_v16, 1  ;;  %v347_v1 = vrot.slane %v346_v27, 1  ;;  %v320_v61 = vadd.f32 %v319_v6, %v8709_v35 }
  0x61   : > { %v7727_v59 = vld [vmem:[%s8525_s7 + $0x10c] sm:$0xf0]  ;;  %v5639_v22 = vld [vmem:[%s8525_s7 + $0x300] sm:$0xf]  ;;  %v5256_v31 = vor.u32 %v7695_v18, %v5255_v10  ;;  %v376_v54 = vsel %vm375_vm4, %v8614_v49, %v374_v21  ;;  %v327_v58 = vadd.f32 %v326_v11, %v8717_v46  ;;  %v334_v12 = vadd.f32 %v333_v26, %v332_v7  ;;  %v7785_v35 = vld [vmem:[%s8525_s7 + $0x2e4] sm:$0xf] }
  0x62   : > { %1307 = vmatpush.bf16.msra.mxu1 %v5432_v51  ;;  %1289 = vmatpush.bf16.msra.mxu0 %v5288_v45  ;;  %v364_v51 = vrot.slane %v363_v2, 4  ;;  %v7759_v20 = vld [vmem:[%s8525_s7 + $0x20c] sm:$0xf0]  ;;  %v5384_v45 = vor.u32 %v7727_v59, %v5383_v19  ;;  %v341_v4 = vadd.f32 %v340_v39, %v339_v16  ;;  %v377_v8 = vmul.f32 %v376_v54, %v320_v61  ;;  %v5625_v6 = vld [vmem:[%s8525_s7 + $0x2f0] sm:$0xf0] }
  0x63   : > { %1326 = vmatpush.bf16.msra.mxu2 %v5560_v56  ;;  %1346 = vmatpush.bf16.msra.mxu3 %v5672_v3  ;;  %v5656_v56 = vor.u32 %v7795_v5, %v5655_v13  ;;  %v7791_v15 = vld [vmem:[%s8525_s7 + $0x30c] sm:$0xf0]  ;;  %v348_v5 = vadd.f32 %v347_v1, %v346_v27  ;;  %v7721_v49 = vld [vmem:[%s8525_s7 + $0xe4] sm:$0xf]  ;;  %v378_v46 = vmul.f32 %v376_v54, %v327_v58  ;;  %v5353_v27 = vld [vmem:[%s8525_s7 + $0xd0] sm:$0xf0] }
  0x64   : > { %v365_v30 = vadd.f32 %v364_v51, %v363_v2  ;;  %v5640_v53 = vor.u32 %v7791_v15, %v5639_v22  ;;  %v354_v2 = vrot.slane %v353_v40, 1  ;;  %v379_v7 = vmul.f32 %v376_v54, %v334_v12  ;;  %v7817_v14 = vld [vmem:[%s8525_s7 + $0x3e4] sm:$0xf]  ;;  %v5753_v51 = vld [vmem:[%s8525_s7 + $0x3f0] sm:$0xf0] }
  0x65   : > { %v380_v11 = vmul.f32 %v376_v54, %v341_v4  ;;  %v5628_v16 = vor.u32 %v7785_v35, %v5625_v6  ;;  %v5372_v18 = vor.u32 %v7721_v49, %v5369_v55  ;;  %v5756_v59 = vor.u32 %v7817_v14, %v5753_v51  ;;  %v7717_v21 = vld [vmem:[%s8525_s7 + $0xc4] sm:$0xf]  ;;  %v5337_v12 = vld [vmem:[%s8525_s7 + $0xb0] sm:$0xf0] }
  0x66   : > { %1308 = vmatpush.bf16.msra.mxu1 %v5416_v57  ;;  %1290 = vmatpush.bf16.msra.mxu0 %v5272_v9  ;;  %v5512_v57 = vor.u32 %v7759_v20, %v5511_v63  ;;  %v366_v50 = vrot.slane %v365_v30, 2  ;;  %v355_v9 = vadd.f32 %v354_v2, %v353_v40  ;;  %v7781_v63 = vld [vmem:[%s8525_s7 + $0x2c4] sm:$0xf]  ;;  %v5609_v20 = vld [vmem:[%s8525_s7 + $0x2d0] sm:$0xf0]  ;;  %v381_v22 = vmul.f32 %v376_v54, %v348_v5 }
  0x67   : > { %1327 = vmatpush.bf16.msra.mxu2 %v5544_v0  ;;  %v359_v0 = vrot.slane %v358_v28, 2  ;;  %1347 = vmatpush.bf16.msra.mxu3 %v5656_v56  ;;  %v5612_v26 = vor.u32 %v7781_v63, %v5609_v20  ;;  %v7777_v1 = vld [vmem:[%s8525_s7 + $0x2a4] sm:$0xf]  ;;  %v5593_v2 = vld [vmem:[%s8525_s7 + $0x2b0] sm:$0xf0] }
  0x68   : > { %v367_v44 = vadd.f32 %v366_v50, %v365_v30  ;;  %v5481_v30 = vld [vmem:[%s8525_s7 + $0x1d0] sm:$0xf0]  ;;  %v7813_v50 = vld [vmem:[%s8525_s7 + $0x3c4] sm:$0xf] }
  0x69   : > { %v360_v3 = vadd.f32 %v359_v0, %v358_v28  ;;  %v7749_v28 = vld [vmem:[%s8525_s7 + $0x1c4] sm:$0xf]  ;;  %v5465_v49 = vld [vmem:[%s8525_s7 + $0x1b0] sm:$0xf0] }
  0x6a   : > { %1309 = vmatpush.bf16.msra.mxu1 %v5400_v62  ;;  %1291 = vmatpush.bf16.msra.mxu0 %v5256_v31  ;;  %v368_v13 = vrot.slane %v367_v44, 1  ;;  %v7753_v62 = vld [vmem:[%s8525_s7 + $0x1e4] sm:$0xf]  ;;  %v382_v31 = vmul.f32 %v376_v54, %v355_v9 }
  0x6b   : > { %1328 = vmatpush.bf16.msra.mxu2 %v5528_v17  ;;  %v361_v60 = vrot.slane %v360_v3, 1  ;;  %1348 = vmatpush.bf16.msra.mxu3 %v5640_v53  ;;  %v5497_v17 = vld [vmem:[%s8525_s7 + $0x1f0] sm:$0xf0]  ;;  %v7713_v58 = vld [vmem:[%s8525_s7 + $0xa4] sm:$0xf] }
  0x6c   : > { %v5500_v19 = vor.u32 %v7753_v62, %v5497_v17  ;;  %v369_v56 = vadd.f32 %v368_v13, %v367_v44  ;;  %v5737_v53 = vld [vmem:[%s8525_s7 + $0x3d0] sm:$0xf0]  ;;  %v5484_v44 = vor.u32 %v7749_v28, %v5481_v30  ;;  %v5340_v6 = vor.u32 %v7713_v58, %v5337_v12  ;;  %v7805_v63 = vld [vmem:[%s8525_s7 + $0x384] sm:$0xf] }
  0x6d   : > { %v362_v10 = vadd.f32 %v361_v60, %v360_v3  ;;  %v5356_v3 = vor.u32 %v7717_v21, %v5353_v27  ;;  %v5740_v61 = vor.u32 %v7813_v50, %v5737_v53  ;;  %v5577_v17 = vld [vmem:[%s8525_s7 + $0x290] sm:$0xf0]  ;;  %v7705_v58 = vld [vmem:[%s8525_s7 + $0x64] sm:$0xf] }
  0x6e   : > { %1310 = vmatpush.bf16.msra.mxu1 %v5384_v45  ;;  %1360 = vmatpush.bf16.msrb.mxu0 %v5372_v18  ;;  %v384_v4 = vmul.f32 %v376_v54, %v369_v56  ;;  %v7709_v18 = vld [vmem:[%s8525_s7 + $0x84] sm:$0xf]  ;;  %v5305_v12 = vld [vmem:[%s8525_s7 + $0x70] sm:$0xf0] }
  0x6f   : > { %1329 = vmatpush.bf16.msra.mxu2 %v5512_v57  ;;  %v383_v39 = vmul.f32 %v376_v54, %v362_v10  ;;  %1417 = vmatpush.bf16.msrb.mxu3 %v5756_v59  ;;  %v7745_v54 = vld [vmem:[%s8525_s7 + $0x1a4] sm:$0xf]  ;;  %v5449_v59 = vld [vmem:[%s8525_s7 + $0x190] sm:$0xf0] }
  0x70   : > { %v5468_v55 = vor.u32 %v7745_v54, %v5465_v49  ;;  %v7741_v56 = vld [vmem:[%s8525_s7 + $0x184] sm:$0xf]  ;;  %v5308_v54 = vor.u32 %v7705_v58, %v5305_v12 }
  0x71   : > { %v5452_v21 = vor.u32 %v7741_v56, %v5449_v59 }
  0x72   : > { %1379 = vmatpush.bf16.msrb.mxu1 %v5500_v19  ;;  %1361 = vmatpush.bf16.msrb.mxu0 %v5356_v3  ;;  %v5321_v19 = vld [vmem:[%s8525_s7 + $0x90] sm:$0xf0] }
  0x73   : > { %1398 = vmatpush.bf16.msrb.mxu2 %v5628_v16  ;;  %1418 = vmatpush.bf16.msrb.mxu3 %v5740_v61  ;;  %v5324_v51 = vor.u32 %v7709_v18, %v5321_v19  ;;  %v5561_v3 = vld [vmem:[%s8525_s7 + $0x270] sm:$0xf0] }
  0x76   : > { %1380 = vmatpush.bf16.msrb.mxu1 %v5484_v44  ;;  %1362 = vmatpush.bf16.msrb.mxu0 %v5340_v6 }
  0x77   : > { %1399 = vmatpush.bf16.msrb.mxu2 %v5612_v26 }
  0x7a   : > { %1381 = vmatpush.bf16.msrb.mxu1 %v5468_v55  ;;  %1363 = vmatpush.bf16.msrb.mxu0 %v5324_v51 }
  0x7e   : > { %1382 = vmatpush.bf16.msrb.mxu1 %v5452_v21  ;;  %1364 = vmatpush.bf16.msrb.mxu0 %v5308_v54 }
  0x89   : > { %s8206_s10 = spop %8205 }
  0x8a   : > { %s297_s11 = smul.f32 16.0, %s8206_s10 }
  0x8c   : > { %v385_v15 = vstv %s297_s11 }
  0x8d   : > { %v386_v40 = vmul.f32 %v385_v15, %v377_v8  ;;  %v387_v45 = vmul.f32 %v385_v15, %v378_v46  ;;  %v388_v57 = vmul.f32 %v385_v15, %v379_v7  ;;  %v389_v0 = vmul.f32 %v385_v15, %v380_v11  ;;  %v7809_v46 = vld [vmem:[%s8525_s7 + $0x3a4] sm:$0xf]  ;;  %v5721_v7 = vld [vmem:[%s8525_s7 + $0x3b0] sm:$0xf0] }
  0x8e   : > { %v5596_v8 = vor.u32 %v7777_v1, %v5593_v2  ;;  %v390_v9 = vmul.f32 %v385_v15, %v381_v22  ;;  %v391_v10 = vmul.f32 %v385_v15, %v382_v31  ;;  %v7773_v11 = vld [vmem:[%s8525_s7 + $0x284] sm:$0xf]  ;;  %v392_v16 = vmul.f32 %v385_v15, %v383_v39  ;;  %v5705_v22 = vld [vmem:[%s8525_s7 + $0x390] sm:$0xf0] }
  0x8f   : > { %v8770_v60 = vadd.f32 1e-08, %v386_v40  ;;  %v8772_v13 = vadd.f32 1e-08, %v387_v45  ;;  %v8774_v5 = vadd.f32 1e-08, %v388_v57  ;;  %v5724_v62 = vor.u32 %v7809_v46, %v5721_v7 }
  0x90   : > { %v8776_v35 = vadd.f32 1e-08, %v389_v0  ;;  %1400 = vmatpush.bf16.msrb.mxu2 %v5596_v8  ;;  %v5580_v14 = vor.u32 %v7773_v11, %v5577_v17  ;;  %v393_v20 = vmul.f32 %v385_v15, %v384_v4  ;;  %v8794_v26 = vadd.f32 1e-08, %v390_v9  ;;  %v7769_v1 = vld [vmem:[%s8525_s7 + $0x264] sm:$0xf] }
  0x91   : > { %8261 = vrsqrt.f32 %v8770_v60  ;;  %v8796_v27 = vadd.f32 1e-08, %v391_v10  ;;  %1419 = vmatpush.bf16.msrb.mxu3 %v5724_v62  ;;  %v5708_v28 = vor.u32 %v7805_v63, %v5705_v22  ;;  %v8798_v30 = vadd.f32 1e-08, %v392_v16 }
  0x92   : > { %8263 = vrsqrt.f32 %v8772_v13  ;;  %v8800_v31 = vadd.f32 1e-08, %v393_v20  ;;  %vm408_vm5 = vweird.f32 %v8770_v60  ;;  %vm418_vm6 = vweird.f32 %v8772_v13 }
  0x93   : > { %8265 = vrsqrt.f32 %v8774_v5  ;;  %vm428_vm7 = vweird.f32 %v8774_v5  ;;  %vm438_vm9 = vweird.f32 %v8776_v35  ;;  %v5564_v2 = vor.u32 %v7769_v1, %v5561_v3 }
  0x94   : > { %8267 = vrsqrt.f32 %v8776_v35  ;;  %1401 = vmatpush.bf16.msrb.mxu2 %v5580_v14  ;;  %vm448_vm3 = vweird.f32 %v8794_v26 }
  0x95   : > { %8269 = vrsqrt.f32 %v8794_v26  ;;  %1420 = vmatpush.bf16.msrb.mxu3 %v5708_v28 }
  0x96   : > { %8271 = vrsqrt.f32 %v8796_v27 }
  0x97   : > { %v8262_v39 = vpop.eup %8261  ;;  %8273 = vrsqrt.f32 %v8798_v30 }
  0x98   : > { %v8804_v15 = vpop.eup %8263  ;;  %v403_v40 = vmul.f32 %v8262_v39, %v8770_v60  ;;  %8275 = vrsqrt.f32 %v8800_v31  ;;  %vm409_vm8 = vweird.f32 %v8262_v39  ;;  %1402 = vmatpush.bf16.msrb.mxu2 %v5564_v2  ;;  %v5689_v2 = vld [vmem:[%s8525_s7 + $0x370] sm:$0xf0] }
  0x99   : > { %v8808_v45 = vpop.eup %8265  ;;  %v413_v57 = vmul.f32 %v8804_v15, %v8772_v13  ;;  %vm419_vm10 = vweird.f32 %v8804_v15  ;;  %vm410_vm14 = vmor %vm408_vm5, %vm409_vm8  ;;  %vm458_vm5 = vweird.f32 %v8796_v27  ;;  %vm468_vm8 = vweird.f32 %v8798_v30 }
  0x9a   : > { %v8814_v0 = vpop.eup %8267  ;;  %v404_v50 = vmul.f32 %v8262_v39, %v403_v40  ;;  %v423_v53 = vmul.f32 %v8808_v45, %v8774_v5  ;;  %vm429_vm11 = vweird.f32 %v8808_v45  ;;  %vm420_vm15 = vmor %vm418_vm6, %vm419_vm10 }
  0x9b   : > { %v414_v44 = vmul.f32 %v8804_v15, %v413_v57  ;;  %v433_v61 = vmul.f32 %v8814_v0, %v8776_v35  ;;  %v8828_v4 = vpop.eup %8269  ;;  %vm439_vm12 = vweird.f32 %v8814_v0  ;;  %vm430_vm0 = vmor %vm428_vm7, %vm429_vm11  ;;  %vm478_vm11 = vweird.f32 %v8800_v31 }
  0x9c   : > { %v405_v8 = vmul.f32 0.5, %v404_v50  ;;  %v424_v6 = vmul.f32 %v8808_v45, %v423_v53  ;;  %v8832_v49 = vpop.eup %8271  ;;  %v443_v46 = vmul.f32 %v8828_v4, %v8794_v26  ;;  %vm449_vm13 = vweird.f32 %v8828_v4  ;;  %vm440_vm1 = vmor %vm438_vm9, %vm439_vm12  ;;  %v7761_v26 = vld [vmem:[%s8525_s7 + $0x224] sm:$0xf] }
  0x9d   : > { %v415_v9 = vmul.f32 0.5, %v414_v44  ;;  %v434_v10 = vmul.f32 %v8814_v0, %v433_v61  ;;  %v8838_v7 = vpop.eup %8273  ;;  %v453_v55 = vmul.f32 %v8832_v49, %v8796_v27  ;;  %v5433_v61 = vld [vmem:[%s8525_s7 + $0x170] sm:$0xf0]  ;;  %vm459_vm2 = vweird.f32 %v8832_v49  ;;  %vm8911_vm4 = vmor %vm448_vm3, %vm449_vm13 }
  0x9e   : > { %v406_v11 = vsub.f32 1.5, %v405_v8  ;;  %v425_v16 = vmul.f32 0.5, %v424_v6  ;;  %v8843_v62 = vpop.eup %8275  ;;  %v444_v19 = vmul.f32 %v8828_v4, %v443_v46  ;;  %v463_v14 = vmul.f32 %v8838_v7, %v8798_v30  ;;  %v7765_v8 = vld [vmem:[%s8525_s7 + $0x244] sm:$0xf]  ;;  %vm8922_vm7 = vmor %vm458_vm5, %vm459_vm2 }
  0x9f   : > { %v416_v17 = vsub.f32 1.5, %v415_v9  ;;  %v435_v18 = vmul.f32 0.5, %v434_v10  ;;  %v454_v59 = vmul.f32 %v8832_v49, %v453_v55  ;;  %v473_v60 = vmul.f32 %v8843_v62, %v8800_v31  ;;  %v7797_v55 = vld [vmem:[%s8525_s7 + $0x344] sm:$0xf]  ;;  %v7756_v31 = vld [vmem:[%s8525_s7 + $0x1f4] sm:$0xf0] }
  0xa0   : > { %v407_v51 = vmul.f32 %v8262_v39, %v406_v11  ;;  %v426_v56 = vsub.f32 1.5, %v425_v16  ;;  %v445_v21 = vmul.f32 0.5, %v444_v19  ;;  %v464_v22 = vmul.f32 %v8838_v7, %v463_v14  ;;  %v5417_v16 = vld [vmem:[%s8525_s7 + $0x150] sm:$0xf0] }
  0xa1   : > { %v417_v63 = vmul.f32 %v8804_v15, %v416_v17  ;;  %v436_v20 = vsub.f32 1.5, %v435_v18  ;;  %v455_v57 = vmul.f32 0.5, %v454_v59  ;;  %v474_v9 = vmul.f32 %v8843_v62, %v473_v60  ;;  %v5673_v17 = vld [vmem:[%s8525_s7 + $0x350] sm:$0xf0]  ;;  %v7793_v60 = vld [vmem:[%s8525_s7 + $0x324] sm:$0xf] }
  0xa2   : > { %v411_v28 = vsel %vm410_vm14, %v8262_v39, %v407_v51  ;;  %v427_v40 = vmul.f32 %v8808_v45, %v426_v56  ;;  %v465_v54 = vmul.f32 0.5, %v464_v22  ;;  %vm469_vm6 = vweird.f32 %v8838_v7  ;;  %v5529_v14 = vld [vmem:[%s8525_s7 + $0x230] sm:$0xf0]  ;;  %v5615_v51 = vld [vmem:[%s8525_s7 + $0x2c8] sm:$0xf] }
  0xa3   : > { %v482_v50 = vmul.f32 %v411_v28, %v8559_v23  ;;  %v486_v53 = vmul.f32 %v411_v28, %v8562_v24  ;;  %v421_v39 = vsel %vm420_vm15, %v8804_v15, %v417_v63  ;;  %v437_v13 = vmul.f32 %v8814_v0, %v436_v20  ;;  %v7737_v15 = vld [vmem:[%s8525_s7 + $0x164] sm:$0xf]  ;;  %vm8939_vm9 = vmor %vm468_vm8, %vm469_vm6 }
  0xa4   : > { %v483_v1 = vmul.f32 %v421_v39, %v8565_v25  ;;  %v487_v3 = vmul.f32 %v421_v39, %v8572_v29  ;;  %v431_v23 = vsel %vm430_vm0, %v8808_v45, %v427_v40  ;;  %v446_v24 = vsub.f32 1.5, %v445_v21  ;;  %v7801_v45 = vld [vmem:[%s8525_s7 + $0x364] sm:$0xf]  ;;  %v5273_v21 = vld [vmem:[%s8525_s7 + $0x30] sm:$0xf0] }
  0xa5   : > { %v8878_v5 = vpack.c.bf16 %v486_v53, %v482_v50  ;;  %v484_v44 = vmul.f32 %v431_v23, %v8579_v32  ;;  %v488_v25 = vmul.f32 %v431_v23, %v8582_v33  ;;  %v441_v29 = vsel %vm440_vm1, %v8814_v0, %v437_v13  ;;  %v5545_v32 = vld [vmem:[%s8525_s7 + $0x250] sm:$0xf0]  ;;  %v7701_v33 = vld [vmem:[%s8525_s7 + $0x44] sm:$0xf]  ;;  %v5343_v39 = vld [vmem:[%s8525_s7 + $0xa8] sm:$0xf] }
  0xa6   : > { %v8886_v58 = vpack.c.bf16 %v487_v3, %v483_v1  ;;  %v485_v35 = vmul.f32 %v441_v29, %v8585_v34  ;;  %v489_v12 = vmul.f32 %v441_v29, %v8588_v36  ;;  %v456_v6 = vsub.f32 1.5, %v455_v57  ;;  %v5289_v34 = vld [vmem:[%s8525_s7 + $0x50] sm:$0xf0]  ;;  %v7733_v36 = vld [vmem:[%s8525_s7 + $0x144] sm:$0xf] }
  0xa7   : > { %1292 = vmatmul.bf16.vlgmr.msra.gmra.mxu0 %v8878_v5  ;;  %v8895_v0 = vpack.c.bf16 %v488_v25, %v484_v44  ;;  %v447_v46 = vmul.f32 %v8828_v4, %v446_v24  ;;  %v5436_v11 = vor.u32 %v7737_v15, %v5433_v61  ;;  %v466_v19 = vsub.f32 1.5, %v465_v54  ;;  %v7697_v20 = vld [vmem:[%s8525_s7 + $0x24] sm:$0xf]  ;;  %v5401_v57 = vld [vmem:[%s8525_s7 + $0x130] sm:$0xf0] }
  0xa8   : > { %1311 = vmatmul.bf16.vlgmr.msra.gmra.mxu1 %v8886_v58  ;;  %v8901_v10 = vpack.c.bf16 %v489_v12, %v485_v35  ;;  %v475_v56 = vmul.f32 0.5, %v474_v9  ;;  %v5692_v59 = vor.u32 %v7801_v45, %v5689_v2  ;;  %v5548_v27 = vor.u32 %v7765_v8, %v5545_v32  ;;  %v7729_v40 = vld [vmem:[%s8525_s7 + $0x124] sm:$0xf]  ;;  %v5657_v1 = vld [vmem:[%s8525_s7 + $0x330] sm:$0xf0] }
  0xa9   : > { %1330 = vmatmul.bf16.vlgmr.msra.gmra.mxu2 %v8895_v0  ;;  %1383 = vmatpush.bf16.msrb.mxu1 %v5436_v11  ;;  %v5292_v63 = vor.u32 %v7701_v33, %v5289_v34  ;;  %v457_v22 = vmul.f32 %v8832_v49, %v456_v6  ;;  %v5420_v28 = vor.u32 %v7733_v36, %v5417_v16  ;;  %v7757_v3 = vld [vmem:[%s8525_s7 + $0x204] sm:$0xf]  ;;  %vm479_vm10 = vweird.f32 %v8843_v62  ;;  %v5513_v24 = vld [vmem:[%s8525_s7 + $0x210] sm:$0xf0]  ;;  %v5631_v45 = vld [vmem:[%s8525_s7 + $0x2e8] sm:$0xf] }
  0xaa   : > { %1349 = vmatmul.bf16.vlgmr.msra.gmra.mxu3 %v8901_v10  ;;  %v451_v50 = vsel %vm8911_vm4, %v8828_v4, %v447_v46  ;;  %v467_v53 = vmul.f32 %v8838_v7, %v466_v19  ;;  %v476_v30 = vsub.f32 1.5, %v475_v56  ;;  %1403 = vmatpush.bf16.msrb.mxu2 %v5548_v27  ;;  %v5676_v13 = vor.u32 %v7797_v55, %v5673_v17  ;;  %v7693_v15 = vld [vmem:[%s8525_s7 + $0x4] sm:$0xf]  ;;  %v5257_v44 = vld [vmem:[%s8525_s7 + $0x10] sm:$0xf0]  ;;  %vm480_vm12 = vmor %vm478_vm11, %vm479_vm10 }
  0xab   : > { %1421 = vmatpush.bf16.msrb.mxu3 %v5692_v59  ;;  %1365 = vmatpush.bf16.msrb.mxu0 %v5292_v63  ;;  %v5532_v4 = vor.u32 %v7761_v26, %v5529_v14  ;;  %v5276_v23 = vor.u32 %v7697_v20, %v5273_v21  ;;  %v5404_v29 = vor.u32 %v7729_v40, %v5401_v57  ;;  %v7725_v61 = vld [vmem:[%s8525_s7 + $0x104] sm:$0xf]  ;;  %v7788_v2 = vld [vmem:[%s8525_s7 + $0x2f4] sm:$0xf0]  ;;  %v5385_v8 = vld [vmem:[%s8525_s7 + $0x110] sm:$0xf0] }
  0xac   : > { %v477_v25 = vmul.f32 %v8843_v62, %v476_v30  ;;  %v490_v35 = vmul.f32 %v451_v50, %v8591_v37  ;;  %v461_v12 = vsel %vm8922_vm7, %v8832_v49, %v457_v22  ;;  %v5375_v32 = vld [vmem:[%s8525_s7 + $0xe8] sm:$0xf]  ;;  %v7724_v33 = vld [vmem:[%s8525_s7 + $0xf4] sm:$0xf0]  ;;  %v471_v6 = vsel %vm8939_vm9, %v8838_v7, %v467_v53  ;;  %v7789_v7 = vld [vmem:[%s8525_s7 + $0x304] sm:$0xf] }
  0xad   : > { %1384 = vmatpush.bf16.msrb.mxu1 %v5420_v28  ;;  %v5660_v37 = vor.u32 %v7793_v60, %v5657_v1  ;;  %v5516_v54 = vor.u32 %v7757_v3, %v5513_v24  ;;  %v5503_v49 = vld [vmem:[%s8525_s7 + $0x1e8] sm:$0xf]  ;;  %v494_v9 = vmul.f32 %v451_v50, %v8594_v38  ;;  %v5260_v36 = vor.u32 %v7693_v15, %v5257_v44  ;;  %v5641_v46 = vld [vmem:[%s8525_s7 + $0x310] sm:$0xf0]  ;;  %v7784_v56 = vld [vmem:[%s8525_s7 + $0x2d4] sm:$0xf0] }
  0xae   : > { %1404 = vmatpush.bf16.msrb.mxu2 %v5532_v4  ;;  %v481_v34 = vsel %vm480_vm12, %v8843_v62, %v477_v25  ;;  %v5632_v11 = vor.u32 %v7788_v2, %v5631_v45  ;;  %v491_v16 = vmul.f32 %v461_v12, %v8609_v47  ;;  %v495_v55 = vmul.f32 %v461_v12, %v8612_v48  ;;  %v5759_v38 = vld [vmem:[%s8525_s7 + $0x3e8] sm:$0xf]  ;;  %v7820_v62 = vld [vmem:[%s8525_s7 + $0x3f4] sm:$0xf0] }
  0xaf   : > { %1422 = vmatpush.bf16.msrb.mxu3 %v5676_v13  ;;  %1366 = vmatpush.bf16.msrb.mxu0 %v5276_v23  ;;  %v5388_v17 = vor.u32 %v7725_v61, %v5385_v8  ;;  %v5376_v18 = vor.u32 %v7724_v33, %v5375_v32  ;;  %v492_v19 = vmul.f32 %v471_v6, %v8663_v41  ;;  %v5359_v59 = vld [vmem:[%s8525_s7 + $0xc8] sm:$0xf]  ;;  %v7720_v63 = vld [vmem:[%s8525_s7 + $0xd4] sm:$0xf0] }
  0xb0   : > { %v496_v26 = vmul.f32 %v471_v6, %v8666_v42  ;;  %v5504_v14 = vor.u32 %v7756_v31, %v5503_v49  ;;  %v493_v47 = vmul.f32 %v481_v34, %v8669_v43  ;;  %v497_v48 = vmul.f32 %v481_v34, %v8675_v52  ;;  %v5487_v20 = vld [vmem:[%s8525_s7 + $0x1c8] sm:$0xf]  ;;  %v7752_v21 = vld [vmem:[%s8525_s7 + $0x1d4] sm:$0xf0] }
  0xb1   : > { %1385 = vmatpush.bf16.msrb.mxu1 %v5404_v29  ;;  %v5644_v27 = vor.u32 %v7789_v7, %v5641_v46  ;;  %v8986_v41 = vpack.c.bf16 %v494_v9, %v490_v35  ;;  %v5760_v42 = vor.u32 %v7820_v62, %v5759_v38  ;;  %v8988_v22 = vpack.c.bf16 %v495_v55, %v491_v16  ;;  %v5743_v52 = vld [vmem:[%s8525_s7 + $0x3c8] sm:$0xf]  ;;  %v7816_v28 = vld [vmem:[%s8525_s7 + $0x3d4] sm:$0xf0] }
  0xb2   : > { %1405 = vmatpush.bf16.msrb.mxu2 %v5516_v54  ;;  %v5616_v43 = vor.u32 %v7784_v56, %v5615_v51  ;;  %v8993_v40 = vpack.c.bf16 %v496_v26, %v492_v19  ;;  %v5360_v57 = vor.u32 %v7720_v63, %v5359_v59  ;;  %v5488_v60 = vor.u32 %v7752_v21, %v5487_v20  ;;  %v5599_v50 = vld [vmem:[%s8525_s7 + $0x2a8] sm:$0xf]  ;;  %v7780_v53 = vld [vmem:[%s8525_s7 + $0x2b4] sm:$0xf0] }
  0xb3   : > { %1423 = vmatpush.bf16.msrb.mxu3 %v5660_v37  ;;  %1367 = vmatpush.bf16.msrb.mxu0 %v5260_v36  ;;  %v8999_v30 = vpack.c.bf16 %v497_v48, %v493_v47  ;;  %v7716_v13 = vld [vmem:[%s8525_s7 + $0xb4] sm:$0xf0]  ;;  %v5471_v1 = vld [vmem:[%s8525_s7 + $0x1a8] sm:$0xf]  ;;  %v5744_v4 = vor.u32 %v7816_v28, %v5743_v52  ;;  %v5600_v23 = vor.u32 %v7780_v53, %v5599_v50 }
  0xb4   : > { %v7748_v3 = vld [vmem:[%s8525_s7 + $0x1b4] sm:$0xf0]  ;;  %v5727_v24 = vld [vmem:[%s8525_s7 + $0x3a8] sm:$0xf]  ;;  %v5344_v44 = vor.u32 %v7716_v13, %v5343_v39 }
  0xb5   : > { %1386 = vmatpush.bf16.msrb.mxu1 %v5388_v17  ;;  %v7812_v15 = vld [vmem:[%s8525_s7 + $0x3b4] sm:$0xf0]  ;;  %v5472_v25 = vor.u32 %v7748_v3, %v5471_v1  ;;  %v5583_v29 = vld [vmem:[%s8525_s7 + $0x288] sm:$0xf] }
  0xb6   : > { %1474 = vmatpush.bf16.msra.mxu2 %v5632_v11  ;;  %v7776_v61 = vld [vmem:[%s8525_s7 + $0x294] sm:$0xf0]  ;;  %v5327_v45 = vld [vmem:[%s8525_s7 + $0x88] sm:$0xf]  ;;  %v5728_v8 = vor.u32 %v7812_v15, %v5727_v24 }
  0xb7   : > { %1436 = vmatpush.bf16.msra.mxu0 %v5376_v18  ;;  %1424 = vmatpush.bf16.msrb.mxu3 %v5644_v27  ;;  %v7712_v2 = vld [vmem:[%s8525_s7 + $0x94] sm:$0xf0]  ;;  %v5455_v35 = vld [vmem:[%s8525_s7 + $0x188] sm:$0xf]  ;;  %v5584_v32 = vor.u32 %v7776_v61, %v5583_v29 }
  0xb8   : > { %1297 = vmatmul.bf16.gmra.mxu0 %v8986_v41  ;;  %1316 = vmatmul.bf16.gmra.mxu1 %v8988_v22  ;;  %v7744_v12 = vld [vmem:[%s8525_s7 + $0x194] sm:$0xf0]  ;;  %v5711_v33 = vld [vmem:[%s8525_s7 + $0x388] sm:$0xf]  ;;  %v5328_v37 = vor.u32 %v7712_v2, %v5327_v45  ;;  %v7754_v45 = vld [vmem:[%s8525_s7 + $0x1ec] sm:$0xf] }
  0xb9   : > { %1455 = vmatpush.bf16.msra.mxu1 %v5504_v14  ;;  %1335 = vmatmul.bf16.gmra.mxu2 %v8993_v40  ;;  %v7808_v6 = vld [vmem:[%s8525_s7 + $0x394] sm:$0xf0]  ;;  %v5456_v54 = vor.u32 %v7744_v12, %v5455_v35  ;;  %v5567_v49 = vld [vmem:[%s8525_s7 + $0x268] sm:$0xf]  ;;  %v5505_v2 = vld [vmem:[%s8525_s7 + $0x1f8] sm:$0xf0] }
  0xba   : > { %1354 = vmatmul.bf16.gmra.mxu3 %v8999_v30  ;;  %1475 = vmatpush.bf16.msra.mxu2 %v5616_v43  ;;  %v7772_v31 = vld [vmem:[%s8525_s7 + $0x274] sm:$0xf0]  ;;  %v5439_v9 = vld [vmem:[%s8525_s7 + $0x168] sm:$0xf]  ;;  %v5712_v36 = vor.u32 %v7808_v6, %v5711_v33 }
  0xbb   : > { %1493 = vmatpush.bf16.msra.mxu3 %v5760_v42  ;;  %1437 = vmatpush.bf16.msra.mxu0 %v5360_v57  ;;  %v7740_v34 = vld [vmem:[%s8525_s7 + $0x174] sm:$0xf0]  ;;  %v5311_v7 = vld [vmem:[%s8525_s7 + $0x68] sm:$0xf]  ;;  %v5568_v11 = vor.u32 %v7772_v31, %v5567_v49  ;;  %v5508_v31 = vor.u32 %v7754_v45, %v5505_v2  ;;  %v7738_v45 = vld [vmem:[%s8525_s7 + $0x16c] sm:$0xf] }
  0xbc   : > { %v7708_v46 = vld [vmem:[%s8525_s7 + $0x74] sm:$0xf0]  ;;  %v5695_v16 = vld [vmem:[%s8525_s7 + $0x368] sm:$0xf]  ;;  %v5440_v17 = vor.u32 %v7740_v34, %v5439_v9  ;;  %v7782_v9 = vld [vmem:[%s8525_s7 + $0x2cc] sm:$0xf] }
  0xbd   : > { %1456 = vmatpush.bf16.msra.mxu1 %v5488_v60  ;;  %v7804_v55 = vld [vmem:[%s8525_s7 + $0x374] sm:$0xf0]  ;;  %v5551_v18 = vld [vmem:[%s8525_s7 + $0x248] sm:$0xf]  ;;  %v5312_v62 = vor.u32 %v7708_v46, %v5311_v7  ;;  %v5617_v34 = vld [vmem:[%s8525_s7 + $0x2d8] sm:$0xf0] }
  0xbe   : > { %1476 = vmatpush.bf16.msra.mxu2 %v5600_v23  ;;  %v7768_v38 = vld [vmem:[%s8525_s7 + $0x254] sm:$0xf0]  ;;  %v5423_v19 = vld [vmem:[%s8525_s7 + $0x148] sm:$0xf]  ;;  %v5696_v14 = vor.u32 %v7804_v55, %v5695_v16  ;;  %v5361_v16 = vld [vmem:[%s8525_s7 + $0xd8] sm:$0xf0]  ;;  %v5620_v55 = vor.u32 %v7782_v9, %v5617_v34 }
  0xbf   : > { %1494 = vmatpush.bf16.msra.mxu3 %v5744_v4  ;;  %1438 = vmatpush.bf16.msra.mxu0 %v5344_v44  ;;  %v7736_v26 = vld [vmem:[%s8525_s7 + $0x154] sm:$0xf0]  ;;  %v5295_v51 = vld [vmem:[%s8525_s7 + $0x48] sm:$0xf]  ;;  %v5552_v59 = vor.u32 %v7768_v38, %v5551_v18  ;;  %v7786_v44 = vld [vmem:[%s8525_s7 + $0x2ec] sm:$0xf] }
  0xc0   : > { %v7704_v56 = vld [vmem:[%s8525_s7 + $0x54] sm:$0xf0]  ;;  %v5679_v47 = vld [vmem:[%s8525_s7 + $0x348] sm:$0xf]  ;;  %v5424_v27 = vor.u32 %v7736_v26, %v5423_v19  ;;  %v5489_v18 = vld [vmem:[%s8525_s7 + $0x1d8] sm:$0xf0] }
  0xc1   : > { %1457 = vmatpush.bf16.msra.mxu1 %v5472_v25  ;;  %v7800_v48 = vld [vmem:[%s8525_s7 + $0x354] sm:$0xf0]  ;;  %v5535_v63 = vld [vmem:[%s8525_s7 + $0x228] sm:$0xf]  ;;  %v5296_v21 = vor.u32 %v7704_v56, %v5295_v51  ;;  %v5633_v25 = vld [vmem:[%s8525_s7 + $0x2f8] sm:$0xf0] }
  0xc2   : > { %1477 = vmatpush.bf16.msra.mxu2 %v5584_v32  ;;  %v7764_v20 = vld [vmem:[%s8525_s7 + $0x234] sm:$0xf0]  ;;  %v5407_v42 = vld [vmem:[%s8525_s7 + $0x128] sm:$0xf]  ;;  %v5680_v52 = vor.u32 %v7800_v48, %v5679_v47  ;;  %v5377_v32 = vld [vmem:[%s8525_s7 + $0xf8] sm:$0xf0]  ;;  %v5636_v6 = vor.u32 %v7786_v44, %v5633_v25 }
  0xc3   : > { %1495 = vmatpush.bf16.msra.mxu3 %v5728_v8  ;;  %1439 = vmatpush.bf16.msra.mxu0 %v5328_v37  ;;  %v7732_v43 = vld [vmem:[%s8525_s7 + $0x134] sm:$0xf0]  ;;  %v5279_v28 = vld [vmem:[%s8525_s7 + $0x28] sm:$0xf]  ;;  %v5536_v50 = vor.u32 %v7764_v20, %v5535_v63  ;;  %v7722_v8 = vld [vmem:[%s8525_s7 + $0xec] sm:$0xf] }
  0xc4   : > { %v7700_v57 = vld [vmem:[%s8525_s7 + $0x34] sm:$0xf0]  ;;  %v5663_v60 = vld [vmem:[%s8525_s7 + $0x328] sm:$0xf]  ;;  %v5408_v1 = vor.u32 %v7732_v43, %v5407_v42  ;;  %v7818_v37 = vld [vmem:[%s8525_s7 + $0x3ec] sm:$0xf]  ;;  %v5380_v7 = vor.u32 %v7722_v8, %v5377_v32 }
  0xc5   : > { %1458 = vmatpush.bf16.msra.mxu1 %v5456_v54  ;;  %v7796_v53 = vld [vmem:[%s8525_s7 + $0x334] sm:$0xf0]  ;;  %v5519_v39 = vld [vmem:[%s8525_s7 + $0x208] sm:$0xf]  ;;  %v5280_v24 = vor.u32 %v7700_v57, %v5279_v28  ;;  %v5761_v54 = vld [vmem:[%s8525_s7 + $0x3f8] sm:$0xf0] }
  0xc6   : > { %1478 = vmatpush.bf16.msra.mxu2 %v5568_v11  ;;  %v7760_v13 = vld [vmem:[%s8525_s7 + $0x214] sm:$0xf0]  ;;  %v5263_v3 = vld [vmem:[%s8525_s7 + $0x8] sm:$0xf]  ;;  %v5664_v29 = vor.u32 %v7796_v53, %v5663_v60  ;;  %v5764_v46 = vor.u32 %v7818_v37, %v5761_v54  ;;  %v7718_v11 = vld [vmem:[%s8525_s7 + $0xcc] sm:$0xf] }
  0xc7   : > { %1496 = vmatpush.bf16.msra.mxu3 %v5712_v36  ;;  %1440 = vmatpush.bf16.msra.mxu0 %v5312_v62  ;;  %v7696_v4 = vld [vmem:[%s8525_s7 + $0x14] sm:$0xf0]  ;;  %v5391_v23 = vld [vmem:[%s8525_s7 + $0x108] sm:$0xf]  ;;  %v5520_v35 = vor.u32 %v7760_v13, %v5519_v39  ;;  %v7814_v38 = vld [vmem:[%s8525_s7 + $0x3cc] sm:$0xf] }
  0xc8   : > { %1368 = vmatmul.bf16.vlgmr.msrb.gmra.mxu0 %v8878_v5  ;;  %1387 = vmatmul.bf16.vlgmr.msrb.gmra.mxu1 %v8886_v58  ;;  %v7728_v15 = vld [vmem:[%s8525_s7 + $0x114] sm:$0xf0]  ;;  %v5647_v61 = vld [vmem:[%s8525_s7 + $0x308] sm:$0xf]  ;;  %v5264_v49 = vor.u32 %v7696_v4, %v5263_v3  ;;  %v5745_v62 = vld [vmem:[%s8525_s7 + $0x3d8] sm:$0xf0] }
  0xc9   : > { %1459 = vmatpush.bf16.msra.mxu1 %v5440_v17  ;;  %1406 = vmatmul.bf16.vlgmr.msrb.gmra.mxu2 %v8895_v0  ;;  %v7792_v12 = vld [vmem:[%s8525_s7 + $0x314] sm:$0xf0]  ;;  %v5392_v33 = vor.u32 %v7728_v15, %v5391_v23  ;;  %v7750_v17 = vld [vmem:[%s8525_s7 + $0x1cc] sm:$0xf]  ;;  %v5601_v26 = vld [vmem:[%s8525_s7 + $0x2b8] sm:$0xf0]  ;;  %v5748_v47 = vor.u32 %v7814_v38, %v5745_v62 }
  0xca   : > { %1425 = vmatmul.bf16.vlgmr.msrb.gmra.mxu3 %v8901_v10  ;;  %1479 = vmatpush.bf16.msra.mxu2 %v5552_v59  ;;  %v5648_v36 = vor.u32 %v7792_v12, %v5647_v61  ;;  %v7778_v19 = vld [vmem:[%s8525_s7 + $0x2ac] sm:$0xf]  ;;  %v5492_v51 = vor.u32 %v7750_v17, %v5489_v18  ;;  %v5345_v59 = vld [vmem:[%s8525_s7 + $0xb8] sm:$0xf0] }
  0xcb   : > { %1497 = vmatpush.bf16.msra.mxu3 %v5696_v14  ;;  %1441 = vmatpush.bf16.msra.mxu0 %v5296_v21  ;;  %v5364_v14 = vor.u32 %v7718_v11, %v5361_v16  ;;  %v7714_v56 = vld [vmem:[%s8525_s7 + $0xac] sm:$0xf]  ;;  %v5604_v48 = vor.u32 %v7778_v19, %v5601_v26  ;;  %v5473_v63 = vld [vmem:[%s8525_s7 + $0x1b8] sm:$0xf0] }
  0xcc   : > { %v7810_v20 = vld [vmem:[%s8525_s7 + $0x3ac] sm:$0xf]  ;;  %v5729_v21 = vld [vmem:[%s8525_s7 + $0x3b8] sm:$0xf0] }
  0xcd   : > { %1460 = vmatpush.bf16.msra.mxu1 %v5424_v27  ;;  %v7746_v27 = vld [vmem:[%s8525_s7 + $0x1ac] sm:$0xf]  ;;  %v5585_v43 = vld [vmem:[%s8525_s7 + $0x298] sm:$0xf0] }
  0xce   : > { %1480 = vmatpush.bf16.msra.mxu2 %v5536_v50  ;;  %v7774_v42 = vld [vmem:[%s8525_s7 + $0x28c] sm:$0xf]  ;;  %v5476_v28 = vor.u32 %v7746_v27, %v5473_v63  ;;  %v5329_v60 = vld [vmem:[%s8525_s7 + $0x98] sm:$0xf0]  ;;  %v5732_v50 = vor.u32 %v7810_v20, %v5729_v21 }
  0xcf   : > { %1498 = vmatpush.bf16.msra.mxu3 %v5680_v52  ;;  %1442 = vmatpush.bf16.msra.mxu0 %v5280_v24  ;;  %v5348_v52 = vor.u32 %v7714_v56, %v5345_v59  ;;  %v7710_v57 = vld [vmem:[%s8525_s7 + $0x8c] sm:$0xf]  ;;  %v5588_v53 = vor.u32 %v7774_v42, %v5585_v43  ;;  %v5457_v13 = vld [vmem:[%s8525_s7 + $0x198] sm:$0xf0] }
  0xd0   : > { %v7742_v39 = vld [vmem:[%s8525_s7 + $0x18c] sm:$0xf]  ;;  %v5713_v3 = vld [vmem:[%s8525_s7 + $0x398] sm:$0xf0]  ;;  %v5332_v24 = vor.u32 %v7710_v57, %v5329_v60 }
  0xd1   : > { %1461 = vmatpush.bf16.msra.mxu1 %v5408_v1  ;;  %v7806_v1 = vld [vmem:[%s8525_s7 + $0x38c] sm:$0xf]  ;;  %v5569_v23 = vld [vmem:[%s8525_s7 + $0x278] sm:$0xf0]  ;;  %v5460_v15 = vor.u32 %v7742_v39, %v5457_v13  ;;  %v7851_v39 = vld [vmem:[%s8525_s7 + $0x4ec] sm:$0xf0] }
  0xd2   : > { %1481 = vmatpush.bf16.msra.mxu2 %v5520_v35  ;;  %v7770_v4 = vld [vmem:[%s8525_s7 + $0x26c] sm:$0xf]  ;;  %v5313_v25 = vld [vmem:[%s8525_s7 + $0x78] sm:$0xf0]  ;;  %v5992_v13 = vld [vmem:[%s8525_s7 + $0x4c0] sm:$0xf] }
  0xd3   : > { %1499 = vmatpush.bf16.msra.mxu3 %v5664_v29  ;;  %1443 = vmatpush.bf16.msra.mxu0 %v5264_v49  ;;  %v7706_v44 = vld [vmem:[%s8525_s7 + $0x6c] sm:$0xf]  ;;  %v5716_v29 = vor.u32 %v7806_v1, %v5713_v3  ;;  %v5572_v61 = vor.u32 %v7770_v4, %v5569_v23  ;;  %v5441_v2 = vld [vmem:[%s8525_s7 + $0x178] sm:$0xf0]  ;;  %v7847_v3 = vld [vmem:[%s8525_s7 + $0x4cc] sm:$0xf0] }
  0xd4   : > { %v7802_v35 = vld [vmem:[%s8525_s7 + $0x36c] sm:$0xf]  ;;  %v5697_v12 = vld [vmem:[%s8525_s7 + $0x378] sm:$0xf0]  ;;  %v5316_v8 = vor.u32 %v7706_v44, %v5313_v25  ;;  %v5993_v4 = vor.u32 %v7847_v3, %v5992_v13  ;;  %v5976_v23 = vld [vmem:[%s8525_s7 + $0x4a0] sm:$0xf] }
  0xd5   : > { %1462 = vmatpush.bf16.msra.mxu1 %v5392_v33  ;;  %v7766_v32 = vld [vmem:[%s8525_s7 + $0x24c] sm:$0xf]  ;;  %v5553_v33 = vld [vmem:[%s8525_s7 + $0x258] sm:$0xf0]  ;;  %v5700_v49 = vor.u32 %v7802_v35, %v5697_v12  ;;  %v5960_v44 = vld [vmem:[%s8525_s7 + $0x480] sm:$0xf] }
  0xd6   : > { %1550 = vmatpush.bf16.msrb.mxu2 %v5636_v6  ;;  %v5444_v6 = vor.u32 %v7738_v45, %v5441_v2  ;;  %v7702_v37 = vld [vmem:[%s8525_s7 + $0x4c] sm:$0xf]  ;;  %v5297_v54 = vld [vmem:[%s8525_s7 + $0x58] sm:$0xf0]  ;;  %v5556_v34 = vor.u32 %v7766_v32, %v5553_v33  ;;  %v7839_v25 = vld [vmem:[%s8525_s7 + $0x48c] sm:$0xf0] }
  0xd7   : > { %1500 = vmatpush.bf16.msra.mxu3 %v5648_v36  ;;  %1512 = vmatpush.bf16.msrb.mxu0 %v5380_v7  ;;  %v5425_v9 = vld [vmem:[%s8525_s7 + $0x158] sm:$0xf0]  ;;  %v7798_v36 = vld [vmem:[%s8525_s7 + $0x34c] sm:$0xf]  ;;  %v5912_v2 = vld [vmem:[%s8525_s7 + $0x420] sm:$0xf] }
  0xd8   : > { %1373 = vmatmul.bf16.gmra.mxu0 %v8986_v41  ;;  %1392 = vmatmul.bf16.gmra.mxu1 %v8988_v22  ;;  %v5681_v7 = vld [vmem:[%s8525_s7 + $0x358] sm:$0xf0]  ;;  %v7762_v11 = vld [vmem:[%s8525_s7 + $0x22c] sm:$0xf]  ;;  %v9151_v35 = vld [vmem:[%s8531_s12] sm:$0xf] }
  0xd9   : > { %1531 = vmatpush.bf16.msrb.mxu1 %v5508_v31  ;;  %1411 = vmatmul.bf16.gmra.mxu2 %v8993_v40  ;;  %v7734_v31 = vld [vmem:[%s8525_s7 + $0x14c] sm:$0xf]  ;;  %v5537_v16 = vld [vmem:[%s8525_s7 + $0x238] sm:$0xf0]  ;;  %v5684_v38 = vor.u32 %v7798_v36, %v5681_v7  ;;  %v9154_v12 = vperm.slane %v9151_v35, 0 }
  0xda   : > { %1551 = vmatpush.bf16.msrb.mxu2 %v5620_v55  ;;  %1430 = vmatmul.bf16.gmra.mxu3 %v8999_v30  ;;  %v5428_v55 = vor.u32 %v7734_v31, %v5425_v9  ;;  %v7698_v17 = vld [vmem:[%s8525_s7 + $0x2c] sm:$0xf]  ;;  %v5281_v18 = vld [vmem:[%s8525_s7 + $0x38] sm:$0xf0]  ;;  %v5540_v26 = vor.u32 %v7762_v11, %v5537_v16  ;;  %v6136_v32 = vld [vmem:[%s8525_s7 + $0x5e0] sm:$0xf] }
  0xdb   : > { %1569 = vmatpush.bf16.msrb.mxu3 %v5764_v46  ;;  %1513 = vmatpush.bf16.msrb.mxu0 %v5364_v14  ;;  %v5300_v46 = vor.u32 %v7702_v37, %v5297_v54  ;;  %v7730_v62 = vld [vmem:[%s8525_s7 + $0x12c] sm:$0xf]  ;;  %v5409_v19 = vld [vmem:[%s8525_s7 + $0x138] sm:$0xf0]  ;;  %v5284_v56 = vor.u32 %v7698_v17, %v5281_v18  ;;  %v7883_v37 = vld [vmem:[%s8525_s7 + $0x5ec] sm:$0xf0] }
  0xdc   : > { %v7794_v14 = vld [vmem:[%s8525_s7 + $0x32c] sm:$0xf]  ;;  %v5265_v63 = vld [vmem:[%s8525_s7 + $0x18] sm:$0xf0]  ;;  %v7849_v54 = vld [vmem:[%s8525_s7 + $0x4e4] sm:$0xf]  ;;  %v6137_v31 = vor.u32 %v7883_v37, %v6136_v32 }
  0xdd   : > { %1532 = vmatpush.bf16.msrb.mxu1 %v5492_v51  ;;  %v5665_v51 = vld [vmem:[%s8525_s7 + $0x338] sm:$0xf0]  ;;  %v7758_v59 = vld [vmem:[%s8525_s7 + $0x20c] sm:$0xf]  ;;  %v6120_v11 = vld [vmem:[%s8525_s7 + $0x5c0] sm:$0xf] }
  0xde   : > { %1552 = vmatpush.bf16.msrb.mxu2 %v5604_v48  ;;  %v5412_v48 = vor.u32 %v7730_v62, %v5409_v19  ;;  %v7694_v27 = vld [vmem:[%s8525_s7 + $0xc] sm:$0xf]  ;;  %v5668_v20 = vor.u32 %v7794_v14, %v5665_v51  ;;  %v5393_v42 = vld [vmem:[%s8525_s7 + $0x118] sm:$0xf0]  ;;  %v7879_v16 = vld [vmem:[%s8525_s7 + $0x5cc] sm:$0xf0] }
  0xdf   : > { %1570 = vmatpush.bf16.msrb.mxu3 %v5748_v47  ;;  %1514 = vmatpush.bf16.msrb.mxu0 %v5348_v52  ;;  %v5521_v47 = vld [vmem:[%s8525_s7 + $0x218] sm:$0xf0]  ;;  %v7726_v21 = vld [vmem:[%s8525_s7 + $0x10c] sm:$0xf]  ;;  %v5268_v57 = vor.u32 %v7694_v27, %v5265_v63  ;;  %v6121_v62 = vor.u32 %v7879_v16, %v6120_v11  ;;  %v5994_v19 = vld [vmem:[%s8525_s7 + $0x4d0] sm:$0xf0] }
  0xe0   : > { %v5524_v43 = vor.u32 %v7758_v59, %v5521_v47  ;;  %v7790_v52 = vld [vmem:[%s8525_s7 + $0x30c] sm:$0xf]  ;;  %v5396_v60 = vor.u32 %v7726_v21, %v5393_v42  ;;  %v7875_v51 = vld [vmem:[%s8525_s7 + $0x5ac] sm:$0xf0]  ;;  %v5978_v59 = vld [vmem:[%s8525_s7 + $0x4b0] sm:$0xf0] }
  0xe1   : > { %1533 = vmatpush.bf16.msrb.mxu1 %v5476_v28  ;;  %v5649_v28 = vld [vmem:[%s8525_s7 + $0x318] sm:$0xf0]  ;;  %v5962_v13 = vld [vmem:[%s8525_s7 + $0x490] sm:$0xf0] }
  0xe2   : > { %1553 = vmatpush.bf16.msrb.mxu2 %v5588_v53  ;;  %v6008_v53 = vld [vmem:[%s8525_s7 + $0x4e0] sm:$0xf]  ;;  %v5930_v37 = vld [vmem:[%s8525_s7 + $0x450] sm:$0xf0] }
  0xe3   : > { %1571 = vmatpush.bf16.msrb.mxu3 %v5732_v50  ;;  %1515 = vmatpush.bf16.msrb.mxu0 %v5332_v24  ;;  %v5652_v50 = vor.u32 %v7790_v52, %v5649_v28  ;;  %v6009_v1 = vor.u32 %v7851_v39, %v6008_v53  ;;  %v7843_v24 = vld [vmem:[%s8525_s7 + $0x4ac] sm:$0xf0]  ;;  %v6088_v52 = vld [vmem:[%s8525_s7 + $0x580] sm:$0xf]  ;;  %v7837_v39 = vld [vmem:[%s8525_s7 + $0x484] sm:$0xf] }
  0xe4   : > { %v7871_v28 = vld [vmem:[%s8525_s7 + $0x58c] sm:$0xf0]  ;;  %v5965_v3 = vor.u32 %v7837_v39, %v5962_v13 }
  0xe5   : > { %1534 = vmatpush.bf16.msrb.mxu1 %v5460_v15  ;;  %v5977_v15 = vor.u32 %v7843_v24, %v5976_v23  ;;  %v6089_v53 = vor.u32 %v7871_v28, %v6088_v52  ;;  %v7833_v23 = vld [vmem:[%s8525_s7 + $0x464] sm:$0xf]  ;;  %v5946_v24 = vld [vmem:[%s8525_s7 + $0x470] sm:$0xf0] }
  0xe6   : > { %1554 = vmatpush.bf16.msrb.mxu2 %v5572_v61  ;;  %v5944_v61 = vld [vmem:[%s8525_s7 + $0x460] sm:$0xf] }
  0xe7   : > { %1572 = vmatpush.bf16.msrb.mxu3 %v5716_v29  ;;  %1516 = vmatpush.bf16.msrb.mxu0 %v5316_v8  ;;  %v5961_v29 = vor.u32 %v7839_v25, %v5960_v44  ;;  %v5896_v8 = vld [vmem:[%s8525_s7 + $0x400] sm:$0xf] }
  0xe8   : > { %1444 = vmatmul.bf16.vlgmr.msra.gmra.mxu0 %v8878_v5  ;;  %1463 = vmatmul.bf16.vlgmr.msra.gmra.mxu1 %v8886_v58 }
  0xe9   : > { %1535 = vmatpush.bf16.msrb.mxu1 %v5444_v6  ;;  %1482 = vmatmul.bf16.vlgmr.msra.gmra.mxu2 %v8895_v0 }
  0xea   : > { %1555 = vmatpush.bf16.msrb.mxu2 %v5556_v34  ;;  %1501 = vmatmul.bf16.vlgmr.msra.gmra.mxu3 %v8901_v10 }
  0xeb   : > { %1573 = vmatpush.bf16.msrb.mxu3 %v5700_v49  ;;  %1517 = vmatpush.bf16.msrb.mxu0 %v5300_v46  ;;  %v6010_v49 = vld [vmem:[%s8525_s7 + $0x4f0] sm:$0xf0] }
  0xec   : > { %v6013_v9 = vor.u32 %v7849_v54, %v6010_v49  ;;  %v6040_v54 = vld [vmem:[%s8525_s7 + $0x520] sm:$0xf] }
  0xed   : > { %1536 = vmatpush.bf16.msrb.mxu1 %v5428_v55  ;;  %v7845_v55 = vld [vmem:[%s8525_s7 + $0x4c4] sm:$0xf] }
  0xee   : > { %1556 = vmatpush.bf16.msrb.mxu2 %v5540_v26  ;;  %v6104_v26 = vld [vmem:[%s8525_s7 + $0x5a0] sm:$0xf]  ;;  %v5997_v14 = vor.u32 %v7845_v55, %v5994_v19  ;;  %v7855_v19 = vld [vmem:[%s8525_s7 + $0x50c] sm:$0xf0] }
  0xef   : > { %1574 = vmatpush.bf16.msrb.mxu3 %v5684_v38  ;;  %1518 = vmatpush.bf16.msrb.mxu0 %v5284_v56  ;;  %v7841_v56 = vld [vmem:[%s8525_s7 + $0x4a4] sm:$0xf]  ;;  %v6105_v27 = vor.u32 %v7875_v51, %v6104_v26 }
  0xf0   : > { %v5981_v63 = vor.u32 %v7841_v56, %v5978_v59  ;;  %v7821_v59 = vld [vmem:[%s8525_s7 + $0x404] sm:$0xf] }
  0xf1   : > { %1537 = vmatpush.bf16.msrb.mxu1 %v5412_v48 }
  0xf2   : > { %1557 = vmatpush.bf16.msrb.mxu2 %v5524_v43 }
  0xf3   : > { %1575 = vmatpush.bf16.msrb.mxu3 %v5668_v20  ;;  %1519 = vmatpush.bf16.msrb.mxu0 %v5268_v57 }
  0xf5   : > { %1538 = vmatpush.bf16.msrb.mxu1 %v5396_v60 }
  0xf7   : > { %1576 = vmatpush.bf16.msrb.mxu3 %v5652_v50  ;;  %2440 = vmatpush.bf16.msra.mxu0 %v6009_v1  ;;  %v6072_v1 = vld [vmem:[%s8525_s7 + $0x560] sm:$0xf] }
  0xf8   : > { %1449 = vmatmul.bf16.gmra.mxu0 %v8986_v41  ;;  %1468 = vmatmul.bf16.gmra.mxu1 %v8988_v22 }
  0xf9   : > { %1487 = vmatmul.bf16.gmra.mxu2 %v8993_v40  ;;  %2459 = vmatpush.bf16.msra.mxu1 %v6137_v31 }
  0xfa   : > { %1506 = vmatmul.bf16.gmra.mxu3 %v8999_v30 }
  0xfb   : > { %2441 = vmatpush.bf16.msra.mxu0 %v5993_v4  ;;  %v7867_v4 = vld [vmem:[%s8525_s7 + $0x56c] sm:$0xf0] }
  0xfc   : > { %v6073_v25 = vor.u32 %v7867_v4, %v6072_v1 }
  0xfd   : > { %2460 = vmatpush.bf16.msra.mxu1 %v6121_v62  ;;  %v6024_v62 = vld [vmem:[%s8525_s7 + $0x500] sm:$0xf] }
  0xfe   : > { %v6025_v56 = vor.u32 %v7855_v19, %v6024_v62  ;;  %v7869_v19 = vld [vmem:[%s8525_s7 + $0x584] sm:$0xf] }
  0xff   : > { %2442 = vmatpush.bf16.msra.mxu0 %v5977_v15 }
 0x101   : > { %2461 = vmatpush.bf16.msra.mxu1 %v6105_v27 }
 0x103   : > { %2443 = vmatpush.bf16.msra.mxu0 %v5961_v29 }
 0x105   : > { %2462 = vmatpush.bf16.msra.mxu1 %v6089_v53 }
 0x108   : > { %1520 = vmatmul.bf16.vlgmr.msrb.gmra.mxu0 %v8878_v5  ;;  %1539 = vmatmul.bf16.vlgmr.msrb.gmra.mxu1 %v8886_v58  ;;  %v7835_v5 = vld [vmem:[%s8525_s7 + $0x46c] sm:$0xf0] }
 0x109   : > { %1558 = vmatmul.bf16.vlgmr.msrb.gmra.mxu2 %v8895_v0  ;;  %v5945_v58 = vor.u32 %v7835_v5, %v5944_v61  ;;  %v5928_v0 = vld [vmem:[%s8525_s7 + $0x440] sm:$0xf]  ;;  %v5949_v61 = vor.u32 %v7833_v23, %v5946_v24  ;;  %2463 = vmatpush.bf16.msra.mxu1 %v6073_v25 }
 0x10a   : > { %1577 = vmatmul.bf16.vlgmr.msrb.gmra.mxu3 %v8901_v10  ;;  %v7831_v10 = vld [vmem:[%s8525_s7 + $0x44c] sm:$0xf0] }
 0x10b   : > { %2444 = vmatpush.bf16.msra.mxu0 %v5945_v58  ;;  %v5929_v45 = vor.u32 %v7831_v10, %v5928_v0 }
 0x10f   : > { %2445 = vmatpush.bf16.msra.mxu0 %v5929_v45 }
 0x118   : > { %1525 = vmatmul.bf16.gmra.mxu0 %v8986_v41  ;;  %1544 = vmatmul.bf16.gmra.mxu1 %v8988_v22  ;;  %v7827_v41 = vld [vmem:[%s8525_s7 + $0x42c] sm:$0xf0] }
 0x119   : > { %1563 = vmatmul.bf16.gmra.mxu2 %v8993_v40  ;;  %v5913_v22 = vor.u32 %v7827_v41, %v5912_v2 }
 0x11a   : > { %1582 = vmatmul.bf16.gmra.mxu3 %v8999_v30  ;;  %v7823_v30 = vld [vmem:[%s8525_s7 + $0x40c] sm:$0xf0] }
 0x11b   : > { %2446 = vmatpush.bf16.msra.mxu0 %v5913_v22  ;;  %v5897_v6 = vor.u32 %v7823_v30, %v5896_v8  ;;  %v6056_v22 = vld [vmem:[%s8525_s7 + $0x540] sm:$0xf] }
 0x11f   : > { %2447 = vmatpush.bf16.msra.mxu0 %v5897_v6  ;;  %v7829_v6 = vld [vmem:[%s8525_s7 + $0x444] sm:$0xf] }
 0x120   : > { %v5933_v31 = vor.u32 %v7829_v6, %v5930_v37  ;;  %v6106_v6 = vld [vmem:[%s8525_s7 + $0x5b0] sm:$0xf0] }
 0x123   : > { %2516 = vmatpush.bf16.msrb.mxu0 %v6013_v9  ;;  %v7859_v9 = vld [vmem:[%s8525_s7 + $0x52c] sm:$0xf0] }
 0x124   : > { %v1293_v40 = vpop.f32.mrf.mxu0  ;;  %v6041_v11 = vor.u32 %v7859_v9, %v6040_v54  ;;  %v7844_v9 = vld [vmem:[%s8525_s7 + $0x4b4] sm:$0xf0] }
 0x125   : > { %v1312_v33 = vpop.f32.mrf.mxu1  ;;  %v1294_v34 = vadd.f32 %v1293_v40, %v9154_v12  ;;  %v7863_v40 = vld [vmem:[%s8525_s7 + $0x54c] sm:$0xf0] }
 0x127   : > { %v1313_v36 = vadd.f32 %v1312_v33, %v1294_v34  ;;  %2517 = vmatpush.bf16.msrb.mxu0 %v5997_v14  ;;  %v6057_v33 = vor.u32 %v7863_v40, %v6056_v22  ;;  %v7825_v34 = vld [vmem:[%s8525_s7 + $0x424] sm:$0xf]  ;;  %v6232_v22 = vld [vmem:[%s8525_s7 + $0x6a0] sm:$0xf] }
 0x129   : > { %2464 = vmatpush.bf16.msra.mxu1 %v6057_v33  ;;  %v7873_v33 = vld [vmem:[%s8525_s7 + $0x5a4] sm:$0xf] }
 0x12a   : > { %v6109_v54 = vor.u32 %v7873_v33, %v6106_v6  ;;  %v7857_v33 = vld [vmem:[%s8525_s7 + $0x524] sm:$0xf]  ;;  %v6042_v6 = vld [vmem:[%s8525_s7 + $0x530] sm:$0xf0] }
 0x12b   : > { %2518 = vmatpush.bf16.msrb.mxu0 %v5981_v63  ;;  %v7915_v63 = vld [vmem:[%s8525_s7 + $0x6ec] sm:$0xf0] }
 0x12c   : > { %v1331_v7 = vpop.f32.mrf.mxu2  ;;  %v1295_v46 = vpop.f32.mrf.mxu0 }
 0x12d   : > { %v1332_v17 = vadd.f32 %v1331_v7, %v1313_v36  ;;  %v1350_v18 = vpop.f32.mrf.mxu3  ;;  %v1314_v38 = vpop.f32.mrf.mxu1  ;;  %v1296_v48 = vadd.f32 %v1295_v46, %v9154_v12  ;;  %v5914_v36 = vld [vmem:[%s8525_s7 + $0x430] sm:$0xf0]  ;;  %2465 = vmatpush.bf16.msra.mxu1 %v6041_v11 }
 0x12e   : > { %v5917_v16 = vor.u32 %v7825_v34, %v5914_v36 }
 0x12f   : > { %v1351_v47 = vadd.f32 %v1350_v18, %v1332_v17  ;;  %v1315_v20 = vadd.f32 %v1314_v38, %v1296_v48  ;;  %2519 = vmatpush.bf16.msrb.mxu0 %v5965_v3  ;;  %v9195_v17 = vperm.slane %v9151_v35, 1  ;;  %v6264_v48 = vld [vmem:[%s8525_s7 + $0x6e0] sm:$0xf] }
 0x130   : > { %v6265_v52 = vor.u32 %v7915_v63, %v6264_v48 }
 0x131   : > { %vm1588_vm13 = vcmp.ge.f32.partialorder %v1351_v47, 0.0  ;;  %v1604_v21 = vmul.f32 0.2, %v1351_v47  ;;  %2466 = vmatpush.bf16.msra.mxu1 %v6025_v56  ;;  %v7840_v56 = vld [vmem:[%s8525_s7 + $0x494] sm:$0xf0] }
 0x132   : > { %2478 = vmatpush.bf16.msra.mxu2 %v6265_v52 }
 0x133   : > { %v1620_v29 = vsel %vm1588_vm13, %v1351_v47, %v1604_v21  ;;  %2520 = vmatpush.bf16.msrb.mxu0 %v5949_v61  ;;  %v5898_v47 = vld [vmem:[%s8525_s7 + $0x410] sm:$0xf0] }
 0x134   : > { %v1333_v42 = vpop.f32.mrf.mxu2  ;;  %v1636_v58 = vmul.f32 1.4142135, %v1620_v29  ;;  %v5901_v27 = vor.u32 %v7821_v59, %v5898_v47  ;;  %v6138_v21 = vld [vmem:[%s8525_s7 + $0x5f0] sm:$0xf0]  ;;  %v6200_v59 = vld [vmem:[%s8525_s7 + $0x660] sm:$0xf] }
 0x135   : > { %v1298_v43 = vpop.f32.mrf.mxu0  ;;  %v1334_v57 = vadd.f32 %v1333_v42, %v1315_v20  ;;  %v1352_v60 = vpop.f32.mrf.mxu3  ;;  %v7881_v20 = vld [vmem:[%s8525_s7 + $0x5e4] sm:$0xf]  ;;  %v7899_v47 = vld [vmem:[%s8525_s7 + $0x66c] sm:$0xf0] }
 0x136   : > { %v1317_v50 = vpop.f32.mrf.mxu1  ;;  %v1299_v44 = vadd.f32 %v1298_v43, %v9154_v12  ;;  %v6141_v28 = vor.u32 %v7881_v20, %v6138_v21  ;;  %v6201_v20 = vor.u32 %v7899_v47, %v6200_v59  ;;  %v7865_v21 = vld [vmem:[%s8525_s7 + $0x564] sm:$0xf]  ;;  %v7947_v59 = vld [vmem:[%s8525_s7 + $0x7ec] sm:$0xf0] }
 0x137   : > { %v1353_v15 = vadd.f32 %v1352_v60, %v1334_v57  ;;  %2521 = vmatpush.bf16.msrb.mxu0 %v5933_v31  ;;  %v6016_v57 = vld [vmem:[%s8525_s7 + $0x4e8] sm:$0xf]  ;;  %v7852_v60 = vld [vmem:[%s8525_s7 + $0x4f4] sm:$0xf0] }
 0x138   : > { %v1318_v10 = vadd.f32 %v1317_v50, %v1299_v44  ;;  %v6017_v53 = vor.u32 %v7852_v60, %v6016_v57  ;;  %2535 = vmatpush.bf16.msrb.mxu1 %v6141_v28  ;;  %v7911_v44 = vld [vmem:[%s8525_s7 + $0x6cc] sm:$0xf0]  ;;  %v5984_v31 = vld [vmem:[%s8525_s7 + $0x4a8] sm:$0xf]  ;;  %v7836_v57 = vld [vmem:[%s8525_s7 + $0x474] sm:$0xf0] }
 0x139   : > { %vm1592_vm14 = vcmp.ge.f32.partialorder %v1353_v15, 0.0  ;;  %v1608_v5 = vmul.f32 0.2, %v1353_v15  ;;  %v5985_v34 = vor.u32 %v7844_v9, %v5984_v31  ;;  %v6045_v31 = vor.u32 %v7857_v33, %v6042_v6 }
 0x13b   : > { %v1624_v0 = vsel %vm1592_vm14, %v1353_v15, %v1608_v5  ;;  %2522 = vmatpush.bf16.msrb.mxu0 %v5917_v16  ;;  %v6248_v15 = vld [vmem:[%s8525_s7 + $0x6c0] sm:$0xf] }
 0x13c   : > { %v1640_v45 = vmul.f32 1.4142135, %v1624_v0  ;;  %v1336_v2 = vpop.f32.mrf.mxu2  ;;  %v6249_v5 = vor.u32 %v7911_v44, %v6248_v15  ;;  %v6122_v0 = vld [vmem:[%s8525_s7 + $0x5d0] sm:$0xf0]  ;;  %v6216_v16 = vld [vmem:[%s8525_s7 + $0x680] sm:$0xf] }
 0x13d   : > { %v1300_v41 = vpop.f32.mrf.mxu0  ;;  %v1337_v8 = vadd.f32 %v1336_v2, %v1318_v10  ;;  %v1355_v30 = vpop.f32.mrf.mxu3  ;;  %v6000_v10 = vld [vmem:[%s8525_s7 + $0x4c8] sm:$0xf] }
 0x13e   : > { %v1319_v32 = vpop.f32.mrf.mxu1  ;;  %v9187_v49 = vpack.c.bf16 %v1640_v45, %v1636_v58  ;;  %v1301_v46 = vadd.f32 %v1300_v41, %v9154_v12  ;;  %v7877_v58 = vld [vmem:[%s8525_s7 + $0x5c4] sm:$0xf]  ;;  %v7848_v41 = vld [vmem:[%s8525_s7 + $0x4d4] sm:$0xf0]  ;;  %2479 = vmatpush.bf16.msra.mxu2 %v6249_v5  ;;  %v6058_v5 = vld [vmem:[%s8525_s7 + $0x550] sm:$0xf0] }
 0x13f   : > { %v1356_v7 = vadd.f32 %v1355_v30, %v1337_v8  ;;  %2523 = vmatpush.bf16.msrb.mxu0 %v5901_v27  ;;  %v6125_v2 = vor.u32 %v7877_v58, %v6122_v0  ;;  %v6001_v30 = vor.u32 %v7848_v41, %v6000_v10  ;;  %v5936_v58 = vld [vmem:[%s8525_s7 + $0x448] sm:$0xf]  ;;  %v6168_v41 = vld [vmem:[%s8525_s7 + $0x620] sm:$0xf] }
 0x140   : > { %2448 = vmatmul.bf16.vlgmr.msra.gmra.mxu0 %v9187_v49  ;;  %v1320_v55 = vadd.f32 %v1319_v32, %v1301_v46  ;;  %v7907_v32 = vld [vmem:[%s8525_s7 + $0x6ac] sm:$0xf0] }
 0x141   : > { %vm1596_vm15 = vcmp.ge.f32.partialorder %v1356_v7, 0.0  ;;  %v1612_v18 = vmul.f32 0.2, %v1356_v7  ;;  %2536 = vmatpush.bf16.msrb.mxu1 %v6125_v2  ;;  %v6233_v37 = vor.u32 %v7907_v32, %v6232_v22  ;;  %v7832_v2 = vld [vmem:[%s8525_s7 + $0x454] sm:$0xf0] }
 0x142   : > { %v7891_v22 = vld [vmem:[%s8525_s7 + $0x62c] sm:$0xf0] }
 0x143   : > { %v1628_v50 = vsel %vm1596_vm15, %v1356_v7, %v1612_v18  ;;  %2592 = vmatpush.bf16.msra.mxu0 %v6017_v53  ;;  %2480 = vmatpush.bf16.msra.mxu2 %v6233_v37  ;;  %v6169_v32 = vor.u32 %v7891_v22, %v6168_v41  ;;  %v5920_v37 = vld [vmem:[%s8525_s7 + $0x428] sm:$0xf] }
 0x144   : > { %v1338_v12 = vpop.f32.mrf.mxu2  ;;  %v1644_v13 = vmul.f32 1.4142135, %v1628_v50 }
 0x145   : > { %v1369_v38 = vpop.f32.mrf.mxu0  ;;  %v1339_v26 = vadd.f32 %v1338_v12, %v1320_v55  ;;  %v1357_v14 = vpop.f32.mrf.mxu3  ;;  %2537 = vmatpush.bf16.msrb.mxu1 %v6109_v54  ;;  %v7903_v55 = vld [vmem:[%s8525_s7 + $0x68c] sm:$0xf0]  ;;  %v7828_v54 = vld [vmem:[%s8525_s7 + $0x434] sm:$0xf0] }
 0x146   : > { %v1388_v51 = vpop.f32.mrf.mxu1  ;;  %v1370_v43 = vadd.f32 %v1369_v38, %v9195_v17  ;;  %v6217_v62 = vor.u32 %v7903_v55, %v6216_v16  ;;  %v5921_v9 = vor.u32 %v7828_v54, %v5920_v37  ;;  %v7887_v16 = vld [vmem:[%s8525_s7 + $0x60c] sm:$0xf0]  ;;  %v6360_v54 = vld [vmem:[%s8525_s7 + $0x7a0] sm:$0xf] }
 0x147   : > { %v1358_v42 = vadd.f32 %v1357_v14, %v1339_v26  ;;  %2593 = vmatpush.bf16.msra.mxu0 %v6001_v30  ;;  %v6090_v26 = vld [vmem:[%s8525_s7 + $0x590] sm:$0xf0]  ;;  %v5968_v14 = vld [vmem:[%s8525_s7 + $0x488] sm:$0xf]  ;;  %v5937_v30 = vor.u32 %v7832_v2, %v5936_v58  ;;  %v7909_v58 = vld [vmem:[%s8525_s7 + $0x6c4] sm:$0xf] }
 0x148   : > { %v1389_v3 = vadd.f32 %v1388_v51, %v1370_v43  ;;  %v6093_v51 = vor.u32 %v7869_v19, %v6090_v26  ;;  %2481 = vmatpush.bf16.msra.mxu2 %v6217_v62  ;;  %v5969_v63 = vor.u32 %v7840_v56, %v5968_v14  ;;  %v5952_v43 = vld [vmem:[%s8525_s7 + $0x468] sm:$0xf]  ;;  %v7853_v62 = vld [vmem:[%s8525_s7 + $0x504] sm:$0xf]  ;;  %v6026_v19 = vld [vmem:[%s8525_s7 + $0x510] sm:$0xf0] }
 0x149   : > { %vm1600_vm0 = vcmp.ge.f32.partialorder %v1358_v42, 0.0  ;;  %v1616_v39 = vmul.f32 0.2, %v1358_v42  ;;  %v5953_v50 = vor.u32 %v7836_v57, %v5952_v43  ;;  %v5904_v26 = vld [vmem:[%s8525_s7 + $0x408] sm:$0xf]  ;;  %v6029_v14 = vor.u32 %v7853_v62, %v6026_v19 }
 0x14a   : > { %2538 = vmatpush.bf16.msrb.mxu1 %v6093_v51  ;;  %v7824_v51 = vld [vmem:[%s8525_s7 + $0x414] sm:$0xf0]  ;;  %v6392_v56 = vld [vmem:[%s8525_s7 + $0x7e0] sm:$0xf]  ;;  %v7850_v57 = vld [vmem:[%s8525_s7 + $0x4ec] sm:$0xf] }
 0x14b   : > { %v1632_v1 = vsel %vm1600_vm0, %v1358_v42, %v1616_v39  ;;  %2594 = vmatpush.bf16.msra.mxu0 %v5985_v34  ;;  %v6074_v42 = vld [vmem:[%s8525_s7 + $0x570] sm:$0xf0]  ;;  %v9257_v34 = vperm.slane %v9151_v35, 2  ;;  %v6128_v2 = vld [vmem:[%s8525_s7 + $0x5c8] sm:$0xf] }
 0x14c   : > { %v1648_v4 = vmul.f32 1.4142135, %v1632_v1  ;;  %v1407_v23 = vpop.f32.mrf.mxu2  ;;  %v6077_v28 = vor.u32 %v7865_v21, %v6074_v42  ;;  %2482 = vmatpush.bf16.msra.mxu2 %v6201_v20  ;;  %v7913_v20 = vld [vmem:[%s8525_s7 + $0x6e4] sm:$0xf]  ;;  %v6266_v21 = vld [vmem:[%s8525_s7 + $0x6f0] sm:$0xf0] }
 0x14d   : > { %v1371_v24 = vpop.f32.mrf.mxu0  ;;  %v1408_v25 = vadd.f32 %v1407_v23, %v1389_v3  ;;  %v1426_v29 = vpop.f32.mrf.mxu3  ;;  %v6184_v23 = vld [vmem:[%s8525_s7 + $0x640] sm:$0xf]  ;;  %v6144_v42 = vld [vmem:[%s8525_s7 + $0x5e8] sm:$0xf] }
 0x14e   : > { %v1390_v61 = vpop.f32.mrf.mxu1  ;;  %v9214_v45 = vpack.c.bf16 %v1648_v4, %v1644_v13  ;;  %v1372_v8 = vadd.f32 %v1371_v24, %v9195_v17  ;;  %2539 = vmatpush.bf16.msrb.mxu1 %v6077_v28  ;;  %v7895_v24 = vld [vmem:[%s8525_s7 + $0x64c] sm:$0xf0]  ;;  %v7884_v28 = vld [vmem:[%s8525_s7 + $0x5f4] sm:$0xf0] }
 0x14f   : > { %v1427_v40 = vadd.f32 %v1426_v29, %v1408_v25  ;;  %2595 = vmatpush.bf16.msra.mxu0 %v5969_v63  ;;  %v6185_v29 = vor.u32 %v7895_v24, %v6184_v23  ;;  %v6393_v63 = vor.u32 %v7947_v59, %v6392_v56 }
 0x150   : > { %2453 = vmatmul.bf16.gmra.mxu0 %v9214_v45  ;;  %v1391_v36 = vadd.f32 %v1390_v61, %v1372_v8  ;;  %v7861_v61 = vld [vmem:[%s8525_s7 + $0x544] sm:$0xf] }
 0x151   : > { %vm1589_vm1 = vcmp.ge.f32.partialorder %v1427_v40, 0.0  ;;  %v1605_v7 = vmul.f32 0.2, %v1427_v40  ;;  %v6061_v10 = vor.u32 %v7861_v61, %v6058_v5  ;;  %2483 = vmatpush.bf16.msra.mxu2 %v6185_v29  ;;  %2497 = vmatpush.bf16.msra.mxu3 %v6393_v63  ;;  %v6218_v63 = vld [vmem:[%s8525_s7 + $0x690] sm:$0xf0] }
 0x153   : > { %v1621_v52 = vsel %vm1589_vm1, %v1427_v40, %v1605_v7  ;;  %2596 = vmatpush.bf16.msra.mxu0 %v5953_v50  ;;  %2540 = vmatpush.bf16.msrb.mxu1 %v6061_v10  ;;  %v6250_v10 = vld [vmem:[%s8525_s7 + $0x6d0] sm:$0xf0] }
 0x154   : > { %v1409_v46 = vpop.f32.mrf.mxu2  ;;  %v1637_v53 = vmul.f32 1.4142135, %v1621_v52  ;;  %v6269_v52 = vor.u32 %v7913_v20, %v6266_v21  ;;  %v6253_v22 = vor.u32 %v7909_v58, %v6250_v10  ;;  %v6096_v20 = vld [vmem:[%s8525_s7 + $0x588] sm:$0xf] }
 0x155   : > { %v1374_v11 = vpop.f32.mrf.mxu0  ;;  %v1410_v18 = vadd.f32 %v1409_v46, %v1391_v36  ;;  %v1428_v12 = vpop.f32.mrf.mxu3  ;;  %2484 = vmatpush.bf16.msra.mxu2 %v6169_v32 }
 0x156   : > { %v1393_v38 = vpop.f32.mrf.mxu1  ;;  %v1375_v27 = vadd.f32 %v1374_v11, %v9195_v17  ;;  %v6152_v11 = vld [vmem:[%s8525_s7 + $0x600] sm:$0xf] }
 0x157   : > { %v1429_v48 = vadd.f32 %v1428_v12, %v1410_v18  ;;  %2597 = vmatpush.bf16.msra.mxu0 %v5937_v30  ;;  %2541 = vmatpush.bf16.msrb.mxu1 %v6045_v31  ;;  %v6002_v30 = vld [vmem:[%s8525_s7 + $0x4d8] sm:$0xf0]  ;;  %v7939_v31 = vld [vmem:[%s8525_s7 + $0x7ac] sm:$0xf0] }
 0x158   : > { %v1394_v13 = vadd.f32 %v1393_v38, %v1375_v27  ;;  %v6153_v38 = vor.u32 %v7887_v16, %v6152_v11  ;;  %v5905_v27 = vor.u32 %v7824_v51, %v5904_v26  ;;  %v7876_v11 = vld [vmem:[%s8525_s7 + $0x5b4] sm:$0xf0]  ;;  %v7935_v51 = vld [vmem:[%s8525_s7 + $0x78c] sm:$0xf0] }
 0x159   : > { %vm1593_vm2 = vcmp.ge.f32.partialorder %v1429_v48, 0.0  ;;  %v1609_v60 = vmul.f32 0.2, %v1429_v48 }
 0x15a   : > { %2485 = vmatpush.bf16.msra.mxu2 %v6153_v38 }
 0x15b   : > { %v1625_v39 = vsel %vm1593_vm2, %v1429_v48, %v1609_v60  ;;  %2598 = vmatpush.bf16.msra.mxu0 %v5921_v9  ;;  %v6018_v60 = vld [vmem:[%s8525_s7 + $0x4f8] sm:$0xf0]  ;;  %2542 = vmatpush.bf16.msrb.mxu1 %v6029_v14  ;;  %v7905_v9 = vld [vmem:[%s8525_s7 + $0x6a4] sm:$0xf]  ;;  %v6344_v14 = vld [vmem:[%s8525_s7 + $0x780] sm:$0xf] }
 0x15c   : > { %v1641_v1 = vmul.f32 1.4142135, %v1625_v39  ;;  %v1412_v3 = vpop.f32.mrf.mxu2  ;;  %v6021_v39 = vor.u32 %v7850_v57, %v6018_v60 }
 0x15d   : > { %v1376_v4 = vpop.f32.mrf.mxu0  ;;  %v1413_v15 = vadd.f32 %v1412_v3, %v1394_v13  ;;  %v1431_v44 = vpop.f32.mrf.mxu3 }
 0x15e   : > { %v1395_v25 = vpop.f32.mrf.mxu1  ;;  %v9244_v0 = vpack.c.bf16 %v1641_v1, %v1637_v53  ;;  %v1377_v8 = vadd.f32 %v1376_v4, %v9195_v17  ;;  %v6145_v53 = vor.u32 %v7884_v28, %v6144_v42  ;;  %2554 = vmatpush.bf16.msrb.mxu2 %v6269_v52  ;;  %v7872_v42 = vld [vmem:[%s8525_s7 + $0x594] sm:$0xf0]  ;;  %v5970_v52 = vld [vmem:[%s8525_s7 + $0x498] sm:$0xf0] }
 0x15f   : > { %v1432_v40 = vadd.f32 %v1431_v44, %v1413_v15  ;;  %2599 = vmatpush.bf16.msra.mxu0 %v5905_v27  ;;  %v6376_v15 = vld [vmem:[%s8525_s7 + $0x7c0] sm:$0xf]  ;;  %v7943_v44 = vld [vmem:[%s8525_s7 + $0x7cc] sm:$0xf0]  ;;  %v7901_v27 = vld [vmem:[%s8525_s7 + $0x684] sm:$0xf]  ;;  %v6097_v60 = vor.u32 %v7872_v42, %v6096_v20 }
 0x160   : > { %2467 = vmatmul.bf16.vlgmr.msra.gmra.mxu1 %v9244_v0  ;;  %2524 = vmatmul.bf16.vlgmr.msrb.gmra.mxu0 %v9187_v49  ;;  %v1396_v17 = vadd.f32 %v1395_v25, %v1377_v8  ;;  %v6377_v5 = vor.u32 %v7943_v44, %v6376_v15  ;;  %v7846_v8 = vld [vmem:[%s8525_s7 + $0x4cc] sm:$0xf]  ;;  %v6221_v21 = vor.u32 %v7901_v27, %v6218_v63  ;;  %v5922_v27 = vld [vmem:[%s8525_s7 + $0x438] sm:$0xf0]  ;;  %v9337_v20 = vperm.slane %v9151_v35, 3 }
 0x161   : > { %vm1597_vm3 = vcmp.ge.f32.partialorder %v1432_v40, 0.0  ;;  %v1613_v36 = vmul.f32 0.2, %v1432_v40  ;;  %2611 = vmatpush.bf16.msra.mxu1 %v6145_v53  ;;  %v6005_v37 = vor.u32 %v7846_v8, %v6002_v30  ;;  %v6328_v53 = vld [vmem:[%s8525_s7 + $0x760] sm:$0xf] }
 0x162   : > { %2498 = vmatpush.bf16.msra.mxu3 %v6377_v5  ;;  %2555 = vmatpush.bf16.msrb.mxu2 %v6253_v22  ;;  %v6312_v30 = vld [vmem:[%s8525_s7 + $0x740] sm:$0xf]  ;;  %v6154_v35 = vld [vmem:[%s8525_s7 + $0x610] sm:$0xf0] }
 0x163   : > { %v1629_v43 = vsel %vm1597_vm3, %v1432_v40, %v1613_v36  ;;  %2668 = vmatpush.bf16.msrb.mxu0 %v6021_v39  ;;  %v7880_v40 = vld [vmem:[%s8525_s7 + $0x5d4] sm:$0xf0]  ;;  %v6234_v36 = vld [vmem:[%s8525_s7 + $0x6b0] sm:$0xf0]  ;;  %v7931_v39 = vld [vmem:[%s8525_s7 + $0x76c] sm:$0xf0] }
 0x164   : > { %v1414_v7 = vpop.f32.mrf.mxu2  ;;  %v1645_v13 = vmul.f32 1.4142135, %v1629_v43  ;;  %v6129_v6 = vor.u32 %v7880_v40, %v6128_v2  ;;  %v7838_v43 = vld [vmem:[%s8525_s7 + $0x48c] sm:$0xf] }
 0x165   : > { %v1445_v46 = vpop.f32.mrf.mxu0  ;;  %v1415_v55 = vadd.f32 %v1414_v7, %v1396_v17  ;;  %v1433_v18 = vpop.f32.mrf.mxu3  ;;  %v6361_v17 = vor.u32 %v7939_v31, %v6360_v54  ;;  %v6112_v7 = vld [vmem:[%s8525_s7 + $0x5a8] sm:$0xf]  ;;  %v7893_v31 = vld [vmem:[%s8525_s7 + $0x644] sm:$0xf] }
 0x166   : > { %v1464_v12 = vpop.f32.mrf.mxu1  ;;  %v1446_v48 = vadd.f32 %v1445_v46, %v9257_v34  ;;  %2612 = vmatpush.bf16.msra.mxu1 %v6129_v6  ;;  %v6237_v46 = vor.u32 %v7905_v9, %v6234_v36  ;;  %v6113_v16 = vor.u32 %v7876_v11, %v6112_v7  ;;  %v6186_v9 = vld [vmem:[%s8525_s7 + $0x650] sm:$0xf0]  ;;  %v7830_v11 = vld [vmem:[%s8525_s7 + $0x44c] sm:$0xf] }
 0x167   : > { %v1434_v47 = vadd.f32 %v1433_v18, %v1415_v55  ;;  %2669 = vmatpush.bf16.msrb.mxu0 %v6005_v37  ;;  %v7842_v55 = vld [vmem:[%s8525_s7 + $0x4ac] sm:$0xf]  ;;  %v5986_v18 = vld [vmem:[%s8525_s7 + $0x4b8] sm:$0xf0]  ;;  %2499 = vmatpush.bf16.msra.mxu3 %v6361_v17  ;;  %v6064_v17 = vld [vmem:[%s8525_s7 + $0x548] sm:$0xf]  ;;  %v6189_v7 = vor.u32 %v7893_v31, %v6186_v9 }
 0x168   : > { %v1465_v3 = vadd.f32 %v1464_v12, %v1446_v48  ;;  %v5989_v38 = vor.u32 %v7842_v55, %v5986_v18  ;;  %2556 = vmatpush.bf16.msrb.mxu2 %v6237_v46  ;;  %v6345_v48 = vor.u32 %v7935_v51, %v6344_v14  ;;  %v7864_v46 = vld [vmem:[%s8525_s7 + $0x554] sm:$0xf0]  ;;  %v6170_v51 = vld [vmem:[%s8525_s7 + $0x630] sm:$0xf0] }
 0x169   : > { %vm1601_vm4 = vcmp.ge.f32.partialorder %v1434_v47, 0.0  ;;  %v1617_v50 = vmul.f32 0.2, %v1434_v47 }
 0x16a   : > { %2613 = vmatpush.bf16.msra.mxu1 %v6113_v16  ;;  %v5938_v16 = vld [vmem:[%s8525_s7 + $0x458] sm:$0xf0] }
 0x16b   : > { %v1633_v1 = vsel %vm1601_vm4, %v1434_v47, %v1617_v50  ;;  %2670 = vmatpush.bf16.msrb.mxu0 %v5989_v38  ;;  %2500 = vmatpush.bf16.msra.mxu3 %v6345_v48  ;;  %v5973_v50 = vor.u32 %v7838_v43, %v5970_v52  ;;  %v5941_v38 = vor.u32 %v7830_v11, %v5938_v16 }
 0x16c   : > { %v1649_v4 = vmul.f32 1.4142135, %v1633_v1  ;;  %v1483_v23 = vpop.f32.mrf.mxu2  ;;  %2557 = vmatpush.bf16.msrb.mxu2 %v6221_v21 }
 0x16d   : > { %v1447_v24 = vpop.f32.mrf.mxu0  ;;  %v1484_v25 = vadd.f32 %v1483_v23, %v1465_v3  ;;  %v1502_v29 = vpop.f32.mrf.mxu3  ;;  %v6329_v3 = vor.u32 %v7931_v39, %v6328_v53  ;;  %v6080_v23 = vld [vmem:[%s8525_s7 + $0x568] sm:$0xf] }
 0x16e   : > { %v1466_v61 = vpop.f32.mrf.mxu1  ;;  %v9280_v41 = vpack.c.bf16 %v1649_v4, %v1645_v13  ;;  %v1448_v33 = vadd.f32 %v1447_v24, %v9257_v34  ;;  %v7897_v13 = vld [vmem:[%s8525_s7 + $0x664] sm:$0xf]  ;;  %v6202_v4 = vld [vmem:[%s8525_s7 + $0x670] sm:$0xf0]  ;;  %v7868_v24 = vld [vmem:[%s8525_s7 + $0x574] sm:$0xf0]  ;;  %2614 = vmatpush.bf16.msra.mxu1 %v6097_v60 }
 0x16f   : > { %v1503_v32 = vadd.f32 %v1502_v29, %v1484_v25  ;;  %v6205_v44 = vor.u32 %v7897_v13, %v6202_v4  ;;  %v6081_v25 = vor.u32 %v7868_v24, %v6080_v23  ;;  %v7834_v29 = vld [vmem:[%s8525_s7 + $0x46c] sm:$0xf]  ;;  %2671 = vmatpush.bf16.msrb.mxu0 %v5973_v50  ;;  %2501 = vmatpush.bf16.msra.mxu3 %v6329_v3  ;;  %v7885_v13 = vld [vmem:[%s8525_s7 + $0x604] sm:$0xf]  ;;  %v7856_v4 = vld [vmem:[%s8525_s7 + $0x514] sm:$0xf0] }
 0x170   : > { %2472 = vmatmul.bf16.gmra.mxu1 %v9280_v41  ;;  %2529 = vmatmul.bf16.gmra.mxu0 %v9214_v45  ;;  %v1467_v12 = vadd.f32 %v1466_v61, %v1448_v33  ;;  %v5954_v61 = vld [vmem:[%s8525_s7 + $0x478] sm:$0xf0]  ;;  %v6157_v3 = vor.u32 %v7885_v13, %v6154_v35  ;;  %v7822_v23 = vld [vmem:[%s8525_s7 + $0x40c] sm:$0xf] }
 0x171   : > { %vm1590_vm5 = vcmp.ge.f32.partialorder %v1503_v32, 0.0  ;;  %v1606_v62 = vmul.f32 0.2, %v1503_v32  ;;  %v5957_v2 = vor.u32 %v7834_v29, %v5954_v61  ;;  %2558 = vmatpush.bf16.msrb.mxu2 %v6205_v44  ;;  %v5906_v24 = vld [vmem:[%s8525_s7 + $0x418] sm:$0xf0] }
 0x172   : > { %2615 = vmatpush.bf16.msra.mxu1 %v6081_v25  ;;  %v5909_v29 = vor.u32 %v7822_v23, %v5906_v24  ;;  %v7945_v61 = vld [vmem:[%s8525_s7 + $0x7e4] sm:$0xf]  ;;  %v7870_v35 = vld [vmem:[%s8525_s7 + $0x58c] sm:$0xf]  ;;  %v6330_v24 = vld [vmem:[%s8525_s7 + $0x770] sm:$0xf0] }
 0x173   : > { %v1622_v1 = vsel %vm1590_vm5, %v1503_v32, %v1606_v62  ;;  %v7927_v32 = vld [vmem:[%s8525_s7 + $0x74c] sm:$0xf0]  ;;  %2672 = vmatpush.bf16.msrb.mxu0 %v5957_v2  ;;  %v6296_v62 = vld [vmem:[%s8525_s7 + $0x720] sm:$0xf]  ;;  %v7929_v23 = vld [vmem:[%s8525_s7 + $0x764] sm:$0xf] }
 0x174   : > { %v1485_v19 = vpop.f32.mrf.mxu2  ;;  %v1638_v5 = vmul.f32 1.4142135, %v1622_v1  ;;  %v6313_v54 = vor.u32 %v7927_v32, %v6312_v30  ;;  %v6032_v1 = vld [vmem:[%s8525_s7 + $0x508] sm:$0xf] }
 0x175   : > { %v1450_v26 = vpop.f32.mrf.mxu0  ;;  %v1486_v56 = vadd.f32 %v1485_v19, %v1467_v12  ;;  %v1504_v59 = vpop.f32.mrf.mxu3  ;;  %v6065_v12 = vor.u32 %v7864_v46, %v6064_v17  ;;  %v7923_v19 = vld [vmem:[%s8525_s7 + $0x72c] sm:$0xf0]  ;;  %2559 = vmatpush.bf16.msrb.mxu2 %v6189_v7  ;;  %v6033_v25 = vor.u32 %v7856_v4, %v6032_v1  ;;  %v7941_v7 = vld [vmem:[%s8525_s7 + $0x7c4] sm:$0xf]  ;;  %v6378_v46 = vld [vmem:[%s8525_s7 + $0x7d0] sm:$0xf0] }
 0x176   : > { %v1469_v47 = vpop.f32.mrf.mxu1  ;;  %v1451_v57 = vadd.f32 %v1450_v26, %v9257_v34  ;;  %2502 = vmatpush.bf16.msra.mxu3 %v6313_v54  ;;  %v7889_v26 = vld [vmem:[%s8525_s7 + $0x624] sm:$0xf]  ;;  %v6297_v14 = vor.u32 %v7923_v19, %v6296_v62  ;;  %v6098_v1 = vld [vmem:[%s8525_s7 + $0x598] sm:$0xf0] }
 0x177   : > { %v1505_v28 = vadd.f32 %v1504_v59, %v1486_v56  ;;  %v6048_v56 = vld [vmem:[%s8525_s7 + $0x528] sm:$0xf]  ;;  %v7860_v59 = vld [vmem:[%s8525_s7 + $0x534] sm:$0xf0]  ;;  %2616 = vmatpush.bf16.msra.mxu1 %v6065_v12  ;;  %2673 = vmatpush.bf16.msrb.mxu0 %v5941_v38  ;;  %v7878_v38 = vld [vmem:[%s8525_s7 + $0x5cc] sm:$0xf] }
 0x178   : > { %v1470_v10 = vadd.f32 %v1469_v47, %v1451_v57  ;;  %v7826_v47 = vld [vmem:[%s8525_s7 + $0x42c] sm:$0xf]  ;;  %v6049_v48 = vor.u32 %v7860_v59, %v6048_v56  ;;  %v7919_v57 = vld [vmem:[%s8525_s7 + $0x70c] sm:$0xf0]  ;;  %v7912_v12 = vld [vmem:[%s8525_s7 + $0x6d4] sm:$0xf0] }
 0x179   : > { %vm1594_vm6 = vcmp.ge.f32.partialorder %v1505_v28, 0.0  ;;  %v1610_v15 = vmul.f32 0.2, %v1505_v28  ;;  %v5925_v21 = vor.u32 %v7826_v47, %v5922_v27  ;;  %v6362_v56 = vld [vmem:[%s8525_s7 + $0x7b0] sm:$0xf0] }
 0x17a   : > { %2503 = vmatpush.bf16.msra.mxu3 %v6297_v14  ;;  %v6130_v14 = vld [vmem:[%s8525_s7 + $0x5d8] sm:$0xf0]  ;;  %v6240_v27 = vld [vmem:[%s8525_s7 + $0x6a8] sm:$0xf] }
 0x17b   : > { %v1626_v58 = vsel %vm1594_vm6, %v1505_v28, %v1610_v15  ;;  %v6280_v28 = vld [vmem:[%s8525_s7 + $0x700] sm:$0xf]  ;;  %2617 = vmatpush.bf16.msra.mxu1 %v6049_v48  ;;  %2674 = vmatpush.bf16.msrb.mxu0 %v5925_v21  ;;  %v6133_v47 = vor.u32 %v7878_v38, %v6130_v14  ;;  %v7874_v21 = vld [vmem:[%s8525_s7 + $0x5ac] sm:$0xf] }
 0x17c   : > { %v1642_v22 = vmul.f32 1.4142135, %v1626_v58  ;;  %v1488_v40 = vpop.f32.mrf.mxu2  ;;  %v6281_v39 = vor.u32 %v7919_v57, %v6280_v28  ;;  %v6272_v58 = vld [vmem:[%s8525_s7 + $0x6e8] sm:$0xf] }
 0x17d   : > { %v1452_v8 = vpop.f32.mrf.mxu0  ;;  %v1489_v33 = vadd.f32 %v1488_v40, %v1470_v10  ;;  %v1507_v6 = vpop.f32.mrf.mxu3  ;;  %v7882_v40 = vld [vmem:[%s8525_s7 + $0x5ec] sm:$0xf] }
 0x17e   : > { %v1471_v37 = vpop.f32.mrf.mxu1  ;;  %v9319_v36 = vpack.c.bf16 %v1642_v22, %v1638_v5  ;;  %v1453_v18 = vadd.f32 %v1452_v8, %v9257_v34  ;;  %v6173_v34 = vor.u32 %v7889_v26, %v6170_v51  ;;  %2504 = vmatpush.bf16.msra.mxu3 %v6281_v39  ;;  %v6394_v5 = vld [vmem:[%s8525_s7 + $0x7f0] sm:$0xf0]  ;;  %v7916_v22 = vld [vmem:[%s8525_s7 + $0x6f4] sm:$0xf0]  ;;  %v6146_v8 = vld [vmem:[%s8525_s7 + $0x5f8] sm:$0xf0] }
 0x17f   : > { %v1508_v55 = vadd.f32 %v1507_v6, %v1489_v33  ;;  %v6397_v2 = vor.u32 %v7945_v61, %v6394_v5  ;;  %v6273_v32 = vor.u32 %v7916_v22, %v6272_v58  ;;  %v6149_v33 = vor.u32 %v7882_v40, %v6146_v8  ;;  %2618 = vmatpush.bf16.msra.mxu1 %v6033_v25  ;;  %v7937_v51 = vld [vmem:[%s8525_s7 + $0x7a4] sm:$0xf]  ;;  %v6208_v61 = vld [vmem:[%s8525_s7 + $0x668] sm:$0xf]  ;;  %v7900_v5 = vld [vmem:[%s8525_s7 + $0x674] sm:$0xf0] }
 0x180   : > { %2486 = vmatmul.bf16.vlgmr.msra.gmra.mxu2 %v9319_v36  ;;  %2543 = vmatmul.bf16.vlgmr.msrb.gmra.mxu1 %v9244_v0  ;;  %v1472_v63 = vadd.f32 %v1471_v37, %v1453_v18  ;;  %v6256_v18 = vld [vmem:[%s8525_s7 + $0x6c8] sm:$0xf]  ;;  %v6365_v48 = vor.u32 %v7937_v51, %v6362_v56  ;;  %v6333_v22 = vor.u32 %v7929_v23, %v6330_v24  ;;  %v7866_v40 = vld [vmem:[%s8525_s7 + $0x56c] sm:$0xf]  ;;  %v6082_v8 = vld [vmem:[%s8525_s7 + $0x578] sm:$0xf0] }
 0x181   : > { %2600 = vmatmul.bf16.vlgmr.msra.gmra.mxu0 %v9187_v49  ;;  %vm1598_vm7 = vcmp.ge.f32.partialorder %v1508_v55, 0.0  ;;  %v1614_v42 = vmul.f32 0.2, %v1508_v55  ;;  %2560 = vmatpush.bf16.msrb.mxu2 %v6173_v34  ;;  %v6257_v26 = vor.u32 %v7912_v12, %v6256_v18 }
 0x182   : > { %2675 = vmatpush.bf16.msrb.mxu0 %v5909_v29  ;;  %2573 = vmatpush.bf16.msrb.mxu3 %v6397_v2  ;;  %v6101_v29 = vor.u32 %v7870_v35, %v6098_v1  ;;  %v7888_v1 = vld [vmem:[%s8525_s7 + $0x614] sm:$0xf0] }
 0x183   : > { %v1630_v10 = vsel %vm1598_vm7, %v1508_v55, %v1614_v42  ;;  %2687 = vmatpush.bf16.msrb.mxu1 %v6149_v33  ;;  %v6381_v55 = vor.u32 %v7941_v7, %v6378_v46  ;;  %v6114_v42 = vld [vmem:[%s8525_s7 + $0x5b8] sm:$0xf0]  ;;  %v6314_v33 = vld [vmem:[%s8525_s7 + $0x750] sm:$0xf0] }
 0x184   : > { %v1490_v43 = vpop.f32.mrf.mxu2  ;;  %v1646_v6 = vmul.f32 1.4142135, %v1630_v10  ;;  %v6117_v57 = vor.u32 %v7874_v21, %v6114_v42  ;;  %v7858_v21 = vld [vmem:[%s8525_s7 + $0x52c] sm:$0xf]  ;;  %v6050_v42 = vld [vmem:[%s8525_s7 + $0x538] sm:$0xf0] }
 0x185   : > { %v1521_v52 = vpop.f32.mrf.mxu0  ;;  %v1491_v60 = vadd.f32 %v1490_v43, %v1472_v63  ;;  %v1509_v50 = vpop.f32.mrf.mxu3  ;;  %2561 = vmatpush.bf16.msrb.mxu2 %v6157_v3  ;;  %v7908_v63 = vld [vmem:[%s8525_s7 + $0x6b4] sm:$0xf0]  ;;  %v7933_v43 = vld [vmem:[%s8525_s7 + $0x784] sm:$0xf] }
 0x186   : > { %v1540_v53 = vpop.f32.mrf.mxu1  ;;  %v1522_v44 = vadd.f32 %v1521_v52, %v9337_v20  ;;  %2574 = vmatpush.bf16.msrb.mxu3 %v6381_v55  ;;  %v6346_v52 = vld [vmem:[%s8525_s7 + $0x790] sm:$0xf0]  ;;  %v6241_v28 = vor.u32 %v7908_v63, %v6240_v27  ;;  %v6066_v55 = vld [vmem:[%s8525_s7 + $0x558] sm:$0xf0]  ;;  %v7892_v63 = vld [vmem:[%s8525_s7 + $0x634] sm:$0xf0] }
 0x187   : > { %v1510_v15 = vadd.f32 %v1509_v50, %v1491_v60  ;;  %2688 = vmatpush.bf16.msrb.mxu1 %v6133_v47  ;;  %v6224_v60 = vld [vmem:[%s8525_s7 + $0x688] sm:$0xf]  ;;  %v7904_v50 = vld [vmem:[%s8525_s7 + $0x694] sm:$0xf0]  ;;  %v6349_v13 = vor.u32 %v7933_v43, %v6346_v52  ;;  %v7917_v52 = vld [vmem:[%s8525_s7 + $0x704] sm:$0xf] }
 0x188   : > { %v1541_v54 = vadd.f32 %v1540_v53, %v1522_v44  ;;  %v6225_v25 = vor.u32 %v7904_v50, %v6224_v60  ;;  %v6176_v47 = vld [vmem:[%s8525_s7 + $0x628] sm:$0xf] }
 0x189   : > { %vm1602_vm8 = vcmp.ge.f32.partialorder %v1510_v15, 0.0  ;;  %v1618_v30 = vmul.f32 0.2, %v1510_v15  ;;  %2630 = vmatpush.bf16.msra.mxu2 %v6273_v32  ;;  %v7925_v32 = vld [vmem:[%s8525_s7 + $0x744] sm:$0xf]  ;;  %v6177_v50 = vor.u32 %v7892_v63, %v6176_v47 }
 0x18a   : > { %2575 = vmatpush.bf16.msrb.mxu3 %v6365_v48  ;;  %v6317_v46 = vor.u32 %v7925_v32, %v6314_v33  ;;  %v6258_v32 = vld [vmem:[%s8525_s7 + $0x6d8] sm:$0xf0]  ;;  %v6320_v63 = vld [vmem:[%s8525_s7 + $0x748] sm:$0xf] }
 0x18b   : > { %v1634_v37 = vsel %vm1602_vm8, %v1510_v15, %v1618_v30  ;;  %2689 = vmatpush.bf16.msrb.mxu1 %v6117_v57  ;;  %v7948_v57 = vld [vmem:[%s8525_s7 + $0x7f4] sm:$0xf0]  ;;  %v6210_v47 = vld [vmem:[%s8525_s7 + $0x678] sm:$0xf0] }
 0x18c   : > { %v1650_v31 = vmul.f32 1.4142135, %v1634_v37  ;;  %v1559_v9 = vpop.f32.mrf.mxu2  ;;  %v6209_v37 = vor.u32 %v7900_v5, %v6208_v61  ;;  %v7944_v61 = vld [vmem:[%s8525_s7 + $0x7d4] sm:$0xf0] }
 0x18d   : > { %v1523_v17 = vpop.f32.mrf.mxu0  ;;  %v1560_v11 = vadd.f32 %v1559_v9, %v1541_v54  ;;  %v1578_v16 = vpop.f32.mrf.mxu3  ;;  %2631 = vmatpush.bf16.msra.mxu2 %v6257_v26  ;;  %v6192_v9 = vld [vmem:[%s8525_s7 + $0x648] sm:$0xf]  ;;  %v6298_v26 = vld [vmem:[%s8525_s7 + $0x730] sm:$0xf0] }
 0x18e   : > { %v1542_v62 = vpop.f32.mrf.mxu1  ;;  %v9360_v19 = vpack.c.bf16 %v1650_v31, %v1646_v6  ;;  %v1524_v34 = vadd.f32 %v1523_v17, %v9337_v20  ;;  %2576 = vmatpush.bf16.msrb.mxu3 %v6349_v13  ;;  %v6085_v31 = vor.u32 %v7866_v40, %v6082_v8 }
 0x18f   : > { %v1579_v59 = vadd.f32 %v1578_v16, %v1560_v11  ;;  %2690 = vmatpush.bf16.msrb.mxu1 %v6101_v29  ;;  %v7896_v11 = vld [vmem:[%s8525_s7 + $0x654] sm:$0xf0]  ;;  %v7862_v16 = vld [vmem:[%s8525_s7 + $0x54c] sm:$0xf]  ;;  %v6384_v29 = vld [vmem:[%s8525_s7 + $0x7c8] sm:$0xf] }
 0x190   : > { %2491 = vmatmul.bf16.gmra.mxu2 %v9360_v19  ;;  %2548 = vmatmul.bf16.gmra.mxu1 %v9280_v41  ;;  %v1543_v39 = vadd.f32 %v1542_v62, %v1524_v34  ;;  %v7921_v62 = vld [vmem:[%s8525_s7 + $0x724] sm:$0xf]  ;;  %v6069_v34 = vor.u32 %v7862_v16, %v6066_v55  ;;  %v6385_v8 = vor.u32 %v7944_v61, %v6384_v29  ;;  %v7938_v29 = vld [vmem:[%s8525_s7 + $0x7ac] sm:$0xf]  ;;  %v6370_v61 = vld [vmem:[%s8525_s7 + $0x7b8] sm:$0xf0] }
 0x191   : > { %2605 = vmatmul.bf16.gmra.mxu0 %v9214_v45  ;;  %v1607_v53 = vmul.f32 0.2, %v1579_v59  ;;  %vm1591_vm9 = vcmp.ge.f32.partialorder %v1579_v59, 0.0  ;;  %2632 = vmatpush.bf16.msra.mxu2 %v6241_v28  ;;  %v6301_v27 = vor.u32 %v7921_v62, %v6298_v26  ;;  %v6282_v28 = vld [vmem:[%s8525_s7 + $0x710] sm:$0xf0] }
 0x192   : > { %2577 = vmatpush.bf16.msrb.mxu3 %v6333_v22  ;;  %v6285_v35 = vor.u32 %v7917_v52, %v6282_v28  ;;  %v6226_v62 = vld [vmem:[%s8525_s7 + $0x698] sm:$0xf0]  ;;  %v6304_v28 = vld [vmem:[%s8525_s7 + $0x728] sm:$0xf] }
 0x193   : > { %v1623_v58 = vsel %vm1591_vm9, %v1579_v59, %v1607_v53  ;;  %2691 = vmatpush.bf16.msrb.mxu1 %v6085_v31  ;;  %v6193_v59 = vor.u32 %v7896_v11, %v6192_v9  ;;  %v6053_v53 = vor.u32 %v7858_v21, %v6050_v42  ;;  %v6368_v31 = vld [vmem:[%s8525_s7 + $0x7a8] sm:$0xf]  ;;  %v7940_v9 = vld [vmem:[%s8525_s7 + $0x7b4] sm:$0xf0]  ;;  %v7894_v21 = vld [vmem:[%s8525_s7 + $0x64c] sm:$0xf] }
 0x194   : > { %v1561_v3 = vpop.f32.mrf.mxu2  ;;  %v1639_v54 = vmul.f32 1.4142135, %v1623_v58  ;;  %v6369_v16 = vor.u32 %v7940_v9, %v6368_v31  ;;  %v6194_v42 = vld [vmem:[%s8525_s7 + $0x658] sm:$0xf0] }
 0x195   : > { %v1526_v4 = vpop.f32.mrf.mxu0  ;;  %v1562_v15 = vadd.f32 %v1561_v3, %v1543_v39  ;;  %v1580_v44 = vpop.f32.mrf.mxu3  ;;  %2633 = vmatpush.bf16.msra.mxu2 %v6225_v25  ;;  %v6160_v39 = vld [vmem:[%s8525_s7 + $0x608] sm:$0xf]  ;;  %v7854_v3 = vld [vmem:[%s8525_s7 + $0x50c] sm:$0xf]  ;;  %v6197_v52 = vor.u32 %v7894_v21, %v6194_v42  ;;  %v6290_v31 = vld [vmem:[%s8525_s7 + $0x718] sm:$0xf0] }
 0x196   : > { %v1527_v2 = vadd.f32 %v1526_v4, %v9337_v20  ;;  %v1545_v30 = vpop.f32.mrf.mxu1  ;;  %2578 = vmatpush.bf16.msrb.mxu3 %v6317_v46  ;;  %v6034_v4 = vld [vmem:[%s8525_s7 + $0x518] sm:$0xf0]  ;;  %v6161_v58 = vor.u32 %v7888_v1, %v6160_v39  ;;  %v6288_v39 = vld [vmem:[%s8525_s7 + $0x708] sm:$0xf] }
 0x197   : > { %v1581_v10 = vadd.f32 %v1580_v44, %v1562_v15  ;;  %2692 = vmatpush.bf16.msrb.mxu1 %v6069_v34  ;;  %v7914_v15 = vld [vmem:[%s8525_s7 + $0x6ec] sm:$0xf]  ;;  %v6274_v44 = vld [vmem:[%s8525_s7 + $0x6f8] sm:$0xf0] }
 0x198   : > { %v1546_v7 = vadd.f32 %v1545_v30, %v1527_v2  ;;  %v6277_v22 = vor.u32 %v7914_v15, %v6274_v44  ;;  %v7910_v30 = vld [vmem:[%s8525_s7 + $0x6cc] sm:$0xf]  ;;  %v6242_v46 = vld [vmem:[%s8525_s7 + $0x6b8] sm:$0xf0] }
 0x199   : > { %vm1595_vm10 = vcmp.ge.f32.partialorder %v1581_v10, 0.0  ;;  %v1611_v6 = vmul.f32 0.2, %v1581_v10  ;;  %2634 = vmatpush.bf16.msra.mxu2 %v6209_v37  ;;  %v7898_v34 = vld [vmem:[%s8525_s7 + $0x66c] sm:$0xf] }
 0x19a   : > { %2579 = vmatpush.bf16.msrb.mxu3 %v6301_v27  ;;  %v6213_v27 = vor.u32 %v7898_v34, %v6210_v47  ;;  %v6162_v1 = vld [vmem:[%s8525_s7 + $0x618] sm:$0xf0]  ;;  %v7942_v15 = vld [vmem:[%s8525_s7 + $0x7cc] sm:$0xf]  ;;  %v6585_v47 = vld [vmem:[%s8525_s7 + $0x860] sm:$0xf] }
 0x19b   : > { %v1627_v17 = vsel %vm1595_vm10, %v1581_v10, %v1611_v6  ;;  %2693 = vmatpush.bf16.msrb.mxu1 %v6053_v53  ;;  %v6037_v10 = vor.u32 %v7854_v3, %v6034_v4  ;;  %v7946_v3 = vld [vmem:[%s8525_s7 + $0x7ec] sm:$0xf]  ;;  %v6402_v4 = vld [vmem:[%s8525_s7 + $0x7f8] sm:$0xf0] }
 0x19c   : > { %v1643_v18 = vmul.f32 1.4142135, %v1627_v17  ;;  %v1564_v12 = vpop.f32.mrf.mxu2  ;;  %v6386_v44 = vld [vmem:[%s8525_s7 + $0x7d8] sm:$0xf0] }
 0x19d   : > { %v1528_v38 = vpop.f32.mrf.mxu0  ;;  %v1565_v14 = vadd.f32 %v1564_v12, %v1546_v7  ;;  %v1583_v51 = vpop.f32.mrf.mxu3  ;;  %2635 = vmatpush.bf16.msra.mxu2 %v6193_v59  ;;  %v7906_v7 = vld [vmem:[%s8525_s7 + $0x6ac] sm:$0xf]  ;;  %v7936_v12 = vld [vmem:[%s8525_s7 + $0x794] sm:$0xf0] }
 0x19e   : > { %v9394_v56 = vpack.c.bf16 %v1643_v18, %v1639_v54  ;;  %v1529_v48 = vadd.f32 %v1528_v38, %v9337_v20  ;;  %v6400_v20 = vld [vmem:[%s8525_s7 + $0x7e8] sm:$0xf]  ;;  %v1547_v60 = vpop.f32.mrf.mxu1  ;;  %2580 = vmatpush.bf16.msrb.mxu3 %v6285_v35  ;;  %v6261_v54 = vor.u32 %v7910_v30, %v6258_v32  ;;  %v6245_v55 = vor.u32 %v7906_v7, %v6242_v46  ;;  %v7902_v38 = vld [vmem:[%s8525_s7 + $0x68c] sm:$0xf]  ;;  %v7932_v59 = vld [vmem:[%s8525_s7 + $0x774] sm:$0xf0] }
 0x19f   : > { %v1584_v43 = vadd.f32 %v1583_v51, %v1565_v14  ;;  %v6401_v24 = vor.u32 %v7948_v57, %v6400_v20  ;;  %2694 = vmatpush.bf16.msrb.mxu1 %v6037_v10  ;;  %v6352_v18 = vld [vmem:[%s8525_s7 + $0x788] sm:$0xf]  ;;  %v6229_v14 = vor.u32 %v7902_v38, %v6226_v62  ;;  %v7924_v20 = vld [vmem:[%s8525_s7 + $0x734] sm:$0xf0]  ;;  %v7890_v57 = vld [vmem:[%s8525_s7 + $0x62c] sm:$0xf] }
 0x1a0   : > { %2505 = vmatmul.bf16.vlgmr.msra.gmra.mxu3 %v9394_v56  ;;  %2562 = vmatmul.bf16.vlgmr.msrb.gmra.mxu2 %v9319_v36  ;;  %v1548_v13 = vadd.f32 %v1547_v60, %v1529_v48  ;;  %v6353_v26 = vor.u32 %v7936_v12, %v6352_v18  ;;  %v6336_v51 = vld [vmem:[%s8525_s7 + $0x768] sm:$0xf]  ;;  %v6178_v60 = vld [vmem:[%s8525_s7 + $0x638] sm:$0xf0]  ;;  %v7886_v35 = vld [vmem:[%s8525_s7 + $0x60c] sm:$0xf] }
 0x1a1   : > { %2619 = vmatmul.bf16.vlgmr.msra.gmra.mxu1 %v9244_v0  ;;  %2676 = vmatmul.bf16.vlgmr.msrb.gmra.mxu0 %v9187_v49  ;;  %v1615_v23 = vmul.f32 0.2, %v1584_v43  ;;  %vm1599_vm11 = vcmp.ge.f32.partialorder %v1584_v43, 0.0  ;;  %v6337_v48 = vor.u32 %v7932_v59, %v6336_v51  ;;  %v6181_v53 = vor.u32 %v7890_v57, %v6178_v60  ;;  %v6322_v30 = vld [vmem:[%s8525_s7 + $0x758] sm:$0xf0] }
 0x1a2   : > { %2636 = vmatpush.bf16.msra.mxu2 %v6177_v50  ;;  %2649 = vmatpush.bf16.msra.mxu3 %v6401_v24  ;;  %v6305_v50 = vor.u32 %v7924_v20, %v6304_v28  ;;  %v6405_v24 = vor.u32 %v7946_v3, %v6402_v4  ;;  %v6633_v7 = vld [vmem:[%s8525_s7 + $0x8c0] sm:$0xf]  ;;  %v7971_v38 = vld [vmem:[%s8525_s7 + $0x8ac] sm:$0xf0]  ;;  %v6651_v4 = vld [vmem:[%s8525_s7 + $0x8f0] sm:$0xf0] }
 0x1a3   : > { %v1631_v40 = vsel %vm1599_vm11, %v1584_v43, %v1615_v23  ;;  %v6617_v12 = vld [vmem:[%s8525_s7 + $0x8a0] sm:$0xf]  ;;  %v7955_v28 = vld [vmem:[%s8525_s7 + $0x82c] sm:$0xf0] }
 0x1a4   : > { %v1566_v49 = vpop.f32.mrf.mxu2  ;;  %v1647_v6 = vmul.f32 1.4142135, %v1631_v40  ;;  %v6601_v62 = vld [vmem:[%s8525_s7 + $0x880] sm:$0xf]  ;;  %v7951_v60 = vld [vmem:[%s8525_s7 + $0x80c] sm:$0xf0] }
 0x1a5   : > { %v1567_v25 = vadd.f32 %v1566_v49, %v1548_v13  ;;  %v1585_v5 = vpop.f32.mrf.mxu3  ;;  %v7920_v13 = vld [vmem:[%s8525_s7 + $0x714] sm:$0xf0]  ;;  %v6165_v49 = vor.u32 %v7886_v35, %v6162_v1  ;;  %v6537_v20 = vld [vmem:[%s8525_s7 + $0x800] sm:$0xf]  ;;  %v8011_v35 = vld [vmem:[%s8525_s7 + $0x9ec] sm:$0xf0] }
 0x1a6   : > { %2637 = vmatpush.bf16.msra.mxu2 %v6161_v58  ;;  %2650 = vmatpush.bf16.msra.mxu3 %v6385_v8  ;;  %v6289_v23 = vor.u32 %v7920_v13, %v6288_v39  ;;  %v6354_v58 = vld [vmem:[%s8525_s7 + $0x798] sm:$0xf0]  ;;  %v7926_v8 = vld [vmem:[%s8525_s7 + $0x74c] sm:$0xf]  ;;  %v6777_v13 = vld [vmem:[%s8525_s7 + $0x9e0] sm:$0xf] }
 0x1a7   : > { %v1586_v2 = vadd.f32 %v1585_v5, %v1567_v25  ;;  %v6389_v25 = vor.u32 %v7942_v15, %v6386_v44  ;;  %v7934_v5 = vld [vmem:[%s8525_s7 + $0x78c] sm:$0xf]  ;;  %v6325_v32 = vor.u32 %v7926_v8, %v6322_v30  ;;  %v7977_v1 = vld [vmem:[%s8525_s7 + $0x8e4] sm:$0xf]  ;;  %v6778_v3 = vor.u32 %v8011_v35, %v6777_v13 }
 0x1a8   : > { %v6357_v10 = vor.u32 %v7934_v5, %v6354_v58  ;;  %v6654_v15 = vor.u32 %v7977_v1, %v6651_v4  ;;  %v7973_v44 = vld [vmem:[%s8525_s7 + $0x8c4] sm:$0xf] }
 0x1a9   : > { %vm1603_vm12 = vcmp.ge.f32.partialorder %v1586_v2, 0.0  ;;  %v1619_v33 = vmul.f32 0.2, %v1586_v2  ;;  %3615 = vmatpush.bf16.msra.mxu1 %v6778_v3 }
 0x1aa   : > { %2706 = vmatpush.bf16.msrb.mxu2 %v6277_v22  ;;  %2651 = vmatpush.bf16.msra.mxu3 %v6369_v16  ;;  %v6338_v22 = vld [vmem:[%s8525_s7 + $0x778] sm:$0xf0]  ;;  %v7975_v16 = vld [vmem:[%s8525_s7 + $0x8cc] sm:$0xf0] }
 0x1ab   : > { %v1635_v37 = vsel %vm1603_vm12, %v1586_v2, %v1619_v33  ;;  %v7930_v2 = vld [vmem:[%s8525_s7 + $0x76c] sm:$0xf] }
 0x1ac   : > { %v1651_v17 = vmul.f32 1.4142135, %v1635_v37  ;;  %v6341_v40 = vor.u32 %v7930_v2, %v6338_v22  ;;  %v7922_v33 = vld [vmem:[%s8525_s7 + $0x72c] sm:$0xf]  ;;  %v6745_v2 = vld [vmem:[%s8525_s7 + $0x9a0] sm:$0xf] }
 0x1ad   : > { %v8003_v22 = vld [vmem:[%s8525_s7 + $0x9ac] sm:$0xf0] }
 0x1ae   : > { %v9423_v11 = vpack.c.bf16 %v1651_v17, %v1647_v6  ;;  %2707 = vmatpush.bf16.msrb.mxu2 %v6261_v54  ;;  %2652 = vmatpush.bf16.msra.mxu3 %v6353_v26  ;;  %v6306_v6 = vld [vmem:[%s8525_s7 + $0x738] sm:$0xf0]  ;;  %v7918_v54 = vld [vmem:[%s8525_s7 + $0x70c] sm:$0xf]  ;;  %v7979_v17 = vld [vmem:[%s8525_s7 + $0x8ec] sm:$0xf0]  ;;  %v6746_v30 = vor.u32 %v8003_v22, %v6745_v2 }
 0x1af   : > { %v6309_v37 = vor.u32 %v7922_v33, %v6306_v6  ;;  %v6293_v9 = vor.u32 %v7918_v54, %v6290_v31  ;;  %v7967_v26 = vld [vmem:[%s8525_s7 + $0x88c] sm:$0xf0]  ;;  %v6729_v33 = vld [vmem:[%s8525_s7 + $0x980] sm:$0xf]  ;;  %v7965_v31 = vld [vmem:[%s8525_s7 + $0x884] sm:$0xf] }
 0x1b0   : > { %2510 = vmatmul.bf16.gmra.mxu3 %v9423_v11  ;;  %2567 = vmatmul.bf16.gmra.mxu2 %v9360_v19  ;;  %v7999_v6 = vld [vmem:[%s8525_s7 + $0x98c] sm:$0xf0]  ;;  %v7949_v2 = vld [vmem:[%s8525_s7 + $0x804] sm:$0xf] }
 0x1b1   : > { %2624 = vmatmul.bf16.gmra.mxu1 %v9280_v41  ;;  %2681 = vmatmul.bf16.gmra.mxu0 %v9214_v45  ;;  %v7928_v45 = vld [vmem:[%s8525_s7 + $0x754] sm:$0xf0] }
 0x1b2   : > { %2708 = vmatpush.bf16.msrb.mxu2 %v6245_v55  ;;  %2653 = vmatpush.bf16.msra.mxu3 %v6337_v48  ;;  %v6321_v43 = vor.u32 %v7928_v45, %v6320_v63  ;;  %v6634_v55 = vor.u32 %v7975_v16, %v6633_v7  ;;  %v7963_v48 = vld [vmem:[%s8525_s7 + $0x86c] sm:$0xf0] }
 0x1b3   : > { %v7959_v63 = vld [vmem:[%s8525_s7 + $0x84c] sm:$0xf0] }
 0x1b6   : > { %2709 = vmatpush.bf16.msrb.mxu2 %v6229_v14  ;;  %2654 = vmatpush.bf16.msra.mxu3 %v6321_v43  ;;  %v6602_v14 = vor.u32 %v7967_v26, %v6601_v62 }
 0x1ba   : > { %2710 = vmatpush.bf16.msrb.mxu2 %v6213_v27  ;;  %2655 = vmatpush.bf16.msra.mxu3 %v6305_v50  ;;  %v6569_v27 = vld [vmem:[%s8525_s7 + $0x840] sm:$0xf]  ;;  %v9504_v50 = vld [vmem:[%s8531_s12 + $0x4] sm:$0xf] }
 0x1bb   : > { %v6570_v21 = vor.u32 %v7959_v63, %v6569_v27  ;;  %v9509_v39 = vperm.slane %v9504_v50, 0  ;;  %v7991_v27 = vld [vmem:[%s8525_s7 + $0x94c] sm:$0xf0] }
 0x1bd   : > { %v2449_v18 = vpop.f32.mrf.mxu0 }
 0x1be   : > { %2711 = vmatpush.bf16.msrb.mxu2 %v6197_v52  ;;  %2656 = vmatpush.bf16.msra.mxu3 %v6289_v23  ;;  %v6553_v52 = vld [vmem:[%s8525_s7 + $0x820] sm:$0xf]  ;;  %v2450_v5 = vadd.f32 %v2449_v18, %v9509_v39 }
 0x1bf   : > { %v6554_v57 = vor.u32 %v7955_v28, %v6553_v52  ;;  %v6761_v23 = vld [vmem:[%s8525_s7 + $0x9c0] sm:$0xf] }
 0x1c0   : > { %2581 = vmatmul.bf16.vlgmr.msrb.gmra.mxu3 %v9394_v56  ;;  %2638 = vmatmul.bf16.vlgmr.msra.gmra.mxu2 %v9319_v36 }
 0x1c1   : > { %2695 = vmatmul.bf16.vlgmr.msrb.gmra.mxu1 %v9244_v0  ;;  %v6373_v0 = vor.u32 %v7938_v29, %v6370_v61 }
 0x1c2   : > { %2712 = vmatpush.bf16.msrb.mxu2 %v6181_v53  ;;  %2725 = vmatpush.bf16.msrb.mxu3 %v6405_v24 }
 0x1c5   : > { %v9484_v59 = vpop.f32.mrf.mxu0 }
 0x1c6   : > { %2713 = vmatpush.bf16.msrb.mxu2 %v6165_v49  ;;  %2726 = vmatpush.bf16.msrb.mxu3 %v6389_v25  ;;  %v8007_v49 = vld [vmem:[%s8525_s7 + $0x9cc] sm:$0xf0]  ;;  %v6635_v25 = vld [vmem:[%s8525_s7 + $0x8d0] sm:$0xf0]  ;;  %v2452_v16 = vadd.f32 %v9484_v59, %v9509_v39  ;;  %v6697_v59 = vld [vmem:[%s8525_s7 + $0x940] sm:$0xf] }
 0x1c7   : > { %v6762_v29 = vor.u32 %v8007_v49, %v6761_v23  ;;  %v7987_v49 = vld [vmem:[%s8525_s7 + $0x92c] sm:$0xf0] }
 0x1c9   : > { %3616 = vmatpush.bf16.msra.mxu1 %v6762_v29  ;;  %v6555_v29 = vld [vmem:[%s8525_s7 + $0x830] sm:$0xf0] }
 0x1ca   : > { %2727 = vmatpush.bf16.msrb.mxu3 %v6373_v0  ;;  %v6638_v0 = vor.u32 %v7973_v44, %v6635_v25 }
 0x1cd   : > { %v9495_v42 = vpop.f32.mrf.mxu0  ;;  %3617 = vmatpush.bf16.msra.mxu1 %v6746_v30  ;;  %v9577_v30 = vperm.slane %v9504_v50, 1 }
 0x1ce   : > { %2728 = vmatpush.bf16.msrb.mxu3 %v6357_v10  ;;  %v2455_v28 = vadd.f32 %v9495_v42, %v9509_v39 }
 0x1d0   : > { %2586 = vmatmul.bf16.gmra.mxu3 %v9423_v11  ;;  %2643 = vmatmul.bf16.gmra.mxu2 %v9360_v19 }
 0x1d1   : > { %2700 = vmatmul.bf16.gmra.mxu1 %v9280_v41  ;;  %v6649_v41 = vld [vmem:[%s8525_s7 + $0x8e0] sm:$0xf] }
 0x1d2   : > { %2729 = vmatpush.bf16.msrb.mxu3 %v6341_v40  ;;  %v6650_v46 = vor.u32 %v7979_v17, %v6649_v41  ;;  %v7969_v40 = vld [vmem:[%s8525_s7 + $0x8a4] sm:$0xf]  ;;  %v6730_v17 = vor.u32 %v7999_v6, %v6729_v33 }
 0x1d4   : > { %3596 = vmatpush.bf16.msra.mxu0 %v6650_v46  ;;  %3618 = vmatpush.bf16.msra.mxu1 %v6730_v17 }
 0x1d5   : > { %v9517_v24 = vpop.f32.mrf.mxu0 }
 0x1d6   : > { %2730 = vmatpush.bf16.msrb.mxu3 %v6325_v32  ;;  %v6619_v32 = vld [vmem:[%s8525_s7 + $0x8b0] sm:$0xf0]  ;;  %v2457_v22 = vadd.f32 %v9517_v24, %v9509_v39  ;;  %v8043_v39 = vld [vmem:[%s8525_s7 + $0xaec] sm:$0xf0] }
 0x1d7   : > { %v6622_v54 = vor.u32 %v7969_v40, %v6619_v32 }
 0x1d8   : > { %3597 = vmatpush.bf16.msra.mxu0 %v6634_v55 }
 0x1da   : > { %2731 = vmatpush.bf16.msrb.mxu3 %v6309_v37 }
 0x1dd   : > { %v9534_v7 = vpop.f32.mrf.mxu0 }
 0x1de   : > { %2732 = vmatpush.bf16.msrb.mxu3 %v6293_v9  ;;  %v6603_v9 = vld [vmem:[%s8525_s7 + $0x890] sm:$0xf0] }
 0x1df   : > { %v6606_v46 = vor.u32 %v7965_v31, %v6603_v9  ;;  %v8009_v31 = vld [vmem:[%s8525_s7 + $0x9e4] sm:$0xf]  ;;  %v6779_v9 = vld [vmem:[%s8525_s7 + $0x9f0] sm:$0xf0] }
 0x1e0   : > { %2657 = vmatmul.bf16.vlgmr.msra.gmra.mxu3 %v9394_v56  ;;  %2714 = vmatmul.bf16.vlgmr.msrb.gmra.mxu2 %v9319_v36  ;;  %v2468_v36 = vpop.f32.mrf.mxu1 }
 0x1e1   : > { %v2469_v10 = vadd.f32 %v2468_v36, %v2450_v5  ;;  %v7983_v5 = vld [vmem:[%s8525_s7 + $0x90c] sm:$0xf0] }
 0x1e8   : > { %v9486_v34 = vpop.f32.mrf.mxu1 }
 0x1e9   : > { %v2471_v18 = vadd.f32 %v9486_v34, %v2452_v16  ;;  %v7957_v34 = vld [vmem:[%s8525_s7 + $0x844] sm:$0xf]  ;;  %v7980_v16 = vld [vmem:[%s8525_s7 + $0x8f4] sm:$0xf0] }
 0x1f0   : > { %2662 = vmatmul.bf16.gmra.mxu3 %v9423_v11  ;;  %2719 = vmatmul.bf16.gmra.mxu2 %v9360_v19  ;;  %v6618_v19 = vor.u32 %v7971_v38, %v6617_v12  ;;  %v9497_v43 = vpop.f32.mrf.mxu1  ;;  %v6713_v38 = vld [vmem:[%s8525_s7 + $0x960] sm:$0xf] }
 0x1f2   : > { %3598 = vmatpush.bf16.msra.mxu0 %v6618_v19  ;;  %v7995_v19 = vld [vmem:[%s8525_s7 + $0x96c] sm:$0xf0] }
 0x1f3   : > { %v6714_v26 = vor.u32 %v7995_v19, %v6713_v38 }
 0x1f5   : > { %3619 = vmatpush.bf16.msra.mxu1 %v6714_v26  ;;  %v6763_v26 = vld [vmem:[%s8525_s7 + $0x9d0] sm:$0xf0] }
 0x1f6   : > { %3599 = vmatpush.bf16.msra.mxu0 %v6602_v14  ;;  %v7961_v14 = vld [vmem:[%s8525_s7 + $0x864] sm:$0xf] }
 0x1f8   : > { %v9521_v61 = vpop.f32.mrf.mxu1 }
 0x1f9   : > { %v2476_v32 = vadd.f32 %v9521_v61, %v2457_v22  ;;  %v7968_v22 = vld [vmem:[%s8525_s7 + $0x894] sm:$0xf0] }
 0x200   : > { %2733 = vmatmul.bf16.vlgmr.msrb.gmra.mxu3 %v9394_v56  ;;  %v6586_v56 = vor.u32 %v7963_v48, %v6585_v47  ;;  %v9538_v55 = vpop.f32.mrf.mxu1 }
 0x202   : > { %3600 = vmatpush.bf16.msra.mxu0 %v6586_v56  ;;  %v6571_v56 = vld [vmem:[%s8525_s7 + $0x850] sm:$0xf0] }
 0x203   : > { %v2487_v51 = vpop.f32.mrf.mxu2  ;;  %v6574_v52 = vor.u32 %v7957_v34, %v6571_v56 }
 0x204   : > { %v2488_v8 = vadd.f32 %v2487_v51, %v2469_v10  ;;  %v6587_v51 = vld [vmem:[%s8525_s7 + $0x870] sm:$0xf0] }
 0x205   : > { %v6590_v48 = vor.u32 %v7961_v14, %v6587_v51  ;;  %v6641_v14 = vld [vmem:[%s8525_s7 + $0x8c8] sm:$0xf] }
 0x206   : > { %3601 = vmatpush.bf16.msra.mxu0 %v6570_v21  ;;  %v6698_v21 = vor.u32 %v7991_v27, %v6697_v59  ;;  %v2526_v27 = vadd.f32 %v9534_v7, %v9577_v30 }
 0x208   : > { %3620 = vmatpush.bf16.msra.mxu1 %v6698_v21  ;;  %v9558_v13 = vpop.f32.mrf.mxu1 }
 0x20a   : > { %3602 = vmatpush.bf16.msra.mxu0 %v6554_v57  ;;  %v9555_v57 = vpop.f32.mrf.mxu0 }
 0x20b   : > { %v9492_v45 = vpop.f32.mrf.mxu2 }
 0x20c   : > { %v2490_v62 = vadd.f32 %v9492_v45, %v2471_v18  ;;  %v6889_v18 = vld [vmem:[%s8525_s7 + $0xac0] sm:$0xf] }
 0x210   : > { %2738 = vmatmul.bf16.gmra.mxu3 %v9423_v11  ;;  %v6538_v11 = vor.u32 %v7951_v60, %v6537_v20  ;;  %v2474_v60 = vadd.f32 %v9497_v43, %v2455_v28  ;;  %v6681_v43 = vld [vmem:[%s8525_s7 + $0x920] sm:$0xf]  ;;  %v9588_v61 = vpop.f32.mrf.mxu1 }
 0x211   : > { %v6682_v25 = vor.u32 %v7987_v49, %v6681_v43  ;;  %v7972_v49 = vld [vmem:[%s8525_s7 + $0x8b4] sm:$0xf0] }
 0x212   : > { %3603 = vmatpush.bf16.msra.mxu0 %v6538_v11  ;;  %v9580_v33 = vpop.f32.mrf.mxu0 }
 0x213   : > { %v9506_v53 = vpop.f32.mrf.mxu2  ;;  %3621 = vmatpush.bf16.msra.mxu1 %v6682_v25 }
 0x214   : > { %v2493_v1 = vadd.f32 %v9506_v53, %v2474_v60  ;;  %v6539_v53 = vld [vmem:[%s8525_s7 + $0x810] sm:$0xf0] }
 0x216   : > { %3672 = vmatpush.bf16.msrb.mxu0 %v6654_v15  ;;  %v7953_v15 = vld [vmem:[%s8525_s7 + $0x824] sm:$0xf] }
 0x217   : > { %v6558_v10 = vor.u32 %v7953_v15, %v6555_v29  ;;  %v6857_v15 = vld [vmem:[%s8525_s7 + $0xa80] sm:$0xf] }
 0x21a   : > { %3673 = vmatpush.bf16.msrb.mxu0 %v6638_v0  ;;  %v6665_v0 = vld [vmem:[%s8525_s7 + $0x900] sm:$0xf] }
 0x21b   : > { %v9524_v58 = vpop.f32.mrf.mxu2  ;;  %v6666_v40 = vor.u32 %v7983_v5, %v6665_v0  ;;  %v7997_v0 = vld [vmem:[%s8525_s7 + $0x984] sm:$0xf]  ;;  %v6731_v5 = vld [vmem:[%s8525_s7 + $0x990] sm:$0xf0] }
 0x21c   : > { %v2495_v24 = vadd.f32 %v9524_v58, %v2476_v32 }
 0x21d   : > { %3622 = vmatpush.bf16.msra.mxu1 %v6666_v40  ;;  %v2528_v40 = vadd.f32 %v9555_v57, %v9577_v30 }
 0x21e   : > { %3674 = vmatpush.bf16.msrb.mxu0 %v6622_v54 }
 0x222   : > { %3675 = vmatpush.bf16.msrb.mxu0 %v6606_v46  ;;  %v6782_v46 = vor.u32 %v8009_v31, %v6779_v9  ;;  %v7993_v31 = vld [vmem:[%s8525_s7 + $0x964] sm:$0xf]  ;;  %v6715_v9 = vld [vmem:[%s8525_s7 + $0x970] sm:$0xf0] }
 0x223   : > { %v2506_v37 = vpop.f32.mrf.mxu3  ;;  %v9541_v12 = vpop.f32.mrf.mxu2 }
 0x224   : > { %v2507_v41 = vadd.f32 %v2506_v37, %v2488_v8  ;;  %v6542_v8 = vor.u32 %v7949_v2, %v6539_v53  ;;  %v6905_v37 = vld [vmem:[%s8525_s7 + $0xae0] sm:$0xf]  ;;  %3691 = vmatpush.bf16.msrb.mxu1 %v6782_v46  ;;  %v9619_v2 = vpop.f32.mrf.mxu1  ;;  %v6734_v53 = vor.u32 %v7997_v0, %v6731_v5  ;;  %v7964_v46 = vld [vmem:[%s8525_s7 + $0x874] sm:$0xf0]  ;;  %v6667_v5 = vld [vmem:[%s8525_s7 + $0x910] sm:$0xf0] }
 0x225   : > { %v6906_v54 = vor.u32 %v8043_v39, %v6905_v37  ;;  %v6841_v39 = vld [vmem:[%s8525_s7 + $0xa60] sm:$0xf] }
 0x226   : > { %vm2744_vm13 = vcmp.ge.f32.partialorder %v2507_v41, 0.0  ;;  %v2760_v36 = vmul.f32 0.2, %v2507_v41  ;;  %3676 = vmatpush.bf16.msrb.mxu0 %v6590_v48  ;;  %v7976_v48 = vld [vmem:[%s8525_s7 + $0x8d4] sm:$0xf0] }
 0x227   : > { %3634 = vmatpush.bf16.msra.mxu2 %v6906_v54  ;;  %v6642_v56 = vor.u32 %v7976_v48, %v6641_v14 }
 0x228   : > { %v2776_v45 = vsel %vm2744_vm13, %v2507_v41, %v2760_v36  ;;  %v6657_v41 = vld [vmem:[%s8525_s7 + $0x8e8] sm:$0xf]  ;;  %v8039_v36 = vld [vmem:[%s8525_s7 + $0xacc] sm:$0xf0] }
 0x229   : > { %v2792_v35 = vmul.f32 1.4142135, %v2776_v45  ;;  %v6658_v58 = vor.u32 %v7980_v16, %v6657_v41  ;;  %v6890_v19 = vor.u32 %v8039_v36, %v6889_v18  ;;  %v6873_v45 = vld [vmem:[%s8525_s7 + $0xaa0] sm:$0xf]  ;;  %v6593_v41 = vld [vmem:[%s8525_s7 + $0x868] sm:$0xf] }
 0x22a   : > { %3677 = vmatpush.bf16.msrb.mxu0 %v6574_v52  ;;  %v6825_v16 = vld [vmem:[%s8525_s7 + $0xa40] sm:$0xf]  ;;  %v8023_v18 = vld [vmem:[%s8525_s7 + $0xa4c] sm:$0xf0] }
 0x22b   : > { %v2508_v47 = vpop.f32.mrf.mxu3  ;;  %v9563_v4 = vpop.f32.mrf.mxu2  ;;  %3635 = vmatpush.bf16.msra.mxu2 %v6890_v19  ;;  %v7989_v19 = vld [vmem:[%s8525_s7 + $0x944] sm:$0xf] }
 0x22c   : > { %v2509_v63 = vadd.f32 %v2508_v47, %v2490_v62  ;;  %v8005_v62 = vld [vmem:[%s8525_s7 + $0x9c4] sm:$0xf] }
 0x22d   : > { %v6766_v47 = vor.u32 %v8005_v62, %v6763_v26  ;;  %v6699_v62 = vld [vmem:[%s8525_s7 + $0x950] sm:$0xf0]  ;;  %v2531_v26 = vadd.f32 %v9580_v33, %v9577_v30 }
 0x22e   : > { %vm2748_vm14 = vcmp.ge.f32.partialorder %v2509_v63, 0.0  ;;  %v2764_v20 = vmul.f32 0.2, %v2509_v63  ;;  %3678 = vmatpush.bf16.msrb.mxu0 %v6558_v10  ;;  %v6609_v10 = vld [vmem:[%s8525_s7 + $0x888] sm:$0xf] }
 0x22f   : > { %3692 = vmatpush.bf16.msrb.mxu1 %v6766_v47  ;;  %v7960_v47 = vld [vmem:[%s8525_s7 + $0x854] sm:$0xf0] }
 0x230   : > { %v2780_v11 = vsel %vm2748_vm14, %v2509_v63, %v2764_v20  ;;  %v2545_v63 = vadd.f32 %v9538_v55, %v2526_v27  ;;  %v8035_v20 = vld [vmem:[%s8525_s7 + $0xaac] sm:$0xf0]  ;;  %v6625_v55 = vld [vmem:[%s8525_s7 + $0x8a8] sm:$0xf] }
 0x231   : > { %v2796_v42 = vmul.f32 1.4142135, %v2780_v11  ;;  %v6874_v60 = vor.u32 %v8035_v20, %v6873_v45  ;;  %v8001_v11 = vld [vmem:[%s8525_s7 + $0x9a4] sm:$0xf] }
 0x232   : > { %3679 = vmatpush.bf16.msrb.mxu0 %v6542_v8  ;;  %v2564_v7 = vadd.f32 %v9541_v12, %v2545_v63  ;;  %v6626_v12 = vor.u32 %v7972_v49, %v6625_v55  ;;  %v6610_v8 = vor.u32 %v7968_v22, %v6609_v10  ;;  %v2550_v63 = vadd.f32 %v9588_v61, %v2531_v26  ;;  %v6809_v61 = vld [vmem:[%s8525_s7 + $0xa20] sm:$0xf]  ;;  %v7956_v49 = vld [vmem:[%s8525_s7 + $0x834] sm:$0xf0]  ;;  %v6545_v22 = vld [vmem:[%s8525_s7 + $0x808] sm:$0xf] }
 0x233   : > { %v9561_v3 = vpack.c.bf16 %v2796_v42, %v2792_v35  ;;  %v2511_v23 = vpop.f32.mrf.mxu3  ;;  %v9597_v59 = vpop.f32.mrf.mxu2  ;;  %v6747_v35 = vld [vmem:[%s8525_s7 + $0x9b0] sm:$0xf0]  ;;  %3636 = vmatpush.bf16.msra.mxu2 %v6874_v60  ;;  %v8019_v60 = vld [vmem:[%s8525_s7 + $0xa2c] sm:$0xf0] }
 0x234   : > { %v2512_v44 = vadd.f32 %v2511_v23, %v2493_v1  ;;  %v9609_v42 = vpop.f32.mrf.mxu0  ;;  %v6750_v43 = vor.u32 %v8001_v11, %v6747_v35  ;;  %v2569_v45 = vadd.f32 %v9597_v59, %v2550_v63  ;;  %v7985_v11 = vld [vmem:[%s8525_s7 + $0x924] sm:$0xf]  ;;  %v6810_v55 = vor.u32 %v8019_v60, %v6809_v61 }
 0x235   : > { %3604 = vmatmul.bf16.vlgmr.msra.gmra.mxu0 %v9561_v3 }
 0x236   : > { %vm2752_vm15 = vcmp.ge.f32.partialorder %v2512_v44, 0.0  ;;  %v2768_v6 = vmul.f32 0.2, %v2512_v44  ;;  %3748 = vmatpush.bf16.msra.mxu0 %v6658_v58  ;;  %3693 = vmatpush.bf16.msrb.mxu1 %v6750_v43  ;;  %v6826_v58 = vor.u32 %v8023_v18, %v6825_v16  ;;  %v6561_v43 = vld [vmem:[%s8525_s7 + $0x828] sm:$0xf] }
 0x237   : > { %v7978_v16 = vld [vmem:[%s8525_s7 + $0x8ec] sm:$0xf] }
 0x238   : > { %v2784_v51 = vsel %vm2752_vm15, %v2512_v44, %v2768_v6  ;;  %v8031_v44 = vld [vmem:[%s8525_s7 + $0xa8c] sm:$0xf0]  ;;  %v2547_v6 = vadd.f32 %v9558_v13, %v2528_v40  ;;  %v6718_v13 = vor.u32 %v7993_v31, %v6715_v9  ;;  %v7952_v40 = vld [vmem:[%s8525_s7 + $0x814] sm:$0xf0]  ;;  %v8041_v31 = vld [vmem:[%s8525_s7 + $0xae4] sm:$0xf] }
 0x239   : > { %v2800_v21 = vmul.f32 1.4142135, %v2784_v51  ;;  %v6858_v29 = vor.u32 %v8031_v44, %v6857_v15  ;;  %v6702_v51 = vor.u32 %v7989_v19, %v6699_v62  ;;  %v6562_v15 = vor.u32 %v7956_v49, %v6561_v43  ;;  %v6793_v44 = vld [vmem:[%s8525_s7 + $0xa00] sm:$0xf]  ;;  %v6907_v9 = vld [vmem:[%s8525_s7 + $0xaf0] sm:$0xf0] }
 0x23a   : > { %3749 = vmatpush.bf16.msra.mxu0 %v6642_v56  ;;  %3694 = vmatpush.bf16.msrb.mxu1 %v6734_v53  ;;  %v2566_v54 = vadd.f32 %v9563_v4, %v2547_v6  ;;  %v6577_v4 = vld [vmem:[%s8525_s7 + $0x848] sm:$0xf]  ;;  %v9646_v56 = vpop.f32.mrf.mxu1  ;;  %v8071_v19 = vld [vmem:[%s8525_s7 + $0xbcc] sm:$0xf0]  ;;  %v8037_v62 = vld [vmem:[%s8525_s7 + $0xac4] sm:$0xf] }
 0x23b   : > { %v2513_v17 = vpop.f32.mrf.mxu3  ;;  %v9625_v32 = vpop.f32.mrf.mxu2  ;;  %3637 = vmatpush.bf16.msra.mxu2 %v6858_v29  ;;  %v2533_v29 = vadd.f32 %v9609_v42, %v9577_v30  ;;  %v6546_v42 = vor.u32 %v7952_v40, %v6545_v22  ;;  %v8033_v43 = vld [vmem:[%s8525_s7 + $0xaa4] sm:$0xf]  ;;  %v6875_v49 = vld [vmem:[%s8525_s7 + $0xab0] sm:$0xf0]  ;;  %v6985_v40 = vld [vmem:[%s8525_s7 + $0xb80] sm:$0xf] }
 0x23c   : > { %v2514_v38 = vadd.f32 %v2513_v17, %v2495_v24  ;;  %v8027_v24 = vld [vmem:[%s8525_s7 + $0xa6c] sm:$0xf0]  ;;  %v9642_v14 = vpop.f32.mrf.mxu0 }
 0x23d   : > { %v6842_v57 = vor.u32 %v8027_v24, %v6841_v39  ;;  %v2552_v30 = vadd.f32 %v9619_v2, %v2533_v29  ;;  %v7033_v39 = vld [vmem:[%s8525_s7 + $0xbe0] sm:$0xf]  ;;  %v8075_v24 = vld [vmem:[%s8525_s7 + $0xbec] sm:$0xf0]  ;;  %v6785_v2 = vld [vmem:[%s8525_s7 + $0x9e8] sm:$0xf] }
 0x23e   : > { %vm2756_vm0 = vcmp.ge.f32.partialorder %v2514_v38, 0.0  ;;  %v2772_v34 = vmul.f32 0.2, %v2514_v38  ;;  %3750 = vmatpush.bf16.msra.mxu0 %v6626_v12  ;;  %3695 = vmatpush.bf16.msrb.mxu1 %v6718_v13  ;;  %v7981_v12 = vld [vmem:[%s8525_s7 + $0x904] sm:$0xf]  ;;  %v6910_v13 = vor.u32 %v8041_v31, %v6907_v9 }
 0x23f   : > { %3638 = vmatpush.bf16.msra.mxu2 %v6842_v57  ;;  %v6670_v53 = vor.u32 %v7981_v12, %v6667_v5  ;;  %v7034_v57 = vor.u32 %v8075_v24, %v7033_v39  ;;  %v6878_v12 = vor.u32 %v8033_v43, %v6875_v49  ;;  %v8004_v29 = vld [vmem:[%s8525_s7 + $0x9b4] sm:$0xf0]  ;;  %v6859_v24 = vld [vmem:[%s8525_s7 + $0xa90] sm:$0xf0]  ;;  %v7958_v43 = vld [vmem:[%s8525_s7 + $0x84c] sm:$0xf] }
 0x240   : > { %v2788_v52 = vsel %vm2756_vm0, %v2514_v38, %v2772_v34  ;;  %v6594_v38 = vor.u32 %v7964_v46, %v6593_v41  ;;  %v6578_v34 = vor.u32 %v7960_v47, %v6577_v4  ;;  %v8012_v46 = vld [vmem:[%s8525_s7 + $0x9f4] sm:$0xf0]  ;;  %v6891_v47 = vld [vmem:[%s8525_s7 + $0xad0] sm:$0xf0] }
 0x241   : > { %v2804_v28 = vmul.f32 1.4142135, %v2788_v52  ;;  %3653 = vmatpush.bf16.msra.mxu3 %v7034_v57  ;;  %v6894_v63 = vor.u32 %v8037_v62, %v6891_v47  ;;  %v8000_v57 = vld [vmem:[%s8525_s7 + $0x994] sm:$0xf0]  ;;  %v7962_v47 = vld [vmem:[%s8525_s7 + $0x86c] sm:$0xf] }
 0x242   : > { %3751 = vmatpush.bf16.msra.mxu0 %v6610_v8  ;;  %3696 = vmatpush.bf16.msrb.mxu1 %v6702_v51  ;;  %v9673_v8 = vperm.slane %v9504_v50, 2  ;;  %v9676_v6 = vpop.f32.mrf.mxu1 }
 0x243   : > { %v2582_v1 = vpop.f32.mrf.mxu3  ;;  %v9611_v23 = vpack.c.bf16 %v2804_v28, %v2800_v21  ;;  %3639 = vmatpush.bf16.msra.mxu2 %v6826_v58  ;;  %v9649_v52 = vpop.f32.mrf.mxu2  ;;  %v7017_v58 = vld [vmem:[%s8525_s7 + $0xbc0] sm:$0xf] }
 0x244   : > { %v2583_v25 = vadd.f32 %v2582_v1, %v2564_v7  ;;  %v6683_v1 = vld [vmem:[%s8525_s7 + $0x930] sm:$0xf0]  ;;  %v9668_v10 = vpop.f32.mrf.mxu0  ;;  %v2602_v4 = vadd.f32 %v9642_v14, %v9673_v8  ;;  %v7018_v51 = vor.u32 %v8071_v19, %v7017_v58  ;;  %v8025_v58 = vld [vmem:[%s8525_s7 + $0xa64] sm:$0xf] }
 0x245   : > { %3609 = vmatmul.bf16.gmra.mxu0 %v9611_v23  ;;  %v6686_v59 = vor.u32 %v7985_v11, %v6683_v1  ;;  %v2604_v31 = vadd.f32 %v9668_v10, %v9673_v8  ;;  %v6969_v10 = vld [vmem:[%s8525_s7 + $0xb60] sm:$0xf]  ;;  %v6843_v19 = vld [vmem:[%s8525_s7 + $0xa70] sm:$0xf0] }
 0x246   : > { %vm2745_vm1 = vcmp.ge.f32.partialorder %v2583_v25, 0.0  ;;  %v2761_v37 = vmul.f32 0.2, %v2583_v25  ;;  %3752 = vmatpush.bf16.msra.mxu0 %v6594_v38  ;;  %v2621_v14 = vadd.f32 %v9646_v56, %v2602_v4  ;;  %3654 = vmatpush.bf16.msra.mxu3 %v7018_v51  ;;  %v7996_v51 = vld [vmem:[%s8525_s7 + $0x974] sm:$0xf0] }
 0x247   : > { %3640 = vmatpush.bf16.msra.mxu2 %v6810_v55  ;;  %3697 = vmatpush.bf16.msrb.mxu1 %v6686_v59  ;;  %v8067_v55 = vld [vmem:[%s8525_s7 + $0xbac] sm:$0xf0]  ;;  %v6753_v59 = vld [vmem:[%s8525_s7 + $0x9a8] sm:$0xf] }
 0x248   : > { %v2777_v48 = vsel %vm2745_vm1, %v2583_v25, %v2761_v37  ;;  %v8015_v25 = vld [vmem:[%s8525_s7 + $0xa0c] sm:$0xf0]  ;;  %v2640_v1 = vadd.f32 %v9649_v52, %v2621_v14  ;;  %v7970_v52 = vld [vmem:[%s8525_s7 + $0x8ac] sm:$0xf] }
 0x249   : > { %v2793_v21 = vmul.f32 1.4142135, %v2777_v48  ;;  %v6794_v0 = vor.u32 %v8015_v25, %v6793_v44  ;;  %v6769_v48 = vld [vmem:[%s8525_s7 + $0x9c8] sm:$0xf] }
 0x24a   : > { %3753 = vmatpush.bf16.msra.mxu0 %v6578_v34 }
 0x24b   : > { %v2584_v17 = vpop.f32.mrf.mxu3  ;;  %3641 = vmatpush.bf16.msra.mxu2 %v6794_v0  ;;  %v9684_v41 = vpop.f32.mrf.mxu2  ;;  %3698 = vmatpush.bf16.msrb.mxu1 %v6670_v53  ;;  %v6627_v0 = vld [vmem:[%s8525_s7 + $0x8b8] sm:$0xf0]  ;;  %v6754_v53 = vor.u32 %v8004_v29, %v6753_v59 }
 0x24c   : > { %v2585_v36 = vadd.f32 %v2584_v17, %v2566_v54  ;;  %v2571_v54 = vadd.f32 %v9625_v32, %v2552_v30  ;;  %v6659_v32 = vld [vmem:[%s8525_s7 + $0x8f8] sm:$0xf0]  ;;  %v9701_v60 = vpop.f32.mrf.mxu0  ;;  %v6630_v22 = vor.u32 %v7970_v52, %v6627_v0  ;;  %v8063_v30 = vld [vmem:[%s8525_s7 + $0xb8c] sm:$0xf0] }
 0x24d   : > { %v6662_v38 = vor.u32 %v7978_v16, %v6659_v32  ;;  %v6986_v39 = vor.u32 %v8063_v30, %v6985_v40  ;;  %v8017_v40 = vld [vmem:[%s8525_s7 + $0xa24] sm:$0xf] }
 0x24e   : > { %vm2749_vm2 = vcmp.ge.f32.partialorder %v2585_v36, 0.0  ;;  %v2765_v27 = vmul.f32 0.2, %v2585_v36  ;;  %3754 = vmatpush.bf16.msra.mxu0 %v6562_v15  ;;  %v9709_v15 = vpop.f32.mrf.mxu1 }
 0x24f   : > { %3710 = vmatpush.bf16.msrb.mxu2 %v6910_v13  ;;  %v6611_v13 = vld [vmem:[%s8525_s7 + $0x898] sm:$0xf0] }
 0x250   : > { %v2781_v33 = vsel %vm2749_vm2, %v2585_v36, %v2765_v27  ;;  %v6786_v36 = vor.u32 %v8012_v46, %v6785_v2  ;;  %v8008_v27 = vld [vmem:[%s8525_s7 + $0x9d4] sm:$0xf0]  ;;  %v2623_v46 = vadd.f32 %v9676_v6, %v2604_v31  ;;  %v6721_v6 = vld [vmem:[%s8525_s7 + $0x968] sm:$0xf] }
 0x251   : > { %v2797_v28 = vmul.f32 1.4142135, %v2781_v33  ;;  %v6770_v33 = vor.u32 %v8008_v27, %v6769_v48  ;;  %v6595_v48 = vld [vmem:[%s8525_s7 + $0x878] sm:$0xf0]  ;;  %v6722_v27 = vor.u32 %v7996_v51, %v6721_v6  ;;  %v7950_v6 = vld [vmem:[%s8525_s7 + $0x80c] sm:$0xf] }
 0x252   : > { %3755 = vmatpush.bf16.msra.mxu0 %v6546_v42  ;;  %v8029_v42 = vld [vmem:[%s8525_s7 + $0xa84] sm:$0xf] }
 0x253   : > { %v9652_v20 = vpack.c.bf16 %v2797_v28, %v2793_v21  ;;  %v2587_v7 = vpop.f32.mrf.mxu3  ;;  %v7974_v21 = vld [vmem:[%s8525_s7 + $0x8cc] sm:$0xf]  ;;  %v6643_v28 = vld [vmem:[%s8525_s7 + $0x8d8] sm:$0xf0]  ;;  %3711 = vmatpush.bf16.msrb.mxu2 %v6894_v63  ;;  %v6862_v9 = vor.u32 %v8029_v42, %v6859_v24  ;;  %v6953_v63 = vld [vmem:[%s8525_s7 + $0xb40] sm:$0xf] }
 0x254   : > { %v2588_v35 = vadd.f32 %v2587_v7, %v2569_v45  ;;  %v6646_v61 = vor.u32 %v7974_v21, %v6643_v28  ;;  %v2608_v62 = vpop.f32.mrf.mxu0  ;;  %v8021_v21 = vld [vmem:[%s8525_s7 + $0xa44] sm:$0xf]  ;;  %v2607_v28 = vadd.f32 %v9701_v60, %v9673_v8  ;;  %v6579_v60 = vld [vmem:[%s8525_s7 + $0x858] sm:$0xf0]  ;;  %v6689_v24 = vld [vmem:[%s8525_s7 + $0x928] sm:$0xf] }
 0x255   : > { %3623 = vmatmul.bf16.vlgmr.msra.gmra.mxu1 %v9652_v20  ;;  %3680 = vmatmul.bf16.vlgmr.msrb.gmra.mxu0 %v9561_v3 }
 0x256   : > { %vm2753_vm3 = vcmp.ge.f32.partialorder %v2588_v35, 0.0  ;;  %v2769_v37 = vmul.f32 0.2, %v2588_v35  ;;  %3767 = vmatpush.bf16.msra.mxu1 %v6786_v36  ;;  %3824 = vmatpush.bf16.msrb.mxu0 %v6662_v38  ;;  %v2642_v36 = vadd.f32 %v9684_v41, %v2623_v46  ;;  %v2627_v14 = vpop.f32.mrf.mxu1  ;;  %v2626_v59 = vadd.f32 %v9709_v15, %v2607_v28  ;;  %v6937_v15 = vld [vmem:[%s8525_s7 + $0xb20] sm:$0xf] }
 0x257   : > { %3712 = vmatpush.bf16.msrb.mxu2 %v6878_v12  ;;  %v6582_v12 = vor.u32 %v7958_v43, %v6579_v60  ;;  %v9768_v46 = vperm.slane %v9504_v50, 3 }
 0x258   : > { %v2785_v26 = vsel %vm2753_vm3, %v2588_v35, %v2769_v37  ;;  %v7001_v35 = vld [vmem:[%s8525_s7 + $0xba0] sm:$0xf]  ;;  %v9719_v37 = vpop.f32.mrf.mxu2 }
 0x259   : > { %v2801_v45 = vmul.f32 1.4142135, %v2785_v26  ;;  %v7002_v56 = vor.u32 %v8067_v55, %v7001_v35  ;;  %v6846_v26 = vor.u32 %v8025_v58, %v6843_v19  ;;  %v7992_v35 = vld [vmem:[%s8525_s7 + $0x954] sm:$0xf0]  ;;  %v2645_v0 = vadd.f32 %v9719_v37, %v2626_v59  ;;  %v6771_v59 = vld [vmem:[%s8525_s7 + $0x9d8] sm:$0xf0] }
 0x25a   : > { %3768 = vmatpush.bf16.msra.mxu1 %v6770_v33  ;;  %3825 = vmatpush.bf16.msrb.mxu0 %v6646_v61  ;;  %v8055_v33 = vld [vmem:[%s8525_s7 + $0xb4c] sm:$0xf0]  ;;  %v6827_v61 = vld [vmem:[%s8525_s7 + $0xa50] sm:$0xf0]  ;;  %v7984_v19 = vld [vmem:[%s8525_s7 + $0x914] sm:$0xf0] }
 0x25b   : > { %v2589_v17 = vpop.f32.mrf.mxu3  ;;  %3655 = vmatpush.bf16.msra.mxu3 %v7002_v56  ;;  %3713 = vmatpush.bf16.msrb.mxu2 %v6862_v9  ;;  %v7954_v9 = vld [vmem:[%s8525_s7 + $0x82c] sm:$0xf] }
 0x25c   : > { %v2590_v18 = vadd.f32 %v2589_v17, %v2571_v54  ;;  %v6737_v54 = vld [vmem:[%s8525_s7 + $0x988] sm:$0xf]  ;;  %v7966_v17 = vld [vmem:[%s8525_s7 + $0x88c] sm:$0xf] }
 0x25d   : > { %v6738_v2 = vor.u32 %v8000_v57, %v6737_v54  ;;  %v6614_v16 = vor.u32 %v7966_v17, %v6611_v13  ;;  %v7988_v54 = vld [vmem:[%s8525_s7 + $0x934] sm:$0xf0]  ;;  %v2677_v57 = vpop.f32.mrf.mxu0  ;;  %v6921_v17 = vld [vmem:[%s8525_s7 + $0xb00] sm:$0xf]  ;;  %v2609_v13 = vadd.f32 %v2608_v62, %v9673_v8  ;;  %v6795_v8 = vld [vmem:[%s8525_s7 + $0xa10] sm:$0xf0] }
 0x25e   : > { %vm2757_vm4 = vcmp.ge.f32.partialorder %v2590_v18, 0.0  ;;  %v2773_v34 = vmul.f32 0.2, %v2590_v18  ;;  %3769 = vmatpush.bf16.msra.mxu1 %v6754_v53  ;;  %3826 = vmatpush.bf16.msrb.mxu0 %v6630_v22  ;;  %v8051_v22 = vld [vmem:[%s8525_s7 + $0xb2c] sm:$0xf0]  ;;  %v6690_v31 = vor.u32 %v7988_v54, %v6689_v24 }
 0x25f   : > { %3656 = vmatpush.bf16.msra.mxu3 %v6986_v39  ;;  %3714 = vmatpush.bf16.msrb.mxu2 %v6846_v26  ;;  %v6938_v42 = vor.u32 %v8051_v22, %v6937_v15  ;;  %v6811_v39 = vld [vmem:[%s8525_s7 + $0xa30] sm:$0xf0]  ;;  %v2628_v50 = vadd.f32 %v2627_v14, %v2609_v13  ;;  %v6547_v62 = vld [vmem:[%s8525_s7 + $0x818] sm:$0xf0]  ;;  %v6881_v54 = vld [vmem:[%s8525_s7 + $0xaa8] sm:$0xf] }
 0x260   : > { %v2789_v7 = vsel %vm2757_vm4, %v2590_v18, %v2773_v34  ;;  %v8059_v18 = vld [vmem:[%s8525_s7 + $0xb6c] sm:$0xf0]  ;;  %v6598_v34 = vor.u32 %v7962_v47, %v6595_v48  ;;  %v2646_v49 = vpop.f32.mrf.mxu2  ;;  %v6814_v37 = vor.u32 %v8017_v40, %v6811_v39  ;;  %v6550_v47 = vor.u32 %v7950_v6, %v6547_v62  ;;  %v8073_v48 = vld [vmem:[%s8525_s7 + $0xbe4] sm:$0xf]  ;;  %v6755_v13 = vld [vmem:[%s8525_s7 + $0x9b8] sm:$0xf0] }
 0x261   : > { %v2805_v11 = vmul.f32 1.4142135, %v2789_v7  ;;  %v6970_v38 = vor.u32 %v8059_v18, %v6969_v10  ;;  %v6954_v7 = vor.u32 %v8055_v33, %v6953_v63  ;;  %v2696_v10 = vpop.f32.mrf.mxu1  ;;  %v6913_v63 = vld [vmem:[%s8525_s7 + $0xae8] sm:$0xf]  ;;  %v8044_v33 = vld [vmem:[%s8525_s7 + $0xaf4] sm:$0xf0] }
 0x262   : > { %3770 = vmatpush.bf16.msra.mxu1 %v6738_v2  ;;  %3827 = vmatpush.bf16.msrb.mxu0 %v6614_v16  ;;  %v6563_v2 = vld [vmem:[%s8525_s7 + $0x838] sm:$0xf0]  ;;  %v6914_v14 = vor.u32 %v8044_v33, %v6913_v63  ;;  %v6971_v6 = vld [vmem:[%s8525_s7 + $0xb70] sm:$0xf0] }
 0x263   : > { %v2658_v44 = vpop.f32.mrf.mxu3  ;;  %v9711_v25 = vpack.c.bf16 %v2805_v11, %v2801_v45  ;;  %3657 = vmatpush.bf16.msra.mxu3 %v6970_v38  ;;  %v6705_v11 = vld [vmem:[%s8525_s7 + $0x948] sm:$0xf]  ;;  %v6566_v16 = vor.u32 %v7954_v9, %v6563_v2  ;;  %v6723_v63 = vld [vmem:[%s8525_s7 + $0x978] sm:$0xf0] }
 0x264   : > { %v2659_v5 = vadd.f32 %v2658_v44, %v2640_v1  ;;  %v6830_v1 = vor.u32 %v8021_v21, %v6827_v61  ;;  %v6706_v56 = vor.u32 %v7992_v35, %v6705_v11  ;;  %v6673_v38 = vld [vmem:[%s8525_s7 + $0x908] sm:$0xf]  ;;  %v8010_v21 = vld [vmem:[%s8525_s7 + $0x9ec] sm:$0xf]  ;;  %v7019_v61 = vld [vmem:[%s8525_s7 + $0xbd0] sm:$0xf0] }
 0x265   : > { %3628 = vmatmul.bf16.gmra.mxu1 %v9711_v25  ;;  %3685 = vmatmul.bf16.gmra.mxu0 %v9611_v23  ;;  %v6674_v51 = vor.u32 %v7984_v19, %v6673_v38  ;;  %v8032_v38 = vld [vmem:[%s8525_s7 + $0xa94] sm:$0xf0]  ;;  %v8057_v19 = vld [vmem:[%s8525_s7 + $0xb64] sm:$0xf] }
 0x266   : > { %vm2746_vm5 = vcmp.ge.f32.partialorder %v2659_v5, 0.0  ;;  %v2762_v32 = vmul.f32 0.2, %v2659_v5  ;;  %3771 = vmatpush.bf16.msra.mxu1 %v6722_v27  ;;  %3828 = vmatpush.bf16.msrb.mxu0 %v6598_v34  ;;  %v2647_v27 = vadd.f32 %v2646_v49, %v2628_v50  ;;  %v7998_v50 = vld [vmem:[%s8525_s7 + $0x98c] sm:$0xf] }
 0x267   : > { %3658 = vmatpush.bf16.msra.mxu3 %v6954_v7  ;;  %3715 = vmatpush.bf16.msrb.mxu2 %v6830_v1  ;;  %v8069_v7 = vld [vmem:[%s8525_s7 + $0xbc4] sm:$0xf]  ;;  %v8040_v1 = vld [vmem:[%s8525_s7 + $0xad4] sm:$0xf0] }
 0x268   : > { %v2778_v45 = vsel %vm2746_vm5, %v2659_v5, %v2762_v32  ;;  %v8047_v32 = vld [vmem:[%s8525_s7 + $0xb0c] sm:$0xf0]  ;;  %v7022_v49 = vor.u32 %v8069_v7, %v7019_v61 }
 0x269   : > { %v2794_v29 = vmul.f32 1.4142135, %v2778_v45  ;;  %v6922_v18 = vor.u32 %v8047_v32, %v6921_v17  ;;  %v6787_v45 = vld [vmem:[%s8525_s7 + $0x9f8] sm:$0xf0]  ;;  %v2698_v22 = vpop.f32.mrf.mxu1  ;;  %v6987_v32 = vld [vmem:[%s8525_s7 + $0xb90] sm:$0xf0] }
 0x26a   : > { %3772 = vmatpush.bf16.msra.mxu1 %v6706_v56  ;;  %3829 = vmatpush.bf16.msrb.mxu0 %v6582_v12  ;;  %v6790_v35 = vor.u32 %v8010_v21, %v6787_v45  ;;  %v8006_v56 = vld [vmem:[%s8525_s7 + $0x9cc] sm:$0xf]  ;;  %v8053_v21 = vld [vmem:[%s8525_s7 + $0xb44] sm:$0xf] }
 0x26b   : > { %v2660_v4 = vpop.f32.mrf.mxu3  ;;  %3659 = vmatpush.bf16.msra.mxu3 %v6938_v42  ;;  %3716 = vmatpush.bf16.msrb.mxu2 %v6814_v37  ;;  %v7003_v42 = vld [vmem:[%s8525_s7 + $0xbb0] sm:$0xf0]  ;;  %v8002_v37 = vld [vmem:[%s8525_s7 + $0x9ac] sm:$0xf] }
 0x26c   : > { %v2661_v41 = vadd.f32 %v2660_v4, %v2642_v36  ;;  %v8013_v36 = vld [vmem:[%s8525_s7 + $0xa04] sm:$0xf]  ;;  %v2715_v4 = vpop.f32.mrf.mxu2 }
 0x26d   : > { %v6798_v58 = vor.u32 %v8013_v36, %v6795_v8  ;;  %v6865_v8 = vld [vmem:[%s8525_s7 + $0xa88] sm:$0xf] }
 0x26e   : > { %vm2750_vm6 = vcmp.ge.f32.partialorder %v2661_v41, 0.0  ;;  %v2766_v55 = vmul.f32 0.2, %v2661_v41  ;;  %3773 = vmatpush.bf16.msra.mxu1 %v6690_v31  ;;  %3830 = vmatpush.bf16.msrb.mxu0 %v6566_v16  ;;  %v8061_v16 = vld [vmem:[%s8525_s7 + $0xb84] sm:$0xf] }
 0x26f   : > { %3660 = vmatpush.bf16.msra.mxu3 %v6922_v18  ;;  %3717 = vmatpush.bf16.msrb.mxu2 %v6798_v58  ;;  %v6758_v18 = vor.u32 %v8002_v37, %v6755_v13  ;;  %v6990_v36 = vor.u32 %v8061_v16, %v6987_v32  ;;  %v6739_v58 = vld [vmem:[%s8525_s7 + $0x998] sm:$0xf0]  ;;  %v6923_v37 = vld [vmem:[%s8525_s7 + $0xb10] sm:$0xf0] }
 0x270   : > { %v2782_v44 = vsel %vm2750_vm6, %v2661_v41, %v2766_v55  ;;  %v7035_v41 = vld [vmem:[%s8525_s7 + $0xbf0] sm:$0xf0]  ;;  %v6897_v55 = vld [vmem:[%s8525_s7 + $0xac8] sm:$0xf] }
 0x271   : > { %v2798_v52 = vmul.f32 1.4142135, %v2782_v44  ;;  %v7038_v34 = vor.u32 %v8073_v48, %v7035_v41  ;;  %v6898_v60 = vor.u32 %v8040_v1, %v6897_v55  ;;  %v2678_v44 = vadd.f32 %v2677_v57, %v9768_v46  ;;  %v8036_v57 = vld [vmem:[%s8525_s7 + $0xab4] sm:$0xf0]  ;;  %v2701_v7 = vpop.f32.mrf.mxu1 }
 0x272   : > { %3774 = vmatpush.bf16.msra.mxu1 %v6674_v51  ;;  %3831 = vmatpush.bf16.msrb.mxu0 %v6550_v47  ;;  %v6882_v17 = vor.u32 %v8036_v57, %v6881_v54  ;;  %v6849_v51 = vld [vmem:[%s8525_s7 + $0xa68] sm:$0xf]  ;;  %v8028_v47 = vld [vmem:[%s8525_s7 + $0xa74] sm:$0xf0]  ;;  %v8045_v57 = vld [vmem:[%s8525_s7 + $0xb04] sm:$0xf] }
 0x273   : > { %v9753_v5 = vpack.c.bf16 %v2798_v52, %v2794_v29  ;;  %v2663_v53 = vpop.f32.mrf.mxu3  ;;  %3729 = vmatpush.bf16.msrb.mxu3 %v7038_v34  ;;  %v6774_v29 = vor.u32 %v8006_v56, %v6771_v59  ;;  %v2679_v52 = vpop.f32.mrf.mxu0  ;;  %v7994_v34 = vld [vmem:[%s8525_s7 + $0x96c] sm:$0xf]  ;;  %v6850_v45 = vor.u32 %v8028_v47, %v6849_v51  ;;  %v8024_v55 = vld [vmem:[%s8525_s7 + $0xa54] sm:$0xf0] }
 0x274   : > { %v2664_v30 = vadd.f32 %v2663_v53, %v2645_v0  ;;  %v2697_v0 = vadd.f32 %v2696_v10, %v2678_v44  ;;  %v2717_v31 = vpop.f32.mrf.mxu2  ;;  %v2680_v62 = vadd.f32 %v2679_v52, %v9768_v46  ;;  %v8049_v44 = vld [vmem:[%s8525_s7 + $0xb24] sm:$0xf]  ;;  %v8042_v51 = vld [vmem:[%s8525_s7 + $0xaec] sm:$0xf] }
 0x275   : > { %3642 = vmatmul.bf16.vlgmr.msra.gmra.mxu2 %v9753_v5  ;;  %3699 = vmatmul.bf16.vlgmr.msrb.gmra.mxu1 %v9652_v20 }
 0x276   : > { %vm2754_vm7 = vcmp.ge.f32.partialorder %v2664_v30, 0.0  ;;  %3756 = vmatmul.bf16.vlgmr.msra.gmra.mxu0 %v9561_v3  ;;  %v2770_v26 = vmul.f32 0.2, %v2664_v30  ;;  %3786 = vmatpush.bf16.msra.mxu2 %v6914_v14  ;;  %v2716_v39 = vadd.f32 %v2715_v4, %v2697_v0  ;;  %v6866_v4 = vor.u32 %v8032_v38, %v6865_v8  ;;  %v8016_v8 = vld [vmem:[%s8525_s7 + $0xa14] sm:$0xf0] }
 0x277   : > { %3843 = vmatpush.bf16.msrb.mxu1 %v6790_v35  ;;  %3730 = vmatpush.bf16.msrb.mxu3 %v7022_v49  ;;  %v2699_v48 = vadd.f32 %v2698_v22, %v2680_v62  ;;  %v6833_v35 = vld [vmem:[%s8525_s7 + $0xa48] sm:$0xf]  ;;  %v7990_v49 = vld [vmem:[%s8525_s7 + $0x94c] sm:$0xf] }
 0x278   : > { %v2786_v43 = vsel %vm2754_vm7, %v2664_v30, %v2770_v26  ;;  %v8065_v30 = vld [vmem:[%s8525_s7 + $0xba4] sm:$0xf]  ;;  %v6742_v26 = vor.u32 %v7998_v50, %v6739_v58  ;;  %v6834_v52 = vor.u32 %v8024_v55, %v6833_v35  ;;  %v7982_v38 = vld [vmem:[%s8525_s7 + $0x90c] sm:$0xf]  ;;  %v6675_v50 = vld [vmem:[%s8525_s7 + $0x918] sm:$0xf0] }
 0x279   : > { %v2802_v53 = vmul.f32 1.4142135, %v2786_v43  ;;  %v7006_v24 = vor.u32 %v8065_v30, %v7003_v42  ;;  %v2718_v14 = vadd.f32 %v2717_v31, %v2699_v48  ;;  %v8020_v42 = vld [vmem:[%s8525_s7 + $0xa34] sm:$0xf0]  ;;  %v2703_v58 = vpop.f32.mrf.mxu1 }
 0x27a   : > { %3787 = vmatpush.bf16.msra.mxu2 %v6898_v60  ;;  %v6707_v60 = vld [vmem:[%s8525_s7 + $0x958] sm:$0xf0]  ;;  %v8068_v55 = vld [vmem:[%s8525_s7 + $0xbb4] sm:$0xf0] }
 0x27b   : > { %v2665_v28 = vpop.f32.mrf.mxu3  ;;  %3844 = vmatpush.bf16.msrb.mxu1 %v6774_v29  ;;  %3731 = vmatpush.bf16.msrb.mxu3 %v7006_v24  ;;  %v2682_v33 = vpop.f32.mrf.mxu0  ;;  %v6691_v24 = vld [vmem:[%s8525_s7 + $0x938] sm:$0xf0] }
 0x27c   : > { %v2666_v11 = vadd.f32 %v2665_v28, %v2647_v27  ;;  %v6974_v27 = vor.u32 %v8057_v19, %v6971_v6  ;;  %v6955_v28 = vld [vmem:[%s8525_s7 + $0xb50] sm:$0xf0]  ;;  %v2720_v59 = vpop.f32.mrf.mxu2  ;;  %v2683_v22 = vadd.f32 %v2682_v33, %v9768_v46  ;;  %v7041_v19 = vld [vmem:[%s8525_s7 + $0xbe8] sm:$0xf]  ;;  %v8076_v6 = vld [vmem:[%s8525_s7 + $0xbf4] sm:$0xf0] }
 0x27d   : > { %v6958_v43 = vor.u32 %v8053_v21, %v6955_v28 }
 0x27e   : > { %vm2758_vm8 = vcmp.ge.f32.partialorder %v2666_v11, 0.0  ;;  %v2774_v12 = vmul.f32 0.2, %v2666_v11  ;;  %3788 = vmatpush.bf16.msra.mxu2 %v6882_v17  ;;  %v2702_v31 = vadd.f32 %v2701_v7, %v2683_v22  ;;  %v6899_v7 = vld [vmem:[%s8525_s7 + $0xad8] sm:$0xf0] }
 0x27f   : > { %3845 = vmatpush.bf16.msrb.mxu1 %v6758_v18  ;;  %3732 = vmatpush.bf16.msrb.mxu3 %v6990_v36  ;;  %v6926_v36 = vor.u32 %v8045_v57, %v6923_v37  ;;  %v8030_v22 = vld [vmem:[%s8525_s7 + $0xa8c] sm:$0xf] }
 0x280   : > { %v2790_v15 = vsel %vm2758_vm8, %v2666_v11, %v2774_v12  ;;  %v6726_v11 = vor.u32 %v7994_v34, %v6723_v63  ;;  %v6939_v12 = vld [vmem:[%s8525_s7 + $0xb30] sm:$0xf0]  ;;  %v2721_v18 = vadd.f32 %v2720_v59, %v2702_v31  ;;  %v7025_v34 = vld [vmem:[%s8525_s7 + $0xbc8] sm:$0xf]  ;;  %v8072_v63 = vld [vmem:[%s8525_s7 + $0xbd4] sm:$0xf0] }
 0x281   : > { %v2806_v40 = vmul.f32 1.4142135, %v2790_v15  ;;  %v6817_v15 = vld [vmem:[%s8525_s7 + $0xa28] sm:$0xf]  ;;  %v6942_v30 = vor.u32 %v8049_v44, %v6939_v12  ;;  %v7026_v21 = vor.u32 %v8072_v63, %v7025_v34  ;;  %v8066_v63 = vld [vmem:[%s8525_s7 + $0xbac] sm:$0xf] }
 0x282   : > { %3789 = vmatpush.bf16.msra.mxu2 %v6866_v4  ;;  %v6818_v16 = vor.u32 %v8020_v42, %v6817_v15  ;;  %v6993_v12 = vld [vmem:[%s8525_s7 + $0xb88] sm:$0xf] }
 0x283   : > { %v2734_v9 = vpop.f32.mrf.mxu3  ;;  %v9797_v2 = vpack.c.bf16 %v2806_v40, %v2802_v53  ;;  %3846 = vmatpush.bf16.msrb.mxu1 %v6742_v26  ;;  %3733 = vmatpush.bf16.msrb.mxu3 %v6974_v27  ;;  %v6710_v53 = vor.u32 %v7990_v49, %v6707_v60  ;;  %v7042_v26 = vor.u32 %v8076_v6, %v7041_v19  ;;  %v6915_v27 = vld [vmem:[%s8525_s7 + $0xaf8] sm:$0xf0]  ;;  %v6977_v42 = vld [vmem:[%s8525_s7 + $0xb68] sm:$0xf]  ;;  %v8048_v19 = vld [vmem:[%s8525_s7 + $0xb14] sm:$0xf0] }
 0x284   : > { %v2735_v10 = vadd.f32 %v2734_v9, %v2716_v39  ;;  %v7986_v39 = vld [vmem:[%s8525_s7 + $0x92c] sm:$0xf]  ;;  %v2684_v9 = vpop.f32.mrf.mxu0  ;;  %v2722_v47 = vpop.f32.mrf.mxu2  ;;  %v6961_v31 = vld [vmem:[%s8525_s7 + $0xb48] sm:$0xf] }
 0x285   : > { %3647 = vmatmul.bf16.gmra.mxu2 %v9797_v2  ;;  %3704 = vmatmul.bf16.gmra.mxu1 %v9711_v25  ;;  %v6694_v32 = vor.u32 %v7986_v39, %v6691_v24  ;;  %v2685_v62 = vadd.f32 %v2684_v9, %v9768_v46  ;;  %v6918_v46 = vor.u32 %v8042_v51, %v6915_v27  ;;  %v8060_v39 = vld [vmem:[%s8525_s7 + $0xb74] sm:$0xf0]  ;;  %v8026_v24 = vld [vmem:[%s8525_s7 + $0xa6c] sm:$0xf]  ;;  %v7027_v27 = vld [vmem:[%s8525_s7 + $0xbd8] sm:$0xf0] }
 0x286   : > { %3761 = vmatmul.bf16.gmra.mxu0 %v9611_v23  ;;  %v2763_v41 = vmul.f32 0.2, %v2735_v10  ;;  %vm2747_vm9 = vcmp.ge.f32.partialorder %v2735_v10, 0.0  ;;  %3790 = vmatpush.bf16.msra.mxu2 %v6850_v45  ;;  %v8038_v45 = vld [vmem:[%s8525_s7 + $0xacc] sm:$0xf]  ;;  %v6978_v57 = vor.u32 %v8060_v39, %v6977_v42 }
 0x287   : > { %3847 = vmatpush.bf16.msrb.mxu1 %v6726_v11  ;;  %3734 = vmatpush.bf16.msrb.mxu3 %v6958_v43  ;;  %v2704_v33 = vadd.f32 %v2703_v58, %v2685_v62  ;;  %v6902_v35 = vor.u32 %v8038_v45, %v6899_v7  ;;  %v6883_v43 = vld [vmem:[%s8525_s7 + $0xab8] sm:$0xf0]  ;;  %v8056_v9 = vld [vmem:[%s8525_s7 + $0xb54] sm:$0xf0]  ;;  %v6929_v58 = vld [vmem:[%s8525_s7 + $0xb08] sm:$0xf] }
 0x288   : > { %v2779_v1 = vsel %vm2747_vm9, %v2735_v10, %v2763_v41  ;;  %v6801_v10 = vld [vmem:[%s8525_s7 + $0xa08] sm:$0xf]  ;;  %v6678_v41 = vor.u32 %v7982_v38, %v6675_v50  ;;  %v6930_v6 = vor.u32 %v8048_v19, %v6929_v58  ;;  %v8014_v62 = vld [vmem:[%s8525_s7 + $0xa0c] sm:$0xf]  ;;  %v7418_v19 = vld [vmem:[%s8525_s7 + $0xde0] sm:$0xf] }
 0x289   : > { %v2795_v0 = vmul.f32 1.4142135, %v2779_v1  ;;  %v6802_v48 = vor.u32 %v8016_v8, %v6801_v10  ;;  %v6945_v10 = vld [vmem:[%s8525_s7 + $0xb28] sm:$0xf]  ;;  %v6819_v8 = vld [vmem:[%s8525_s7 + $0xa38] sm:$0xf0] }
 0x28a   : > { %3791 = vmatpush.bf16.msra.mxu2 %v6834_v52  ;;  %v8074_v51 = vld [vmem:[%s8525_s7 + $0xbec] sm:$0xf] }
 0x28b   : > { %v2736_v61 = vpop.f32.mrf.mxu3  ;;  %3848 = vmatpush.bf16.msrb.mxu1 %v6710_v53  ;;  %3735 = vmatpush.bf16.msrb.mxu3 %v6942_v30  ;;  %v8054_v45 = vld [vmem:[%s8525_s7 + $0xb4c] sm:$0xf] }
 0x28c   : > { %v2737_v56 = vadd.f32 %v2736_v61, %v2718_v14  ;;  %v7009_v61 = vld [vmem:[%s8525_s7 + $0xba8] sm:$0xf] }
 0x28d   : > { %v7010_v1 = vor.u32 %v8068_v55, %v7009_v61  ;;  %v6963_v61 = vld [vmem:[%s8525_s7 + $0xb58] sm:$0xf0] }
 0x28e   : > { %vm2751_vm10 = vcmp.ge.f32.partialorder %v2737_v56, 0.0  ;;  %v2767_v29 = vmul.f32 0.2, %v2737_v56  ;;  %3792 = vmatpush.bf16.msra.mxu2 %v6818_v16  ;;  %v8022_v16 = vld [vmem:[%s8525_s7 + $0xa4c] sm:$0xf] }
 0x28f   : > { %3849 = vmatpush.bf16.msrb.mxu1 %v6694_v32  ;;  %3736 = vmatpush.bf16.msrb.mxu3 %v6926_v36  ;;  %v6835_v32 = vld [vmem:[%s8525_s7 + $0xa58] sm:$0xf0]  ;;  %v8018_v36 = vld [vmem:[%s8525_s7 + $0xa2c] sm:$0xf] }
 0x290   : > { %v2783_v40 = vsel %vm2751_vm10, %v2737_v56, %v2767_v29  ;;  %v8034_v56 = vld [vmem:[%s8525_s7 + $0xaac] sm:$0xf]  ;;  %v8064_v29 = vld [vmem:[%s8525_s7 + $0xb94] sm:$0xf0]  ;;  %v6822_v50 = vor.u32 %v8018_v36, %v6819_v8  ;;  %v6947_v55 = vld [vmem:[%s8525_s7 + $0xb38] sm:$0xf0] }
 0x291   : > { %v2799_v54 = vmul.f32 1.4142135, %v2783_v40  ;;  %v6886_v44 = vor.u32 %v8034_v56, %v6883_v43  ;;  %v6994_v15 = vor.u32 %v8064_v29, %v6993_v12  ;;  %v6867_v40 = vld [vmem:[%s8525_s7 + $0xa98] sm:$0xf0]  ;;  %v8046_v56 = vld [vmem:[%s8525_s7 + $0xb0c] sm:$0xf] }
 0x292   : > { %3793 = vmatpush.bf16.msra.mxu2 %v6802_v48  ;;  %v6870_v30 = vor.u32 %v8030_v22, %v6867_v40  ;;  %v8070_v48 = vld [vmem:[%s8525_s7 + $0xbcc] sm:$0xf]  ;;  %v6931_v43 = vld [vmem:[%s8525_s7 + $0xb18] sm:$0xf0]  ;;  %v8103_v12 = vld [vmem:[%s8525_s7 + $0xccc] sm:$0xf0] }
 0x293   : > { %v9831_v17 = vpack.c.bf16 %v2799_v54, %v2795_v0  ;;  %v2739_v13 = vpop.f32.mrf.mxu3  ;;  %3850 = vmatpush.bf16.msrb.mxu1 %v6678_v41  ;;  %v6851_v54 = vld [vmem:[%s8525_s7 + $0xa78] sm:$0xf0]  ;;  %v7030_v34 = vor.u32 %v8070_v48, %v7027_v27  ;;  %v7242_v22 = vld [vmem:[%s8525_s7 + $0xc80] sm:$0xf]  ;;  %v8095_v40 = vld [vmem:[%s8525_s7 + $0xc8c] sm:$0xf0] }
 0x294   : > { %v2740_v4 = vadd.f32 %v2739_v13, %v2721_v18  ;;  %v6854_v37 = vor.u32 %v8026_v24, %v6851_v54  ;;  %v6962_v13 = vor.u32 %v8056_v9, %v6961_v31  ;;  %v8052_v18 = vld [vmem:[%s8525_s7 + $0xb34] sm:$0xf0]  ;;  %v7226_v54 = vld [vmem:[%s8525_s7 + $0xc60] sm:$0xf]  ;;  %v8087_v31 = vld [vmem:[%s8525_s7 + $0xc4c] sm:$0xf0] }
 0x295   : > { %3661 = vmatmul.bf16.vlgmr.msra.gmra.mxu3 %v9831_v17  ;;  %3718 = vmatmul.bf16.vlgmr.msrb.gmra.mxu2 %v9753_v5  ;;  %v6946_v38 = vor.u32 %v8052_v18, %v6945_v10  ;;  %v8083_v10 = vld [vmem:[%s8525_s7 + $0xc2c] sm:$0xf0]  ;;  %v7178_v18 = vld [vmem:[%s8525_s7 + $0xc00] sm:$0xf]  ;;  %v8101_v27 = vld [vmem:[%s8525_s7 + $0xcc4] sm:$0xf] }
 0x296   : > { %3775 = vmatmul.bf16.vlgmr.msra.gmra.mxu1 %v9652_v20  ;;  %3832 = vmatmul.bf16.vlgmr.msrb.gmra.mxu0 %v9561_v3  ;;  %v2723_v3 = vadd.f32 %v2722_v47, %v2704_v33  ;;  %vm2755_vm11 = vcmp.ge.f32.partialorder %v2740_v4, 0.0  ;;  %v2771_v28 = vmul.f32 0.2, %v2740_v4  ;;  %v7043_v47 = vld [vmem:[%s8525_s7 + $0xbf8] sm:$0xf0] }
 0x297   : > { %3805 = vmatpush.bf16.msra.mxu3 %v7042_v26  ;;  %3862 = vmatpush.bf16.msrb.mxu2 %v6918_v46  ;;  %v7046_v41 = vor.u32 %v8074_v51, %v7043_v47  ;;  %v7011_v33 = vld [vmem:[%s8525_s7 + $0xbb8] sm:$0xf0]  ;;  %v8079_v8 = vld [vmem:[%s8525_s7 + $0xc0c] sm:$0xf0]  ;;  %v7402_v51 = vld [vmem:[%s8525_s7 + $0xdc0] sm:$0xf] }
 0x298   : > { %v2787_v49 = vsel %vm2755_vm11, %v2740_v4, %v2771_v28  ;;  %v6803_v4 = vld [vmem:[%s8525_s7 + $0xa18] sm:$0xf0]  ;;  %v7014_v46 = vor.u32 %v8066_v63, %v7011_v33  ;;  %v8058_v28 = vld [vmem:[%s8525_s7 + $0xb6c] sm:$0xf]  ;;  %v8135_v47 = vld [vmem:[%s8525_s7 + $0xdcc] sm:$0xf0] }
 0x299   : > { %v2803_v52 = vmul.f32 1.4142135, %v2787_v49  ;;  %v6806_v26 = vor.u32 %v8014_v62, %v6803_v4  ;;  %v6934_v49 = vor.u32 %v8046_v56, %v6931_v43  ;;  %v8105_v62 = vld [vmem:[%s8525_s7 + $0xce4] sm:$0xf]  ;;  %v7403_v63 = vor.u32 %v8135_v47, %v7402_v51  ;;  %v8115_v47 = vld [vmem:[%s8525_s7 + $0xd2c] sm:$0xf0] }
 0x29a   : > { %v8093_v43 = vld [vmem:[%s8525_s7 + $0xc84] sm:$0xf] }
 0x29b   : > { %v2741_v14 = vpop.f32.mrf.mxu3  ;;  %3806 = vmatpush.bf16.msra.mxu3 %v7026_v21  ;;  %3863 = vmatpush.bf16.msrb.mxu2 %v6902_v35  ;;  %v8062_v21 = vld [vmem:[%s8525_s7 + $0xb8c] sm:$0xf] }
 0x29c   : > { %v2742_v11 = vadd.f32 %v2741_v14, %v2723_v3  ;;  %v6995_v3 = vld [vmem:[%s8525_s7 + $0xb98] sm:$0xf0]  ;;  %v8050_v35 = vld [vmem:[%s8525_s7 + $0xb2c] sm:$0xf] }
 0x29d   : > { %v6979_v14 = vld [vmem:[%s8525_s7 + $0xb78] sm:$0xf0] }
 0x29e   : > { %vm2759_vm12 = vcmp.ge.f32.partialorder %v2742_v11, 0.0  ;;  %v2775_v60 = vmul.f32 0.2, %v2742_v11  ;;  %v6982_v7 = vor.u32 %v8058_v28, %v6979_v14  ;;  %v7386_v28 = vld [vmem:[%s8525_s7 + $0xda0] sm:$0xf] }
 0x29f   : > { %3807 = vmatpush.bf16.msra.mxu3 %v7010_v1  ;;  %3864 = vmatpush.bf16.msrb.mxu2 %v6886_v44  ;;  %v6950_v1 = vor.u32 %v8050_v35, %v6947_v55  ;;  %v8131_v14 = vld [vmem:[%s8525_s7 + $0xdac] sm:$0xf0]  ;;  %v7370_v35 = vld [vmem:[%s8525_s7 + $0xd80] sm:$0xf] }
 0x2a0   : > { %v2791_v59 = vsel %vm2759_vm12, %v2742_v11, %v2775_v60  ;;  %v6966_v11 = vor.u32 %v8054_v45, %v6963_v61  ;;  %v8107_v60 = vld [vmem:[%s8525_s7 + $0xcec] sm:$0xf0]  ;;  %v8097_v45 = vld [vmem:[%s8525_s7 + $0xca4] sm:$0xf]  ;;  %v7387_v61 = vor.u32 %v8131_v14, %v7386_v28 }
 0x2a1   : > { %v2807_v0 = vmul.f32 1.4142135, %v2791_v59  ;;  %v7274_v59 = vld [vmem:[%s8525_s7 + $0xcc0] sm:$0xf]  ;;  %v8127_v55 = vld [vmem:[%s8525_s7 + $0xd8c] sm:$0xf0] }
 0x2a2   : > { %v7275_v29 = vor.u32 %v8103_v12, %v7274_v59  ;;  %v8077_v28 = vld [vmem:[%s8525_s7 + $0xc04] sm:$0xf] }
 0x2a3   : > { %v9857_v53 = vpack.c.bf16 %v2807_v0, %v2803_v52  ;;  %3808 = vmatpush.bf16.msra.mxu3 %v6994_v15  ;;  %3865 = vmatpush.bf16.msrb.mxu2 %v6870_v30  ;;  %v8099_v15 = vld [vmem:[%s8525_s7 + $0xcac] sm:$0xf0]  ;;  %v7243_v30 = vor.u32 %v8095_v40, %v7242_v22 }
 0x2a5   : > { %3666 = vmatmul.bf16.gmra.mxu3 %v9857_v53  ;;  %3723 = vmatmul.bf16.gmra.mxu2 %v9797_v2 }
 0x2a6   : > { %3780 = vmatmul.bf16.gmra.mxu1 %v9711_v25  ;;  %3837 = vmatmul.bf16.gmra.mxu0 %v9611_v23  ;;  %v6838_v23 = vor.u32 %v8022_v16, %v6835_v32 }
 0x2a7   : > { %3809 = vmatpush.bf16.msra.mxu3 %v6978_v57  ;;  %3866 = vmatpush.bf16.msrb.mxu2 %v6854_v37  ;;  %v8091_v57 = vld [vmem:[%s8525_s7 + $0xc6c] sm:$0xf0]  ;;  %v7210_v37 = vld [vmem:[%s8525_s7 + $0xc40] sm:$0xf] }
 0x2ab   : > { %3810 = vmatpush.bf16.msra.mxu3 %v6962_v13  ;;  %3867 = vmatpush.bf16.msrb.mxu2 %v6838_v23  ;;  %v7211_v13 = vor.u32 %v8087_v31, %v7210_v37  ;;  %v7194_v23 = vld [vmem:[%s8525_s7 + $0xc20] sm:$0xf]  ;;  %v8119_v37 = vld [vmem:[%s8525_s7 + $0xd4c] sm:$0xf0] }
 0x2ac   : > { %v7195_v36 = vor.u32 %v8083_v10, %v7194_v23 }
 0x2af   : > { %3811 = vmatpush.bf16.msra.mxu3 %v6946_v38  ;;  %3868 = vmatpush.bf16.msrb.mxu2 %v6822_v50  ;;  %v9936_v38 = vld [vmem:[%s8531_s12 + $0x8] sm:$0xf] }
 0x2b0   : > { %v9941_v58 = vperm.slane %v9936_v38, 0 }
 0x2b2   : > { %v3605_v52 = vpop.f32.mrf.mxu0 }
 0x2b3   : > { %3812 = vmatpush.bf16.msra.mxu3 %v6930_v6  ;;  %3869 = vmatpush.bf16.msrb.mxu2 %v6806_v26  ;;  %v8139_v6 = vld [vmem:[%s8525_s7 + $0xdec] sm:$0xf0]  ;;  %v7292_v26 = vld [vmem:[%s8525_s7 + $0xcf0] sm:$0xf0] }
 0x2b4   : > { %v7419_v4 = vor.u32 %v8139_v6, %v7418_v19 }
 0x2b5   : > { %3737 = vmatmul.bf16.vlgmr.msrb.gmra.mxu3 %v9831_v17  ;;  %3794 = vmatmul.bf16.vlgmr.msra.gmra.mxu2 %v9753_v5 }
 0x2b6   : > { %3851 = vmatmul.bf16.vlgmr.msrb.gmra.mxu1 %v9652_v20  ;;  %v6998_v20 = vor.u32 %v8062_v21, %v6995_v3  ;;  %v3606_v21 = vadd.f32 %v3605_v52, %v9941_v58 }
 0x2b7   : > { %3881 = vmatpush.bf16.msrb.mxu3 %v7046_v41  ;;  %v7295_v41 = vor.u32 %v8105_v62, %v7292_v26  ;;  %4771 = vmatpush.bf16.msra.mxu1 %v7419_v4 }
 0x2ba   : > { %v9916_v39 = vpop.f32.mrf.mxu0 }
 0x2bb   : > { %3882 = vmatpush.bf16.msrb.mxu3 %v7030_v34  ;;  %v7276_v34 = vld [vmem:[%s8525_s7 + $0xcd0] sm:$0xf0]  ;;  %4772 = vmatpush.bf16.msra.mxu1 %v7403_v63  ;;  %v3608_v12 = vadd.f32 %v9916_v39, %v9941_v58  ;;  %v7338_v39 = vld [vmem:[%s8525_s7 + $0xd40] sm:$0xf] }
 0x2bc   : > { %v7196_v63 = vld [vmem:[%s8525_s7 + $0xc30] sm:$0xf0] }
 0x2bf   : > { %3883 = vmatpush.bf16.msrb.mxu3 %v7014_v46  ;;  %v7279_v46 = vor.u32 %v8101_v27, %v7276_v34  ;;  %4773 = vmatpush.bf16.msra.mxu1 %v7387_v61  ;;  %v10009_v61 = vperm.slane %v9936_v38, 1 }
 0x2c2   : > { %v9927_v16 = vpop.f32.mrf.mxu0 }
 0x2c3   : > { %3884 = vmatpush.bf16.msrb.mxu3 %v6998_v20  ;;  %v3611_v10 = vadd.f32 %v9927_v16, %v9941_v58 }
 0x2c5   : > { %3742 = vmatmul.bf16.gmra.mxu3 %v9857_v53  ;;  %3799 = vmatmul.bf16.gmra.mxu2 %v9797_v2 }
 0x2c6   : > { %3856 = vmatmul.bf16.gmra.mxu1 %v9711_v25  ;;  %v7290_v25 = vld [vmem:[%s8525_s7 + $0xce0] sm:$0xf] }
 0x2c7   : > { %3885 = vmatpush.bf16.msrb.mxu3 %v6982_v7  ;;  %v7291_v44 = vor.u32 %v8107_v60, %v7290_v25  ;;  %v7371_v60 = vor.u32 %v8127_v55, %v7370_v35 }
 0x2c9   : > { %4752 = vmatpush.bf16.msra.mxu0 %v7291_v44  ;;  %4774 = vmatpush.bf16.msra.mxu1 %v7371_v60 }
 0x2ca   : > { %v9949_v48 = vpop.f32.mrf.mxu0 }
 0x2cb   : > { %3886 = vmatpush.bf16.msrb.mxu3 %v6966_v11  ;;  %v7260_v11 = vld [vmem:[%s8525_s7 + $0xcb0] sm:$0xf0]  ;;  %v3613_v14 = vadd.f32 %v9949_v48, %v9941_v58  ;;  %v8171_v58 = vld [vmem:[%s8525_s7 + $0xeec] sm:$0xf0] }
 0x2cc   : > { %v7263_v56 = vor.u32 %v8097_v45, %v7260_v11 }
 0x2cd   : > { %4753 = vmatpush.bf16.msra.mxu0 %v7275_v29 }
 0x2cf   : > { %3887 = vmatpush.bf16.msrb.mxu3 %v6950_v1 }
 0x2d2   : > { %v3624_v0 = vpop.f32.mrf.mxu1  ;;  %v9966_v59 = vpop.f32.mrf.mxu0 }
 0x2d3   : > { %3888 = vmatpush.bf16.msrb.mxu3 %v6934_v49  ;;  %v3625_v20 = vadd.f32 %v3624_v0, %v3606_v21  ;;  %v7244_v49 = vld [vmem:[%s8525_s7 + $0xc90] sm:$0xf0]  ;;  %v8111_v21 = vld [vmem:[%s8525_s7 + $0xd0c] sm:$0xf0] }
 0x2d4   : > { %v7247_v44 = vor.u32 %v8093_v43, %v7244_v49  ;;  %v8137_v43 = vld [vmem:[%s8525_s7 + $0xde4] sm:$0xf]  ;;  %v7420_v49 = vld [vmem:[%s8525_s7 + $0xdf0] sm:$0xf0] }
 0x2d5   : > { %3813 = vmatmul.bf16.vlgmr.msra.gmra.mxu3 %v9831_v17  ;;  %3870 = vmatmul.bf16.vlgmr.msrb.gmra.mxu2 %v9753_v5  ;;  %v7258_v5 = vld [vmem:[%s8525_s7 + $0xca0] sm:$0xf] }
 0x2da   : > { %v9918_v24 = vpop.f32.mrf.mxu1 }
 0x2db   : > { %v3627_v52 = vadd.f32 %v9918_v24, %v3608_v12  ;;  %v8085_v24 = vld [vmem:[%s8525_s7 + $0xc44] sm:$0xf]  ;;  %v8108_v12 = vld [vmem:[%s8525_s7 + $0xcf4] sm:$0xf0] }
 0x2e2   : > { %v9929_v32 = vpop.f32.mrf.mxu1 }
 0x2e5   : > { %3818 = vmatmul.bf16.gmra.mxu3 %v9857_v53  ;;  %3875 = vmatmul.bf16.gmra.mxu2 %v9797_v2  ;;  %v7259_v2 = vor.u32 %v8099_v15, %v7258_v5  ;;  %v7354_v15 = vld [vmem:[%s8525_s7 + $0xd60] sm:$0xf] }
 0x2e7   : > { %4754 = vmatpush.bf16.msra.mxu0 %v7259_v2  ;;  %v8123_v2 = vld [vmem:[%s8525_s7 + $0xd6c] sm:$0xf0] }
 0x2e8   : > { %v7355_v40 = vor.u32 %v8123_v2, %v7354_v15 }
 0x2ea   : > { %v9953_v33 = vpop.f32.mrf.mxu1  ;;  %4775 = vmatpush.bf16.msra.mxu1 %v7355_v40  ;;  %v7404_v40 = vld [vmem:[%s8525_s7 + $0xdd0] sm:$0xf0] }
 0x2eb   : > { %4755 = vmatpush.bf16.msra.mxu0 %v7243_v30  ;;  %v8089_v30 = vld [vmem:[%s8525_s7 + $0xc64] sm:$0xf]  ;;  %v3632_v11 = vadd.f32 %v9953_v33, %v3613_v14  ;;  %v8096_v14 = vld [vmem:[%s8525_s7 + $0xc94] sm:$0xf0] }
 0x2f2   : > { %v9970_v29 = vpop.f32.mrf.mxu1 }
 0x2f5   : > { %3889 = vmatmul.bf16.vlgmr.msrb.gmra.mxu3 %v9831_v17  ;;  %v7227_v17 = vor.u32 %v8091_v57, %v7226_v54 }
 0x2f7   : > { %4756 = vmatpush.bf16.msra.mxu0 %v7227_v17  ;;  %v7212_v17 = vld [vmem:[%s8525_s7 + $0xc50] sm:$0xf0] }
 0x2f8   : > { %v3643_v42 = vpop.f32.mrf.mxu2  ;;  %v7215_v23 = vor.u32 %v8085_v24, %v7212_v17 }
 0x2f9   : > { %v3644_v7 = vadd.f32 %v3643_v42, %v3625_v20  ;;  %v7228_v42 = vld [vmem:[%s8525_s7 + $0xc70] sm:$0xf0] }
 0x2fa   : > { %v7231_v57 = vor.u32 %v8089_v30, %v7228_v42  ;;  %v9990_v19 = vpop.f32.mrf.mxu1  ;;  %v7282_v30 = vld [vmem:[%s8525_s7 + $0xcc8] sm:$0xf] }
 0x2fb   : > { %4757 = vmatpush.bf16.msra.mxu0 %v7211_v13  ;;  %v7339_v13 = vor.u32 %v8119_v37, %v7338_v39  ;;  %v3682_v37 = vadd.f32 %v9966_v59, %v10009_v61 }
 0x2fd   : > { %4776 = vmatpush.bf16.msra.mxu1 %v7339_v13 }
 0x2ff   : > { %4758 = vmatpush.bf16.msra.mxu0 %v7195_v36  ;;  %v9987_v36 = vpop.f32.mrf.mxu0 }
 0x300   : > { %v9924_v9 = vpop.f32.mrf.mxu2 }
 0x301   : > { %v3646_v22 = vadd.f32 %v9924_v9, %v3627_v52  ;;  %v7530_v52 = vld [vmem:[%s8525_s7 + $0xec0] sm:$0xf] }
 0x302   : > { %v10020_v33 = vpop.f32.mrf.mxu1 }
 0x305   : > { %3894 = vmatmul.bf16.gmra.mxu3 %v9857_v53  ;;  %v7179_v53 = vor.u32 %v8079_v8, %v7178_v18  ;;  %v3630_v8 = vadd.f32 %v9929_v32, %v3611_v10  ;;  %v7322_v32 = vld [vmem:[%s8525_s7 + $0xd20] sm:$0xf] }
 0x306   : > { %v7323_v34 = vor.u32 %v8115_v47, %v7322_v32  ;;  %v8100_v47 = vld [vmem:[%s8525_s7 + $0xcb4] sm:$0xf0] }
 0x307   : > { %4759 = vmatpush.bf16.msra.mxu0 %v7179_v53  ;;  %v10012_v35 = vpop.f32.mrf.mxu0 }
 0x308   : > { %v9938_v50 = vpop.f32.mrf.mxu2  ;;  %4777 = vmatpush.bf16.msra.mxu1 %v7323_v34 }
 0x309   : > { %v3649_v62 = vadd.f32 %v9938_v50, %v3630_v8  ;;  %v7180_v50 = vld [vmem:[%s8525_s7 + $0xc10] sm:$0xf0] }
 0x30b   : > { %4828 = vmatpush.bf16.msrb.mxu0 %v7295_v41  ;;  %v8081_v41 = vld [vmem:[%s8525_s7 + $0xc24] sm:$0xf] }
 0x30c   : > { %v7199_v20 = vor.u32 %v8081_v41, %v7196_v63  ;;  %v7498_v41 = vld [vmem:[%s8525_s7 + $0xe80] sm:$0xf] }
 0x30f   : > { %4829 = vmatpush.bf16.msrb.mxu0 %v7279_v46  ;;  %v7306_v46 = vld [vmem:[%s8525_s7 + $0xd00] sm:$0xf] }
 0x310   : > { %v9956_v3 = vpop.f32.mrf.mxu2  ;;  %v7307_v45 = vor.u32 %v8111_v21, %v7306_v46  ;;  %v8125_v46 = vld [vmem:[%s8525_s7 + $0xd84] sm:$0xf]  ;;  %v7372_v21 = vld [vmem:[%s8525_s7 + $0xd90] sm:$0xf0] }
 0x311   : > { %v3651_v48 = vadd.f32 %v9956_v3, %v3632_v11 }
 0x312   : > { %4778 = vmatpush.bf16.msra.mxu1 %v7307_v45  ;;  %v3684_v45 = vadd.f32 %v9987_v36, %v10009_v61 }
 0x313   : > { %4830 = vmatpush.bf16.msrb.mxu0 %v7263_v56 }
 0x317   : > { %4831 = vmatpush.bf16.msrb.mxu0 %v7247_v44  ;;  %v7423_v44 = vor.u32 %v8137_v43, %v7420_v49  ;;  %v8121_v43 = vld [vmem:[%s8525_s7 + $0xd64] sm:$0xf]  ;;  %v7356_v49 = vld [vmem:[%s8525_s7 + $0xd70] sm:$0xf0] }
 0x318   : > { %v3662_v1 = vpop.f32.mrf.mxu3  ;;  %v9973_v5 = vpop.f32.mrf.mxu2 }
 0x319   : > { %v3663_v25 = vadd.f32 %v3662_v1, %v3644_v7  ;;  %v7183_v7 = vor.u32 %v8077_v28, %v7180_v50  ;;  %v7546_v1 = vld [vmem:[%s8525_s7 + $0xee0] sm:$0xf]  ;;  %4847 = vmatpush.bf16.msrb.mxu1 %v7423_v44  ;;  %v10051_v28 = vpop.f32.mrf.mxu1  ;;  %v7375_v50 = vor.u32 %v8125_v46, %v7372_v21  ;;  %v8092_v44 = vld [vmem:[%s8525_s7 + $0xc74] sm:$0xf0]  ;;  %v7308_v21 = vld [vmem:[%s8525_s7 + $0xd10] sm:$0xf0] }
 0x31a   : > { %v7547_v56 = vor.u32 %v8171_v58, %v7546_v1  ;;  %v7482_v58 = vld [vmem:[%s8525_s7 + $0xe60] sm:$0xf] }
 0x31b   : > { %vm3900_vm13 = vcmp.ge.f32.partialorder %v3663_v25, 0.0  ;;  %v3916_v0 = vmul.f32 0.2, %v3663_v25  ;;  %4832 = vmatpush.bf16.msrb.mxu0 %v7231_v57  ;;  %v8104_v57 = vld [vmem:[%s8525_s7 + $0xcd4] sm:$0xf0] }
 0x31c   : > { %4790 = vmatpush.bf16.msra.mxu2 %v7547_v56  ;;  %v7283_v17 = vor.u32 %v8104_v57, %v7282_v30 }
 0x31d   : > { %v3932_v9 = vsel %vm3900_vm13, %v3663_v25, %v3916_v0  ;;  %v7298_v25 = vld [vmem:[%s8525_s7 + $0xce8] sm:$0xf]  ;;  %v8167_v0 = vld [vmem:[%s8525_s7 + $0xecc] sm:$0xf0] }
 0x31e   : > { %v3948_v6 = vmul.f32 1.4142135, %v3932_v9  ;;  %v7299_v3 = vor.u32 %v8108_v12, %v7298_v25  ;;  %v7531_v2 = vor.u32 %v8167_v0, %v7530_v52  ;;  %v7514_v9 = vld [vmem:[%s8525_s7 + $0xea0] sm:$0xf]  ;;  %v7234_v25 = vld [vmem:[%s8525_s7 + $0xc68] sm:$0xf] }
 0x31f   : > { %4833 = vmatpush.bf16.msrb.mxu0 %v7215_v23  ;;  %v7466_v12 = vld [vmem:[%s8525_s7 + $0xe40] sm:$0xf]  ;;  %v8151_v52 = vld [vmem:[%s8525_s7 + $0xe4c] sm:$0xf0] }
 0x320   : > { %v3664_v54 = vpop.f32.mrf.mxu3  ;;  %v9995_v26 = vpop.f32.mrf.mxu2  ;;  %4791 = vmatpush.bf16.msra.mxu2 %v7531_v2  ;;  %v8117_v2 = vld [vmem:[%s8525_s7 + $0xd44] sm:$0xf] }
 0x321   : > { %v3665_v31 = vadd.f32 %v3664_v54, %v3646_v22  ;;  %v8133_v22 = vld [vmem:[%s8525_s7 + $0xdc4] sm:$0xf] }
 0x322   : > { %v7407_v54 = vor.u32 %v8133_v22, %v7404_v40  ;;  %v7340_v22 = vld [vmem:[%s8525_s7 + $0xd50] sm:$0xf0]  ;;  %v3687_v40 = vadd.f32 %v10012_v35, %v10009_v61 }
 0x323   : > { %vm3904_vm14 = vcmp.ge.f32.partialorder %v3665_v31, 0.0  ;;  %v3920_v18 = vmul.f32 0.2, %v3665_v31  ;;  %4834 = vmatpush.bf16.msrb.mxu0 %v7199_v20  ;;  %v7250_v20 = vld [vmem:[%s8525_s7 + $0xc88] sm:$0xf] }
 0x324   : > { %4848 = vmatpush.bf16.msrb.mxu1 %v7407_v54  ;;  %v8088_v54 = vld [vmem:[%s8525_s7 + $0xc54] sm:$0xf0] }
 0x325   : > { %v3936_v53 = vsel %vm3904_vm14, %v3665_v31, %v3920_v18  ;;  %v3701_v31 = vadd.f32 %v9970_v29, %v3682_v37  ;;  %v8163_v18 = vld [vmem:[%s8525_s7 + $0xeac] sm:$0xf0]  ;;  %v7266_v29 = vld [vmem:[%s8525_s7 + $0xca8] sm:$0xf] }
 0x326   : > { %v3952_v16 = vmul.f32 1.4142135, %v3936_v53  ;;  %v7515_v8 = vor.u32 %v8163_v18, %v7514_v9  ;;  %v8129_v53 = vld [vmem:[%s8525_s7 + $0xda4] sm:$0xf] }
 0x327   : > { %4835 = vmatpush.bf16.msrb.mxu0 %v7183_v7  ;;  %v3720_v59 = vadd.f32 %v9973_v5, %v3701_v31  ;;  %v7267_v5 = vor.u32 %v8100_v47, %v7266_v29  ;;  %v7251_v7 = vor.u32 %v8096_v14, %v7250_v20  ;;  %v3706_v31 = vadd.f32 %v10020_v33, %v3687_v40  ;;  %v7450_v33 = vld [vmem:[%s8525_s7 + $0xe20] sm:$0xf]  ;;  %v8084_v47 = vld [vmem:[%s8525_s7 + $0xc34] sm:$0xf0]  ;;  %v7186_v14 = vld [vmem:[%s8525_s7 + $0xc08] sm:$0xf] }
 0x328   : > { %v9993_v4 = vpack.c.bf16 %v3952_v16, %v3948_v6  ;;  %v3667_v51 = vpop.f32.mrf.mxu3  ;;  %v10029_v39 = vpop.f32.mrf.mxu2  ;;  %v7388_v6 = vld [vmem:[%s8525_s7 + $0xdb0] sm:$0xf0]  ;;  %4792 = vmatpush.bf16.msra.mxu2 %v7515_v8  ;;  %v8147_v8 = vld [vmem:[%s8525_s7 + $0xe2c] sm:$0xf0] }
 0x329   : > { %v3668_v27 = vadd.f32 %v3667_v51, %v3649_v62  ;;  %v10041_v16 = vpop.f32.mrf.mxu0  ;;  %v7391_v32 = vor.u32 %v8129_v53, %v7388_v6  ;;  %v3725_v9 = vadd.f32 %v10029_v39, %v3706_v31  ;;  %v8113_v53 = vld [vmem:[%s8525_s7 + $0xd24] sm:$0xf]  ;;  %v7451_v29 = vor.u32 %v8147_v8, %v7450_v33 }
 0x32a   : > { %4760 = vmatmul.bf16.vlgmr.msra.gmra.mxu0 %v9993_v4 }
 0x32b   : > { %vm3908_vm15 = vcmp.ge.f32.partialorder %v3668_v27, 0.0  ;;  %v3924_v55 = vmul.f32 0.2, %v3668_v27  ;;  %4904 = vmatpush.bf16.msra.mxu0 %v7299_v3  ;;  %4849 = vmatpush.bf16.msrb.mxu1 %v7391_v32  ;;  %v7467_v3 = vor.u32 %v8151_v52, %v7466_v12  ;;  %v7202_v32 = vld [vmem:[%s8525_s7 + $0xc28] sm:$0xf] }
 0x32c   : > { %v8106_v12 = vld [vmem:[%s8525_s7 + $0xcec] sm:$0xf] }
 0x32d   : > { %v3940_v42 = vsel %vm3908_vm15, %v3668_v27, %v3924_v55  ;;  %v8159_v27 = vld [vmem:[%s8525_s7 + $0xe8c] sm:$0xf0]  ;;  %v3703_v55 = vadd.f32 %v9990_v19, %v3684_v45  ;;  %v7359_v19 = vor.u32 %v8121_v43, %v7356_v49  ;;  %v8080_v45 = vld [vmem:[%s8525_s7 + $0xc14] sm:$0xf0]  ;;  %v8169_v43 = vld [vmem:[%s8525_s7 + $0xee4] sm:$0xf] }
 0x32e   : > { %v3956_v13 = vmul.f32 1.4142135, %v3940_v42  ;;  %v7499_v63 = vor.u32 %v8159_v27, %v7498_v41  ;;  %v7343_v42 = vor.u32 %v8117_v2, %v7340_v22  ;;  %v7203_v41 = vor.u32 %v8084_v47, %v7202_v32  ;;  %v7434_v27 = vld [vmem:[%s8525_s7 + $0xe00] sm:$0xf]  ;;  %v7548_v49 = vld [vmem:[%s8525_s7 + $0xef0] sm:$0xf0] }
 0x32f   : > { %4905 = vmatpush.bf16.msra.mxu0 %v7283_v17  ;;  %4850 = vmatpush.bf16.msrb.mxu1 %v7375_v50  ;;  %v3722_v56 = vadd.f32 %v9995_v26, %v3703_v55  ;;  %v7218_v26 = vld [vmem:[%s8525_s7 + $0xc48] sm:$0xf]  ;;  %v10078_v17 = vpop.f32.mrf.mxu1  ;;  %v8199_v2 = vld [vmem:[%s8525_s7 + $0xfcc] sm:$0xf0]  ;;  %v8165_v22 = vld [vmem:[%s8525_s7 + $0xec4] sm:$0xf] }
 0x330   : > { %v3669_v60 = vpop.f32.mrf.mxu3  ;;  %v10057_v11 = vpop.f32.mrf.mxu2  ;;  %4793 = vmatpush.bf16.msra.mxu2 %v7499_v63  ;;  %v3689_v63 = vadd.f32 %v10041_v16, %v10009_v61  ;;  %v7187_v16 = vor.u32 %v8080_v45, %v7186_v14  ;;  %v7642_v32 = vld [vmem:[%s8525_s7 + $0xfa0] sm:$0xf]  ;;  %v8195_v47 = vld [vmem:[%s8525_s7 + $0xfac] sm:$0xf0]  ;;  %v7268_v14 = vld [vmem:[%s8525_s7 + $0xcb8] sm:$0xf0] }
 0x331   : > { %v3670_v15 = vadd.f32 %v3669_v60, %v3651_v48  ;;  %v8155_v48 = vld [vmem:[%s8525_s7 + $0xe6c] sm:$0xf0]  ;;  %v10074_v30 = vpop.f32.mrf.mxu0  ;;  %v7626_v45 = vld [vmem:[%s8525_s7 + $0xf80] sm:$0xf] }
 0x332   : > { %v7483_v36 = vor.u32 %v8155_v48, %v7482_v58  ;;  %v3708_v61 = vadd.f32 %v10051_v28, %v3689_v63  ;;  %v7674_v58 = vld [vmem:[%s8525_s7 + $0xfe0] sm:$0xf]  ;;  %v8203_v48 = vld [vmem:[%s8525_s7 + $0xfec] sm:$0xf0]  ;;  %v7426_v28 = vld [vmem:[%s8525_s7 + $0xde8] sm:$0xf] }
 0x333   : > { %vm3912_vm0 = vcmp.ge.f32.partialorder %v3670_v15, 0.0  ;;  %v3928_v24 = vmul.f32 0.2, %v3670_v15  ;;  %4906 = vmatpush.bf16.msra.mxu0 %v7267_v5  ;;  %4851 = vmatpush.bf16.msrb.mxu1 %v7359_v19  ;;  %v8109_v5 = vld [vmem:[%s8525_s7 + $0xd04] sm:$0xf]  ;;  %v7551_v19 = vor.u32 %v8169_v43, %v7548_v49 }
 0x334   : > { %4794 = vmatpush.bf16.msra.mxu2 %v7483_v36  ;;  %v7311_v50 = vor.u32 %v8109_v5, %v7308_v21  ;;  %v7675_v36 = vor.u32 %v8203_v48, %v7674_v58  ;;  %v7394_v5 = vld [vmem:[%s8525_s7 + $0xda8] sm:$0xf]  ;;  %v8132_v63 = vld [vmem:[%s8525_s7 + $0xdb4] sm:$0xf0]  ;;  %v8157_v48 = vld [vmem:[%s8525_s7 + $0xe84] sm:$0xf] }
 0x335   : > { %v3944_v23 = vsel %vm3912_vm0, %v3670_v15, %v3928_v24  ;;  %v7235_v15 = vor.u32 %v8092_v44, %v7234_v25  ;;  %v7219_v24 = vor.u32 %v8088_v54, %v7218_v26  ;;  %v8140_v44 = vld [vmem:[%s8525_s7 + $0xdf4] sm:$0xf0]  ;;  %v7532_v54 = vld [vmem:[%s8525_s7 + $0xed0] sm:$0xf0]  ;;  %v7395_v21 = vor.u32 %v8132_v63, %v7394_v5 }
 0x336   : > { %v3960_v10 = vmul.f32 1.4142135, %v3944_v23  ;;  %4809 = vmatpush.bf16.msra.mxu3 %v7675_v36  ;;  %v7535_v31 = vor.u32 %v8165_v22, %v7532_v54  ;;  %v7378_v36 = vld [vmem:[%s8525_s7 + $0xd88] sm:$0xf]  ;;  %v8128_v49 = vld [vmem:[%s8525_s7 + $0xd94] sm:$0xf0] }
 0x337   : > { %4907 = vmatpush.bf16.msra.mxu0 %v7251_v7  ;;  %4852 = vmatpush.bf16.msrb.mxu1 %v7343_v42  ;;  %v10105_v7 = vperm.slane %v9936_v38, 2  ;;  %v10108_v55 = vpop.f32.mrf.mxu1  ;;  %v8090_v54 = vld [vmem:[%s8525_s7 + $0xc6c] sm:$0xf] }
 0x338   : > { %v3738_v62 = vpop.f32.mrf.mxu3  ;;  %v10043_v51 = vpack.c.bf16 %v3960_v10, %v3956_v13  ;;  %4795 = vmatpush.bf16.msra.mxu2 %v7467_v3  ;;  %v10081_v23 = vpop.f32.mrf.mxu2  ;;  %v7658_v3 = vld [vmem:[%s8525_s7 + $0xfc0] sm:$0xf] }
 0x339   : > { %v3739_v34 = vadd.f32 %v3738_v62, %v3720_v59  ;;  %v7324_v62 = vld [vmem:[%s8525_s7 + $0xd30] sm:$0xf0]  ;;  %v10100_v20 = vpop.f32.mrf.mxu0  ;;  %v3758_v26 = vadd.f32 %v10074_v30, %v10105_v7  ;;  %v7659_v42 = vor.u32 %v8199_v2, %v7658_v3  ;;  %v7362_v2 = vld [vmem:[%s8525_s7 + $0xd68] sm:$0xf] }
 0x33a   : > { %4765 = vmatmul.bf16.gmra.mxu0 %v10043_v51  ;;  %v7327_v39 = vor.u32 %v8113_v53, %v7324_v62  ;;  %v7484_v3 = vld [vmem:[%s8525_s7 + $0xe70] sm:$0xf0] }
 0x33b   : > { %vm3901_vm1 = vcmp.ge.f32.partialorder %v3739_v34, 0.0  ;;  %v3917_v1 = vmul.f32 0.2, %v3739_v34  ;;  %4908 = vmatpush.bf16.msra.mxu0 %v7235_v15  ;;  %4810 = vmatpush.bf16.msra.mxu3 %v7659_v42  ;;  %v8124_v42 = vld [vmem:[%s8525_s7 + $0xd74] sm:$0xf0] }
 0x33c   : > { %4796 = vmatpush.bf16.msra.mxu2 %v7451_v29  ;;  %4853 = vmatpush.bf16.msrb.mxu1 %v7327_v39  ;;  %v8161_v39 = vld [vmem:[%s8525_s7 + $0xea4] sm:$0xf] }
 0x33d   : > { %v3933_v57 = vsel %vm3901_vm1, %v3739_v34, %v3917_v1  ;;  %v8143_v34 = vld [vmem:[%s8525_s7 + $0xe0c] sm:$0xf0] }
 0x33e   : > { %v3949_v13 = vmul.f32 1.4142135, %v3933_v57  ;;  %v7435_v46 = vor.u32 %v8143_v34, %v7434_v27  ;;  %v7410_v57 = vld [vmem:[%s8525_s7 + $0xdc8] sm:$0xf]  ;;  %v7643_v27 = vor.u32 %v8195_v47, %v7642_v32  ;;  %v7516_v34 = vld [vmem:[%s8525_s7 + $0xeb0] sm:$0xf0] }
 0x33f   : > { %4909 = vmatpush.bf16.msra.mxu0 %v7219_v24  ;;  %v10136_v29 = vpop.f32.mrf.mxu1  ;;  %v8086_v32 = vld [vmem:[%s8525_s7 + $0xc4c] sm:$0xf] }
 0x340   : > { %v3740_v60 = vpop.f32.mrf.mxu3  ;;  %4797 = vmatpush.bf16.msra.mxu2 %v7435_v46  ;;  %v10116_v25 = vpop.f32.mrf.mxu2  ;;  %4854 = vmatpush.bf16.msrb.mxu1 %v7311_v50  ;;  %v7519_v46 = vor.u32 %v8161_v39, %v7516_v34  ;;  %v8098_v50 = vld [vmem:[%s8525_s7 + $0xcac] sm:$0xf] }
 0x341   : > { %v3741_v0 = vadd.f32 %v3740_v60, %v3722_v56  ;;  %v3727_v56 = vadd.f32 %v10057_v11, %v3708_v61  ;;  %v7300_v11 = vld [vmem:[%s8525_s7 + $0xcf8] sm:$0xf0]  ;;  %v10133_v33 = vpop.f32.mrf.mxu0  ;;  %v3760_v61 = vadd.f32 %v10100_v20, %v10105_v7  ;;  %4811 = vmatpush.bf16.msra.mxu3 %v7643_v27 }
 0x342   : > { %v7303_v15 = vor.u32 %v8106_v12, %v7300_v11  ;;  %v7610_v11 = vld [vmem:[%s8525_s7 + $0xf60] sm:$0xf] }
 0x343   : > { %vm3905_vm2 = vcmp.ge.f32.partialorder %v3741_v0, 0.0  ;;  %v3921_v37 = vmul.f32 0.2, %v3741_v0  ;;  %4910 = vmatpush.bf16.msra.mxu0 %v7203_v41  ;;  %v3779_v43 = vadd.f32 %v10108_v55, %v3760_v61  ;;  %v8153_v55 = vld [vmem:[%s8525_s7 + $0xe64] sm:$0xf] }
 0x344   : > { %4866 = vmatpush.bf16.msrb.mxu2 %v7551_v19  ;;  %v8145_v61 = vld [vmem:[%s8525_s7 + $0xe24] sm:$0xf] }
 0x345   : > { %v3937_v35 = vsel %vm3905_vm2, %v3741_v0, %v3921_v37  ;;  %v7427_v0 = vor.u32 %v8140_v44, %v7426_v28  ;;  %v8136_v37 = vld [vmem:[%s8525_s7 + $0xdd4] sm:$0xf0]  ;;  %v8094_v28 = vld [vmem:[%s8525_s7 + $0xc8c] sm:$0xf]  ;;  %v7379_v44 = vor.u32 %v8128_v49, %v7378_v36  ;;  %v7204_v49 = vld [vmem:[%s8525_s7 + $0xc38] sm:$0xf0] }
 0x346   : > { %v3953_v10 = vmul.f32 1.4142135, %v3937_v35  ;;  %v7411_v35 = vor.u32 %v8136_v37, %v7410_v57  ;;  %v7236_v57 = vld [vmem:[%s8525_s7 + $0xc78] sm:$0xf0]  ;;  %v7363_v37 = vor.u32 %v8124_v42, %v7362_v2  ;;  %v8078_v2 = vld [vmem:[%s8525_s7 + $0xc0c] sm:$0xf] }
 0x347   : > { %4911 = vmatpush.bf16.msra.mxu0 %v7187_v16  ;;  %v7271_v16 = vor.u32 %v8098_v50, %v7268_v14 }
 0x348   : > { %v10084_v18 = vpack.c.bf16 %v3953_v10, %v3949_v13  ;;  %v3743_v59 = vpop.f32.mrf.mxu3  ;;  %v8102_v13 = vld [vmem:[%s8525_s7 + $0xccc] sm:$0xf]  ;;  %v7284_v10 = vld [vmem:[%s8525_s7 + $0xcd8] sm:$0xf0]  ;;  %4867 = vmatpush.bf16.msrb.mxu2 %v7535_v31  ;;  %v7594_v31 = vld [vmem:[%s8525_s7 + $0xf40] sm:$0xf] }
 0x349   : > { %v3744_v6 = vadd.f32 %v3743_v59, %v3725_v9  ;;  %v3777_v9 = vadd.f32 %v10078_v17, %v3758_v26  ;;  %v7287_v59 = vor.u32 %v8102_v13, %v7284_v10  ;;  %v3764_v22 = vpop.f32.mrf.mxu0  ;;  %v8149_v13 = vld [vmem:[%s8525_s7 + $0xe44] sm:$0xf]  ;;  %v3763_v10 = vadd.f32 %v10133_v33, %v10105_v7  ;;  %v7220_v33 = vld [vmem:[%s8525_s7 + $0xc58] sm:$0xf0] }
 0x34a   : > { %4779 = vmatmul.bf16.vlgmr.msra.gmra.mxu1 %v10084_v18  ;;  %4836 = vmatmul.bf16.vlgmr.msrb.gmra.mxu0 %v9993_v4 }
 0x34b   : > { %vm3909_vm3 = vcmp.ge.f32.partialorder %v3744_v6, 0.0  ;;  %v3925_v1 = vmul.f32 0.2, %v3744_v6  ;;  %4923 = vmatpush.bf16.msra.mxu1 %v7427_v0  ;;  %4980 = vmatpush.bf16.msrb.mxu0 %v7303_v15  ;;  %v3798_v0 = vadd.f32 %v10116_v25, %v3779_v43  ;;  %v3782_v34 = vadd.f32 %v10136_v29, %v3763_v10  ;;  %v8179_v29 = vld [vmem:[%s8525_s7 + $0xf2c] sm:$0xf0] }
 0x34c   : > { %4868 = vmatpush.bf16.msrb.mxu2 %v7519_v46 }
 0x34d   : > { %v3941_v40 = vsel %vm3909_vm3, %v3744_v6, %v3925_v1  ;;  %v3796_v6 = vadd.f32 %v10081_v23, %v3777_v9  ;;  %v10146_v23 = vpop.f32.mrf.mxu2  ;;  %v8191_v1 = vld [vmem:[%s8525_s7 + $0xf8c] sm:$0xf0]  ;;  %v3783_v9 = vpop.f32.mrf.mxu1 }
 0x34e   : > { %v3957_v8 = vmul.f32 1.4142135, %v3941_v40  ;;  %v7627_v58 = vor.u32 %v8191_v1, %v7626_v45  ;;  %v7487_v40 = vor.u32 %v8153_v55, %v7484_v3  ;;  %v7578_v45 = vld [vmem:[%s8525_s7 + $0xf20] sm:$0xf]  ;;  %v8112_v3 = vld [vmem:[%s8525_s7 + $0xd14] sm:$0xf0] }
 0x34f   : > { %4924 = vmatpush.bf16.msra.mxu1 %v7411_v35  ;;  %4981 = vmatpush.bf16.msrb.mxu0 %v7287_v59  ;;  %v8183_v35 = vld [vmem:[%s8525_s7 + $0xf4c] sm:$0xf0]  ;;  %v7346_v59 = vld [vmem:[%s8525_s7 + $0xd48] sm:$0xf]  ;;  %v7579_v1 = vor.u32 %v8179_v29, %v7578_v45 }
 0x350   : > { %v3745_v60 = vpop.f32.mrf.mxu3  ;;  %4812 = vmatpush.bf16.msra.mxu3 %v7627_v58  ;;  %v7452_v58 = vld [vmem:[%s8525_s7 + $0xe30] sm:$0xf0] }
 0x351   : > { %v3746_v52 = vadd.f32 %v3745_v60, %v3727_v56  ;;  %v7500_v56 = vld [vmem:[%s8525_s7 + $0xe90] sm:$0xf0]  ;;  %v7252_v60 = vld [vmem:[%s8525_s7 + $0xc98] sm:$0xf0]  ;;  %v7455_v36 = vor.u32 %v8145_v61, %v7452_v58 }
 0x352   : > { %v7503_v20 = vor.u32 %v8157_v48, %v7500_v56  ;;  %v7255_v12 = vor.u32 %v8094_v28, %v7252_v60  ;;  %v7330_v48 = vld [vmem:[%s8525_s7 + $0xd28] sm:$0xf]  ;;  %v3833_v56 = vpop.f32.mrf.mxu0  ;;  %v7562_v28 = vld [vmem:[%s8525_s7 + $0xf00] sm:$0xf]  ;;  %v3765_v60 = vadd.f32 %v3764_v22, %v10105_v7  ;;  %v8141_v7 = vld [vmem:[%s8525_s7 + $0xe04] sm:$0xf] }
 0x353   : > { %vm3913_vm4 = vcmp.ge.f32.partialorder %v3746_v52, 0.0  ;;  %v3929_v24 = vmul.f32 0.2, %v3746_v52  ;;  %4925 = vmatpush.bf16.msra.mxu1 %v7395_v21  ;;  %4982 = vmatpush.bf16.msrb.mxu0 %v7271_v16  ;;  %v3801_v21 = vadd.f32 %v10146_v23, %v3782_v34  ;;  %v8116_v23 = vld [vmem:[%s8525_s7 + $0xd34] sm:$0xf0] }
 0x354   : > { %4869 = vmatpush.bf16.msrb.mxu2 %v7503_v20  ;;  %v7331_v43 = vor.u32 %v8116_v23, %v7330_v48  ;;  %v8082_v20 = vld [vmem:[%s8525_s7 + $0xc2c] sm:$0xf]  ;;  %v7188_v22 = vld [vmem:[%s8525_s7 + $0xc18] sm:$0xf0]  ;;  %v8193_v23 = vld [vmem:[%s8525_s7 + $0xfa4] sm:$0xf] }
 0x355   : > { %v3945_v30 = vsel %vm3913_vm4, %v3746_v52, %v3929_v24  ;;  %v8187_v52 = vld [vmem:[%s8525_s7 + $0xf6c] sm:$0xf0]  ;;  %v7239_v24 = vor.u32 %v8090_v54, %v7236_v57  ;;  %v3802_v47 = vpop.f32.mrf.mxu2  ;;  %v7191_v54 = vor.u32 %v8078_v2, %v7188_v22  ;;  %v8201_v57 = vld [vmem:[%s8525_s7 + $0xfe4] sm:$0xf]  ;;  %v7412_v34 = vld [vmem:[%s8525_s7 + $0xdd8] sm:$0xf0] }
 0x356   : > { %v3961_v53 = vmul.f32 1.4142135, %v3945_v30  ;;  %v7611_v15 = vor.u32 %v8187_v52, %v7610_v11  ;;  %v7468_v30 = vld [vmem:[%s8525_s7 + $0xe50] sm:$0xf0]  ;;  %v3852_v11 = vpop.f32.mrf.mxu1  ;;  %v8126_v2 = vld [vmem:[%s8525_s7 + $0xd8c] sm:$0xf] }
 0x357   : > { %4926 = vmatpush.bf16.msra.mxu1 %v7379_v44  ;;  %4983 = vmatpush.bf16.msrb.mxu0 %v7255_v12  ;;  %v7471_v39 = vor.u32 %v8149_v13, %v7468_v30  ;;  %v7207_v44 = vor.u32 %v8082_v20, %v7204_v49  ;;  %v8175_v12 = vld [vmem:[%s8525_s7 + $0xf0c] sm:$0xf0]  ;;  %v8138_v13 = vld [vmem:[%s8525_s7 + $0xdec] sm:$0xf]  ;;  %v7428_v30 = vld [vmem:[%s8525_s7 + $0xdf8] sm:$0xf0] }
 0x358   : > { %v3814_v17 = vpop.f32.mrf.mxu3  ;;  %v10138_v62 = vpack.c.bf16 %v3961_v53, %v3957_v8  ;;  %v8120_v8 = vld [vmem:[%s8525_s7 + $0xd54] sm:$0xf0]  ;;  %4813 = vmatpush.bf16.msra.mxu3 %v7611_v15  ;;  %4870 = vmatpush.bf16.msrb.mxu2 %v7487_v40  ;;  %v7563_v52 = vor.u32 %v8175_v12, %v7562_v28  ;;  %v3784_v15 = vadd.f32 %v3783_v9, %v3765_v60  ;;  %v8130_v28 = vld [vmem:[%s8525_s7 + $0xdac] sm:$0xf]  ;;  %v7396_v60 = vld [vmem:[%s8525_s7 + $0xdb8] sm:$0xf0] }
 0x359   : > { %v3815_v41 = vadd.f32 %v3814_v17, %v3796_v6  ;;  %v7595_v17 = vor.u32 %v8183_v35, %v7594_v31  ;;  %v7347_v27 = vor.u32 %v8120_v8, %v7346_v59  ;;  %v7554_v31 = vld [vmem:[%s8525_s7 + $0xee8] sm:$0xf]  ;;  %v8172_v35 = vld [vmem:[%s8525_s7 + $0xef4] sm:$0xf0]  ;;  %v8197_v59 = vld [vmem:[%s8525_s7 + $0xfc4] sm:$0xf]  ;;  %v7399_v12 = vor.u32 %v8130_v28, %v7396_v60 }
 0x35a   : > { %4784 = vmatmul.bf16.gmra.mxu1 %v10138_v62  ;;  %4841 = vmatmul.bf16.gmra.mxu0 %v10043_v51  ;;  %v7555_v9 = vor.u32 %v8172_v35, %v7554_v31  ;;  %v7660_v8 = vld [vmem:[%s8525_s7 + $0xfd0] sm:$0xf0]  ;;  %v8164_v49 = vld [vmem:[%s8525_s7 + $0xeb4] sm:$0xf0]  ;;  %v7380_v22 = vld [vmem:[%s8525_s7 + $0xd98] sm:$0xf0] }
 0x35b   : > { %vm3902_vm5 = vcmp.ge.f32.partialorder %v3815_v41, 0.0  ;;  %v3918_v19 = vmul.f32 0.2, %v3815_v41  ;;  %4927 = vmatpush.bf16.msra.mxu1 %v7363_v37  ;;  %4984 = vmatpush.bf16.msrb.mxu0 %v7239_v24  ;;  %v3803_v37 = vadd.f32 %v3802_v47, %v3784_v15  ;;  %v8134_v47 = vld [vmem:[%s8525_s7 + $0xdcc] sm:$0xf] }
 0x35c   : > { %4814 = vmatpush.bf16.msra.mxu3 %v7595_v17  ;;  %4871 = vmatpush.bf16.msrb.mxu2 %v7471_v39  ;;  %v7538_v17 = vld [vmem:[%s8525_s7 + $0xec8] sm:$0xf]  ;;  %v7364_v31 = vld [vmem:[%s8525_s7 + $0xd78] sm:$0xf0] }
 0x35d   : > { %v3934_v53 = vsel %vm3902_vm5, %v3815_v41, %v3918_v19  ;;  %v7223_v41 = vor.u32 %v8086_v32, %v7220_v33  ;;  %v10202_v19 = vperm.slane %v9936_v38, 3  ;;  %v7314_v38 = vld [vmem:[%s8525_s7 + $0xd08] sm:$0xf]  ;;  %v8168_v32 = vld [vmem:[%s8525_s7 + $0xed4] sm:$0xf0] }
 0x35e   : > { %v3950_v63 = vmul.f32 1.4142135, %v3934_v53  ;;  %v7315_v42 = vor.u32 %v8112_v3, %v7314_v38  ;;  %v7539_v33 = vor.u32 %v8168_v32, %v7538_v17  ;;  %v3854_v45 = vpop.f32.mrf.mxu1 }
 0x35f   : > { %4928 = vmatpush.bf16.msra.mxu1 %v7347_v27  ;;  %4985 = vmatpush.bf16.msrb.mxu0 %v7223_v41  ;;  %v3834_v39 = vadd.f32 %v3833_v56, %v10202_v19  ;;  %v7663_v27 = vor.u32 %v8197_v59, %v7660_v8  ;;  %v7644_v56 = vld [vmem:[%s8525_s7 + $0xfb0] sm:$0xf0]  ;;  %v8181_v8 = vld [vmem:[%s8525_s7 + $0xf44] sm:$0xf] }
 0x360   : > { %v3816_v26 = vpop.f32.mrf.mxu3  ;;  %4815 = vmatpush.bf16.msra.mxu3 %v7579_v1  ;;  %4872 = vmatpush.bf16.msrb.mxu2 %v7455_v36  ;;  %v7522_v36 = vld [vmem:[%s8525_s7 + $0xea8] sm:$0xf]  ;;  %v7647_v20 = vor.u32 %v8193_v23, %v7644_v56  ;;  %v8114_v23 = vld [vmem:[%s8525_s7 + $0xd2c] sm:$0xf]  ;;  %v7332_v56 = vld [vmem:[%s8525_s7 + $0xd38] sm:$0xf0] }
 0x361   : > { %v3817_v25 = vadd.f32 %v3816_v26, %v3798_v0  ;;  %v7436_v0 = vld [vmem:[%s8525_s7 + $0xe10] sm:$0xf0]  ;;  %v3871_v26 = vpop.f32.mrf.mxu2 }
 0x362   : > { %v7439_v55 = vor.u32 %v8141_v7, %v7436_v0  ;;  %v7506_v7 = vld [vmem:[%s8525_s7 + $0xe88] sm:$0xf] }
 0x363   : > { %vm3906_vm6 = vcmp.ge.f32.partialorder %v3817_v25, 0.0  ;;  %v3922_v6 = vmul.f32 0.2, %v3817_v25  ;;  %4929 = vmatpush.bf16.msra.mxu1 %v7331_v43  ;;  %4986 = vmatpush.bf16.msrb.mxu0 %v7207_v44  ;;  %v7523_v44 = vor.u32 %v8164_v49, %v7522_v36 }
 0x364   : > { %4816 = vmatpush.bf16.msra.mxu3 %v7563_v52  ;;  %4873 = vmatpush.bf16.msrb.mxu2 %v7439_v55  ;;  %v7628_v52 = vld [vmem:[%s8525_s7 + $0xf90] sm:$0xf0]  ;;  %v8160_v55 = vld [vmem:[%s8525_s7 + $0xe94] sm:$0xf0] }
 0x365   : > { %v3938_v5 = vsel %vm3906_vm6, %v3817_v25, %v3922_v6  ;;  %v7676_v25 = vld [vmem:[%s8525_s7 + $0xff0] sm:$0xf0]  ;;  %v7431_v6 = vor.u32 %v8138_v13, %v7428_v30  ;;  %v7507_v3 = vor.u32 %v8160_v55, %v7506_v7  ;;  %v8144_v7 = vld [vmem:[%s8525_s7 + $0xe14] sm:$0xf0]  ;;  %v7316_v55 = vld [vmem:[%s8525_s7 + $0xd18] sm:$0xf0] }
 0x366   : > { %v3954_v46 = vmul.f32 1.4142135, %v3938_v5  ;;  %v7679_v24 = vor.u32 %v8201_v57, %v7676_v25  ;;  %v7490_v57 = vld [vmem:[%s8525_s7 + $0xe68] sm:$0xf]  ;;  %v8156_v25 = vld [vmem:[%s8525_s7 + $0xe74] sm:$0xf0] }
 0x367   : > { %4930 = vmatpush.bf16.msra.mxu1 %v7315_v42  ;;  %4987 = vmatpush.bf16.msrb.mxu0 %v7191_v54  ;;  %v7383_v42 = vor.u32 %v8126_v2, %v7380_v22  ;;  %v7612_v54 = vld [vmem:[%s8525_s7 + $0xf70] sm:$0xf0]  ;;  %v7491_v30 = vor.u32 %v8156_v25, %v7490_v57  ;;  %v8204_v2 = vld [vmem:[%s8525_s7 + $0xff4] sm:$0xf0]  ;;  %v7556_v57 = vld [vmem:[%s8525_s7 + $0xef8] sm:$0xf0] }
 0x368   : > { %v10185_v50 = vpack.c.bf16 %v3954_v46, %v3950_v63  ;;  %v3819_v14 = vpop.f32.mrf.mxu3  ;;  %4885 = vmatpush.bf16.msrb.mxu3 %v7679_v24  ;;  %v7415_v63 = vor.u32 %v8134_v47, %v7412_v34  ;;  %v3835_v46 = vpop.f32.mrf.mxu0  ;;  %v8122_v24 = vld [vmem:[%s8525_s7 + $0xd6c] sm:$0xf]  ;;  %v8152_v47 = vld [vmem:[%s8525_s7 + $0xe54] sm:$0xf0] }
 0x369   : > { %v10190_v16 = vadd.f32 %v3819_v14, %v3801_v21  ;;  %v3853_v21 = vadd.f32 %v3852_v11, %v3834_v39  ;;  %v8189_v11 = vld [vmem:[%s8525_s7 + $0xf84] sm:$0xf]  ;;  %v3836_v0 = vadd.f32 %v3835_v46, %v10202_v19  ;;  %v7367_v59 = vor.u32 %v8122_v24, %v7364_v31  ;;  %v8118_v39 = vld [vmem:[%s8525_s7 + $0xd4c] sm:$0xf] }
 0x36a   : > { %4798 = vmatmul.bf16.vlgmr.msra.gmra.mxu2 %v10185_v50  ;;  %4855 = vmatmul.bf16.vlgmr.msrb.gmra.mxu1 %v10084_v18  ;;  %v7631_v15 = vor.u32 %v8189_v11, %v7628_v52  ;;  %v7335_v11 = vor.u32 %v8114_v23, %v7332_v56  ;;  %v7442_v52 = vld [vmem:[%s8525_s7 + $0xe08] sm:$0xf]  ;;  %v8154_v56 = vld [vmem:[%s8525_s7 + $0xe6c] sm:$0xf] }
 0x36b   : > { %vm3910_vm7 = vcmp.ge.f32.partialorder %v10190_v16, 0.0  ;;  %4912 = vmatmul.bf16.vlgmr.msra.gmra.mxu0 %v9993_v4  ;;  %v3926_v40 = vmul.f32 0.2, %v10190_v16  ;;  %4942 = vmatpush.bf16.msra.mxu2 %v7555_v9  ;;  %v3872_v1 = vadd.f32 %v3871_v26, %v3853_v21  ;;  %v8185_v26 = vld [vmem:[%s8525_s7 + $0xf64] sm:$0xf] }
 0x36c   : > { %4999 = vmatpush.bf16.msrb.mxu1 %v7431_v6  ;;  %4886 = vmatpush.bf16.msrb.mxu3 %v7663_v27  ;;  %v7615_v13 = vor.u32 %v8185_v26, %v7612_v54  ;;  %v7474_v6 = vld [vmem:[%s8525_s7 + $0xe48] sm:$0xf]  ;;  %v7348_v27 = vld [vmem:[%s8525_s7 + $0xd58] sm:$0xf0]  ;;  %v8170_v26 = vld [vmem:[%s8525_s7 + $0xeec] sm:$0xf]  ;;  %v7443_v54 = vor.u32 %v8144_v7, %v7442_v52 }
 0x36d   : > { %v3942_v5 = vsel %vm3910_vm7, %v10190_v16, %v3926_v40  ;;  %v3873_v16 = vpop.f32.mrf.mxu2  ;;  %v3855_v40 = vadd.f32 %v3854_v45, %v3836_v0  ;;  %v7475_v46 = vor.u32 %v8152_v47, %v7474_v6  ;;  %v7351_v21 = vor.u32 %v8118_v39, %v7348_v27  ;;  %v8110_v0 = vld [vmem:[%s8525_s7 + $0xd0c] sm:$0xf] }
 0x36e   : > { %v3958_v29 = vmul.f32 1.4142135, %v3942_v5  ;;  %v7559_v31 = vor.u32 %v8170_v26, %v7556_v57  ;;  %v7444_v26 = vld [vmem:[%s8525_s7 + $0xe18] sm:$0xf0]  ;;  %v8198_v57 = vld [vmem:[%s8525_s7 + $0xfcc] sm:$0xf] }
 0x36f   : > { %4943 = vmatpush.bf16.msra.mxu2 %v7539_v33  ;;  %v3874_v35 = vadd.f32 %v3873_v16, %v3855_v40  ;;  %v8148_v16 = vld [vmem:[%s8525_s7 + $0xe34] sm:$0xf0] }
 0x370   : > { %v3821_v10 = vpop.f32.mrf.mxu3  ;;  %5000 = vmatpush.bf16.msrb.mxu1 %v7415_v63  ;;  %4887 = vmatpush.bf16.msrb.mxu3 %v7647_v20 }
 0x371   : > { %v3822_v53 = vadd.f32 %v3821_v10, %v3803_v37  ;;  %v3838_v37 = vpop.f32.mrf.mxu0  ;;  %v3857_v10 = vpop.f32.mrf.mxu1 }
 0x372   : > { %v3839_v34 = vadd.f32 %v3838_v37, %v10202_v19  ;;  %v7319_v37 = vor.u32 %v8110_v0, %v7316_v55  ;;  %v8146_v0 = vld [vmem:[%s8525_s7 + $0xe2c] sm:$0xf]  ;;  %v8176_v55 = vld [vmem:[%s8525_s7 + $0xf14] sm:$0xf0] }
 0x373   : > { %vm3914_vm8 = vcmp.ge.f32.partialorder %v3822_v53, 0.0  ;;  %v3930_v41 = vmul.f32 0.2, %v3822_v53  ;;  %4944 = vmatpush.bf16.msra.mxu2 %v7523_v44  ;;  %v8173_v44 = vld [vmem:[%s8525_s7 + $0xf04] sm:$0xf] }
 0x374   : > { %5001 = vmatpush.bf16.msrb.mxu1 %v7399_v12  ;;  %4888 = vmatpush.bf16.msrb.mxu3 %v7631_v15  ;;  %v3858_v45 = vadd.f32 %v3857_v10, %v3839_v34  ;;  %v7564_v12 = vld [vmem:[%s8525_s7 + $0xf10] sm:$0xf0]  ;;  %v8162_v34 = vld [vmem:[%s8525_s7 + $0xeac] sm:$0xf] }
 0x375   : > { %v3946_v14 = vsel %vm3914_vm8, %v3822_v53, %v3930_v41  ;;  %v7596_v53 = vld [vmem:[%s8525_s7 + $0xf50] sm:$0xf0]  ;;  %v3876_v33 = vpop.f32.mrf.mxu2 }
 0x376   : > { %v3962_v61 = vmul.f32 1.4142135, %v3946_v14  ;;  %v7599_v41 = vor.u32 %v8181_v8, %v7596_v53  ;;  %v8177_v14 = vld [vmem:[%s8525_s7 + $0xf24] sm:$0xf]  ;;  %v3877_v36 = vadd.f32 %v3876_v33, %v3858_v45 }
 0x377   : > { %4945 = vmatpush.bf16.msra.mxu2 %v7507_v3  ;;  %v7682_v3 = vld [vmem:[%s8525_s7 + $0xfe8] sm:$0xf] }
 0x378   : > { %v10230_v58 = vpack.c.bf16 %v3962_v61, %v3958_v29  ;;  %v3890_v48 = vpop.f32.mrf.mxu3  ;;  %5002 = vmatpush.bf16.msrb.mxu1 %v7383_v42  ;;  %4889 = vmatpush.bf16.msrb.mxu3 %v7615_v13  ;;  %v7580_v61 = vld [vmem:[%s8525_s7 + $0xf30] sm:$0xf0]  ;;  %v7567_v42 = vor.u32 %v8173_v44, %v7564_v12  ;;  %v7683_v24 = vor.u32 %v8204_v2, %v7682_v3  ;;  %v8200_v13 = vld [vmem:[%s8525_s7 + $0xfd4] sm:$0xf0]  ;;  %v8150_v44 = vld [vmem:[%s8525_s7 + $0xe4c] sm:$0xf] }
 0x379   : > { %v3891_v43 = vadd.f32 %v3890_v48, %v3872_v1  ;;  %v7458_v1 = vld [vmem:[%s8525_s7 + $0xe28] sm:$0xf]  ;;  %v7583_v28 = vor.u32 %v8177_v14, %v7580_v61  ;;  %v7508_v61 = vld [vmem:[%s8525_s7 + $0xe98] sm:$0xf0] }
 0x37a   : > { %4803 = vmatmul.bf16.gmra.mxu2 %v10230_v58  ;;  %4860 = vmatmul.bf16.gmra.mxu1 %v10138_v62  ;;  %v7459_v60 = vor.u32 %v8148_v16, %v7458_v1  ;;  %v7618_v1 = vld [vmem:[%s8525_s7 + $0xf68] sm:$0xf]  ;;  %v8188_v16 = vld [vmem:[%s8525_s7 + $0xf74] sm:$0xf0] }
 0x37b   : > { %v3919_v38 = vmul.f32 0.2, %v3891_v43  ;;  %4917 = vmatmul.bf16.gmra.mxu0 %v10043_v51  ;;  %vm3903_vm9 = vcmp.ge.f32.partialorder %v3891_v43, 0.0  ;;  %4946 = vmatpush.bf16.msra.mxu2 %v7491_v30  ;;  %v7540_v30 = vld [vmem:[%s8525_s7 + $0xed8] sm:$0xf0]  ;;  %v7619_v23 = vor.u32 %v8188_v16, %v7618_v1 }
 0x37c   : > { %5003 = vmatpush.bf16.msrb.mxu1 %v7367_v59  ;;  %4890 = vmatpush.bf16.msrb.mxu3 %v7599_v41  ;;  %v7586_v12 = vld [vmem:[%s8525_s7 + $0xf28] sm:$0xf] }
 0x37d   : > { %v3935_v17 = vsel %vm3903_vm9, %v3891_v43, %v3919_v38  ;;  %v3840_v43 = vpop.f32.mrf.mxu0  ;;  %v3859_v38 = vpop.f32.mrf.mxu1 }
 0x37e   : > { %v3951_v63 = vmul.f32 1.4142135, %v3935_v17  ;;  %v3841_v22 = vadd.f32 %v3840_v43, %v10202_v19  ;;  %v3878_v40 = vpop.f32.mrf.mxu2  ;;  %v7650_v17 = vld [vmem:[%s8525_s7 + $0xfa8] sm:$0xf] }
 0x37f   : > { %4947 = vmatpush.bf16.msra.mxu2 %v7475_v46  ;;  %v8192_v46 = vld [vmem:[%s8525_s7 + $0xf94] sm:$0xf0]  ;;  %v7602_v43 = vld [vmem:[%s8525_s7 + $0xf48] sm:$0xf] }
 0x380   : > { %v3892_v9 = vpop.f32.mrf.mxu3  ;;  %5004 = vmatpush.bf16.msrb.mxu1 %v7351_v21  ;;  %4891 = vmatpush.bf16.msrb.mxu3 %v7583_v28  ;;  %v3860_v25 = vadd.f32 %v3859_v38, %v3841_v22  ;;  %v7460_v38 = vld [vmem:[%s8525_s7 + $0xe38] sm:$0xf0]  ;;  %v8142_v22 = vld [vmem:[%s8525_s7 + $0xe0c] sm:$0xf] }
 0x381   : > { %v3893_v32 = vadd.f32 %v3892_v9, %v3874_v35  ;;  %v7666_v35 = vld [vmem:[%s8525_s7 + $0xfc8] sm:$0xf]  ;;  %v8166_v9 = vld [vmem:[%s8525_s7 + $0xecc] sm:$0xf]  ;;  %v7463_v3 = vor.u32 %v8146_v0, %v7460_v38 }
 0x382   : > { %v7667_v8 = vor.u32 %v8200_v13, %v7666_v35  ;;  %v7543_v6 = vor.u32 %v8166_v9, %v7540_v30  ;;  %v8190_v13 = vld [vmem:[%s8525_s7 + $0xf8c] sm:$0xf]  ;;  %v7620_v9 = vld [vmem:[%s8525_s7 + $0xf78] sm:$0xf0] }
 0x383   : > { %vm3907_vm10 = vcmp.ge.f32.partialorder %v3893_v32, 0.0  ;;  %v3923_v5 = vmul.f32 0.2, %v3893_v32  ;;  %4948 = vmatpush.bf16.msra.mxu2 %v7459_v60 }
 0x384   : > { %5005 = vmatpush.bf16.msrb.mxu1 %v7335_v11  ;;  %4892 = vmatpush.bf16.msrb.mxu3 %v7567_v42  ;;  %v8180_v11 = vld [vmem:[%s8525_s7 + $0xf34] sm:$0xf0]  ;;  %v7684_v42 = vld [vmem:[%s8525_s7 + $0xff8] sm:$0xf0] }
 0x385   : > { %v3939_v29 = vsel %vm3907_vm10, %v3893_v32, %v3923_v5  ;;  %v8196_v32 = vld [vmem:[%s8525_s7 + $0xfb4] sm:$0xf0]  ;;  %v7524_v5 = vld [vmem:[%s8525_s7 + $0xeb8] sm:$0xf0]  ;;  %v7587_v7 = vor.u32 %v8180_v11, %v7586_v12 }
 0x386   : > { %v3955_v48 = vmul.f32 1.4142135, %v3939_v29  ;;  %v7651_v33 = vor.u32 %v8196_v32, %v7650_v17  ;;  %v7527_v14 = vor.u32 %v8162_v34, %v7524_v5  ;;  %v8158_v29 = vld [vmem:[%s8525_s7 + $0xe8c] sm:$0xf]  ;;  %v7588_v17 = vld [vmem:[%s8525_s7 + $0xf38] sm:$0xf0] }
 0x387   : > { %4949 = vmatpush.bf16.msra.mxu2 %v7443_v54 }
 0x388   : > { %v10267_v20 = vpack.c.bf16 %v3955_v48, %v3951_v63  ;;  %v3895_v49 = vpop.f32.mrf.mxu3  ;;  %5006 = vmatpush.bf16.msrb.mxu1 %v7319_v37  ;;  %v7634_v63 = vld [vmem:[%s8525_s7 + $0xf88] sm:$0xf]  ;;  %v7511_v48 = vor.u32 %v8158_v29, %v7508_v61  ;;  %v7447_v37 = vor.u32 %v8142_v22, %v7444_v26  ;;  %v10347_v29 = vld [vmem:[%s8531_s12 + $0xc] sm:$0xf] }
 0x389   : > { %v3896_v15 = vadd.f32 %v3895_v49, %v3877_v36  ;;  %v7635_v45 = vor.u32 %v8192_v46, %v7634_v63  ;;  %v7492_v36 = vld [vmem:[%s8525_s7 + $0xe78] sm:$0xf0]  ;;  %v8184_v49 = vld [vmem:[%s8525_s7 + $0xf54] sm:$0xf0] }
 0x38a   : > { %4817 = vmatmul.bf16.vlgmr.msra.gmra.mxu3 %v10267_v20  ;;  %4874 = vmatmul.bf16.vlgmr.msrb.gmra.mxu2 %v10185_v50  ;;  %v7495_v28 = vor.u32 %v8154_v56, %v7492_v36  ;;  %v7603_v60 = vor.u32 %v8184_v49, %v7602_v43 }
 0x38b   : > { %4931 = vmatmul.bf16.vlgmr.msra.gmra.mxu1 %v10084_v18  ;;  %4988 = vmatmul.bf16.vlgmr.msrb.gmra.mxu0 %v9993_v4  ;;  %v3927_v19 = vmul.f32 0.2, %v3896_v15  ;;  %v3879_v4 = vadd.f32 %v3878_v40, %v3860_v25  ;;  %vm3911_vm11 = vcmp.ge.f32.partialorder %v3896_v15, 0.0  ;;  %v8202_v40 = vld [vmem:[%s8525_s7 + $0xfec] sm:$0xf] }
 0x38c   : > { %4961 = vmatpush.bf16.msra.mxu3 %v7683_v24  ;;  %5018 = vmatpush.bf16.msrb.mxu2 %v7559_v31  ;;  %v7687_v54 = vor.u32 %v8202_v40, %v7684_v42  ;;  %v7668_v25 = vld [vmem:[%s8525_s7 + $0xfd8] sm:$0xf0] }
 0x38d   : > { %v3943_v53 = vsel %vm3911_vm11, %v3896_v15, %v3927_v19  ;;  %v7570_v15 = vld [vmem:[%s8525_s7 + $0xf08] sm:$0xf]  ;;  %v7671_v24 = vor.u32 %v8198_v57, %v7668_v25  ;;  %v8194_v19 = vld [vmem:[%s8525_s7 + $0xfac] sm:$0xf]  ;;  %v7652_v31 = vld [vmem:[%s8525_s7 + $0xfb8] sm:$0xf0] }
 0x38e   : > { %v3959_v39 = vmul.f32 1.4142135, %v3943_v53  ;;  %v7571_v2 = vor.u32 %v8176_v55, %v7570_v15  ;;  %v7655_v35 = vor.u32 %v8194_v19, %v7652_v31  ;;  %v4105_v31 = vperm.slane %v10347_v29, 1 }
 0x390   : > { %v3897_v10 = vpop.f32.mrf.mxu3  ;;  %4962 = vmatpush.bf16.msra.mxu3 %v7667_v8  ;;  %5019 = vmatpush.bf16.msrb.mxu2 %v7543_v6  ;;  %v7604_v8 = vld [vmem:[%s8525_s7 + $0xf58] sm:$0xf0]  ;;  %v8178_v6 = vld [vmem:[%s8525_s7 + $0xf2c] sm:$0xf] }
 0x391   : > { %v3898_v59 = vadd.f32 %v3897_v10, %v3879_v4  ;;  %v8186_v10 = vld [vmem:[%s8525_s7 + $0xf6c] sm:$0xf]  ;;  %v7591_v32 = vor.u32 %v8178_v6, %v7588_v17 }
 0x392   : > { %v7623_v30 = vor.u32 %v8186_v10, %v7620_v9 }
 0x393   : > { %vm3915_vm12 = vcmp.ge.f32.partialorder %v3898_v59, 0.0  ;;  %v3931_v47 = vmul.f32 0.2, %v3898_v59 }
 0x394   : > { %4963 = vmatpush.bf16.msra.mxu3 %v7651_v33  ;;  %5020 = vmatpush.bf16.msrb.mxu2 %v7527_v14 }
 0x395   : > { %v3947_v27 = vsel %vm3915_vm12, %v3898_v59, %v3931_v47  ;;  %v8182_v59 = vld [vmem:[%s8525_s7 + $0xf4c] sm:$0xf] }
 0x396   : > { %v3963_v41 = vmul.f32 1.4142135, %v3947_v27  ;;  %v7607_v53 = vor.u32 %v8182_v59, %v7604_v8  ;;  %v8174_v47 = vld [vmem:[%s8525_s7 + $0xf0c] sm:$0xf] }
 0x398   : > { %v10294_v21 = vpack.c.bf16 %v3963_v41, %v3959_v39  ;;  %4964 = vmatpush.bf16.msra.mxu3 %v7635_v45  ;;  %5021 = vmatpush.bf16.msrb.mxu2 %v7511_v48  ;;  %v7572_v39 = vld [vmem:[%s8525_s7 + $0xf18] sm:$0xf0] }
 0x399   : > { %v7575_v27 = vor.u32 %v8174_v47, %v7572_v39 }
 0x39a   : > { %4822 = vmatmul.bf16.gmra.mxu3 %v10294_v21  ;;  %4879 = vmatmul.bf16.gmra.mxu2 %v10230_v58 }
 0x39b   : > { %4936 = vmatmul.bf16.gmra.mxu1 %v10138_v62  ;;  %4993 = vmatmul.bf16.gmra.mxu0 %v10043_v51  ;;  %v7476_v51 = vld [vmem:[%s8525_s7 + $0xe58] sm:$0xf0] }
 0x39c   : > { %4965 = vmatpush.bf16.msra.mxu3 %v7619_v23  ;;  %5022 = vmatpush.bf16.msrb.mxu2 %v7495_v28  ;;  %v7479_v52 = vor.u32 %v8150_v44, %v7476_v51 }
 0x3a0   : > { %4966 = vmatpush.bf16.msra.mxu3 %v7603_v60  ;;  %5023 = vmatpush.bf16.msrb.mxu2 %v7479_v52 }
 0x3a4   : > { %4967 = vmatpush.bf16.msra.mxu3 %v7587_v7  ;;  %5024 = vmatpush.bf16.msrb.mxu2 %v7463_v3 }
 0x3a8   : > { %4968 = vmatpush.bf16.msra.mxu3 %v7571_v2  ;;  %5025 = vmatpush.bf16.msrb.mxu2 %v7447_v37 }
 0x3aa   : > { %4893 = vmatmul.bf16.vlgmr.msrb.gmra.mxu3 %v10267_v20  ;;  %4950 = vmatmul.bf16.vlgmr.msra.gmra.mxu2 %v10185_v50 }
 0x3ab   : > { %5007 = vmatmul.bf16.vlgmr.msrb.gmra.mxu1 %v10084_v18  ;;  %v7636_v18 = vld [vmem:[%s8525_s7 + $0xf98] sm:$0xf0] }
 0x3ac   : > { %5037 = vmatpush.bf16.msrb.mxu3 %v7687_v54  ;;  %v7639_v4 = vor.u32 %v8190_v13, %v7636_v18 }
 0x3b0   : > { %5038 = vmatpush.bf16.msrb.mxu3 %v7671_v24 }
 0x3b4   : > { %5039 = vmatpush.bf16.msrb.mxu3 %v7655_v35 }
 0x3b8   : > { %5040 = vmatpush.bf16.msrb.mxu3 %v7639_v4 }
 0x3ba   : > { %4898 = vmatmul.bf16.gmra.mxu3 %v10294_v21  ;;  %4955 = vmatmul.bf16.gmra.mxu2 %v10230_v58 }
 0x3bb   : > { %5012 = vmatmul.bf16.gmra.mxu1 %v10138_v62  ;;  %v4761_v62 = vpop.f32.mrf.mxu0 }
 0x3bc   : > { %5041 = vmatpush.bf16.msrb.mxu3 %v7623_v30 }
 0x3c0   : > { %5042 = vmatpush.bf16.msrb.mxu3 %v7607_v53 }
 0x3c3   : > { %v4763_v5 = vpop.f32.mrf.mxu0 }
 0x3c4   : > { %5043 = vmatpush.bf16.msrb.mxu3 %v7591_v32 }
 0x3c7   : > { %v4780_v33 = vpop.f32.mrf.mxu1 }
 0x3c8   : > { %5044 = vmatpush.bf16.msrb.mxu3 %v7575_v27 }
 0x3ca   : > { %4969 = vmatmul.bf16.vlgmr.msra.gmra.mxu3 %v10267_v20  ;;  %5026 = vmatmul.bf16.vlgmr.msrb.gmra.mxu2 %v10185_v50  ;;  %v4104_v50 = vperm.slane %v10347_v29, 0 }
 0x3cb   : > { %v4766_v46 = vpop.f32.mrf.mxu0 }
 0x3cc   : > { %v4762_v1 = vadd.f32 %v4761_v62, %v4104_v50  ;;  %v4764_v43 = vadd.f32 %v4763_v5, %v4104_v50  ;;  %v4767_v7 = vadd.f32 %v4766_v46, %v4104_v50 }
 0x3ce   : > { %v4781_v48 = vadd.f32 %v4780_v33, %v4762_v1 }
 0x3cf   : > { %v4782_v41 = vpop.f32.mrf.mxu1 }
 0x3d0   : > { %v4783_v28 = vadd.f32 %v4782_v41, %v4764_v43 }
 0x3d3   : > { %v4768_v61 = vpop.f32.mrf.mxu0 }
 0x3d4   : > { %v4769_v54 = vadd.f32 %v4768_v61, %v4104_v50 }
 0x3d7   : > { %v4785_v14 = vpop.f32.mrf.mxu1 }
 0x3d8   : > { %v4786_v15 = vadd.f32 %v4785_v14, %v4767_v7 }
 0x3da   : > { %4974 = vmatmul.bf16.gmra.mxu3 %v10294_v21  ;;  %5031 = vmatmul.bf16.gmra.mxu2 %v10230_v58 }
 0x3db   : > { %v4837_v36 = vpop.f32.mrf.mxu0 }
 0x3dc   : > { %v4838_v9 = vadd.f32 %v4837_v36, %v4105_v31 }
 0x3df   : > { %v4787_v58 = vpop.f32.mrf.mxu1 }
 0x3e0   : > { %v4788_v25 = vadd.f32 %v4787_v58, %v4769_v54 }
 0x3e3   : > { %v4839_v38 = vpop.f32.mrf.mxu0 }
 0x3e4   : > { %v4840_v27 = vadd.f32 %v4839_v38, %v4105_v31 }
 0x3e7   : > { %v4856_v49 = vpop.f32.mrf.mxu1 }
 0x3e8   : > { %v4857_v59 = vadd.f32 %v4856_v49, %v4838_v9 }
 0x3ea   : > { %5045 = vmatmul.bf16.vlgmr.msrb.gmra.mxu3 %v10267_v20 }
 0x3eb   : > { %v4842_v24 = vpop.f32.mrf.mxu0 }
 0x3ec   : > { %v4843_v50 = vadd.f32 %v4842_v24, %v4105_v31 }
 0x3ed   : > { %v4799_v34 = vpop.f32.mrf.mxu2 }
 0x3ee   : > { %v4800_v20 = vadd.f32 %v4799_v34, %v4781_v48 }
 0x3ef   : > { %v4858_v3 = vpop.f32.mrf.mxu1 }
 0x3f0   : > { %v4859_v34 = vadd.f32 %v4858_v3, %v4840_v27 }
 0x3f3   : > { %v4844_v17 = vpop.f32.mrf.mxu0 }
 0x3f4   : > { %v4845_v43 = vadd.f32 %v4844_v17, %v4105_v31 }
 0x3f5   : > { %v4801_v63 = vpop.f32.mrf.mxu2 }
 0x3f6   : > { %v4802_v12 = vadd.f32 %v4801_v63, %v4783_v28 }
 0x3f7   : > { %v4861_v13 = vpop.f32.mrf.mxu1 }
 0x3f8   : > { %v4862_v1 = vadd.f32 %v4861_v13, %v4843_v50 }
 0x3fa   : > { %5050 = vmatmul.bf16.gmra.mxu3 %v10294_v21 }
 0x3fd   : > { %v4804_v45 = vpop.f32.mrf.mxu2 }
 0x3fe   : > { %v4805_v22 = vadd.f32 %v4804_v45, %v4786_v15  ;;  %v4913_v45 = vpop.f32.mrf.mxu0 }
 0x3ff   : > { %v4863_v39 = vpop.f32.mrf.mxu1 }
 0x400   : > { %v4864_v28 = vadd.f32 %v4863_v39, %v4845_v43 }
 0x405   : > { %v4806_v16 = vpop.f32.mrf.mxu2 }
 0x406   : > { %v4807_v35 = vadd.f32 %v4806_v16, %v4788_v25  ;;  %v4915_v49 = vpop.f32.mrf.mxu0 }
 0x408   : > { %v4932_v58 = vpop.f32.mrf.mxu1 }
 0x40d   : > { %v4818_v23 = vpop.f32.mrf.mxu3  ;;  %v4875_v51 = vpop.f32.mrf.mxu2 }
 0x40e   : > { %v4819_v56 = vadd.f32 %v4818_v23, %v4800_v20  ;;  %v4876_v6 = vadd.f32 %v4875_v51, %v4857_v59 }
 0x410   : > { %vm5056_vm13 = vcmp.ge.f32.partialorder %v4819_v56, 0.0  ;;  %v5072_v21 = vmul.f32 0.2, %v4819_v56 }
 0x412   : > { %v5088_v60 = vsel %vm5056_vm13, %v4819_v56, %v5072_v21 }
 0x413   : > { %v5104_v44 = vmul.f32 1.4142135, %v5088_v60 }
 0x415   : > { %5120 = vst [vmem:[%s10355_s18] sm:$0xff] %v5104_v44  ;;  %v4820_v11 = vpop.f32.mrf.mxu3  ;;  %v4877_v26 = vpop.f32.mrf.mxu2 }
 0x416   : > { %v4821_v52 = vadd.f32 %v4820_v11, %v4802_v12  ;;  %v4878_v63 = vadd.f32 %v4877_v26, %v4859_v34  ;;  %v4934_v44 = vpop.f32.mrf.mxu1  ;;  %v4106_v12 = vperm.slane %v10347_v29, 2 }
 0x418   : > { %vm5060_vm14 = vcmp.ge.f32.partialorder %v4821_v52, 0.0  ;;  %v5076_v0 = vmul.f32 0.2, %v4821_v52  ;;  %v4914_v38 = vadd.f32 %v4913_v45, %v4106_v12  ;;  %v4916_v25 = vadd.f32 %v4915_v49, %v4106_v12 }
 0x41a   : > { %v5092_v55 = vsel %vm5060_vm14, %v4821_v52, %v5076_v0  ;;  %v4935_v24 = vadd.f32 %v4934_v44, %v4916_v25 }
 0x41b   : > { %v5108_v2 = vmul.f32 1.4142135, %v5092_v55  ;;  %v4933_v55 = vadd.f32 %v4932_v58, %v4914_v38 }
 0x41d   : > { %5124 = vst [vmem:[%s10355_s18 + $0x20] sm:$0xff] %v5108_v2  ;;  %v4823_v40 = vpop.f32.mrf.mxu3  ;;  %v4880_v10 = vpop.f32.mrf.mxu2 }
 0x41e   : > { %v4824_v42 = vadd.f32 %v4823_v40, %v4805_v22  ;;  %v4881_v23 = vadd.f32 %v4880_v10, %v4862_v1  ;;  %v4918_v2 = vpop.f32.mrf.mxu0  ;;  %v4937_v40 = vpop.f32.mrf.mxu1 }
 0x41f   : > { %v4919_v9 = vadd.f32 %v4918_v2, %v4106_v12 }
 0x420   : > { %vm5064_vm15 = vcmp.ge.f32.partialorder %v4824_v42, 0.0  ;;  %v5080_v57 = vmul.f32 0.2, %v4824_v42 }
 0x422   : > { %v5096_v37 = vsel %vm5064_vm15, %v4824_v42, %v5080_v57 }
 0x423   : > { %v5112_v19 = vmul.f32 1.4142135, %v5096_v37 }
 0x425   : > { %5128 = vst [vmem:[%s10355_s18 + $0x40] sm:$0xff] %v5112_v19  ;;  %v4825_v18 = vpop.f32.mrf.mxu3  ;;  %v4882_v33 = vpop.f32.mrf.mxu2 }
 0x426   : > { %v4826_v4 = vadd.f32 %v4825_v18, %v4807_v35  ;;  %v4883_v11 = vadd.f32 %v4882_v33, %v4864_v28  ;;  %v4920_v13 = vpop.f32.mrf.mxu0  ;;  %v4939_v10 = vpop.f32.mrf.mxu1 }
 0x427   : > { %v4921_v27 = vadd.f32 %v4920_v13, %v4106_v12 }
 0x428   : > { %vm5068_vm0 = vcmp.ge.f32.partialorder %v4826_v4, 0.0  ;;  %v5084_v30 = vmul.f32 0.2, %v4826_v4 }
 0x429   : > { %v4940_v34 = vadd.f32 %v4939_v10, %v4921_v27 }
 0x42a   : > { %v5100_v8 = vsel %vm5068_vm0, %v4826_v4, %v5084_v30 }
 0x42b   : > { %v5116_v53 = vmul.f32 1.4142135, %v5100_v8  ;;  %v4938_v8 = vadd.f32 %v4937_v40, %v4919_v9 }
 0x42d   : > { %5132 = vst [vmem:[%s10355_s18 + $0x60] sm:$0xff] %v5116_v53  ;;  %v4894_v32 = vpop.f32.mrf.mxu3  ;;  %v4951_v48 = vpop.f32.mrf.mxu2 }
 0x42e   : > { %v4895_v47 = vadd.f32 %v4894_v32, %v4876_v6  ;;  %v4952_v26 = vadd.f32 %v4951_v48, %v4933_v55  ;;  %v4989_v39 = vpop.f32.mrf.mxu0  ;;  %v5008_v33 = vpop.f32.mrf.mxu1 }
 0x430   : > { %vm5057_vm1 = vcmp.ge.f32.partialorder %v4895_v47, 0.0  ;;  %v5073_v62 = vmul.f32 0.2, %v4895_v47 }
 0x432   : > { %v5089_v5 = vsel %vm5057_vm1, %v4895_v47, %v5073_v62 }
 0x433   : > { %v5105_v41 = vmul.f32 1.4142135, %v5089_v5 }
 0x435   : > { %5121 = vst [vmem:[%s10355_s18 + $0x8] sm:$0xff] %v5105_v41  ;;  %v4896_v46 = vpop.f32.mrf.mxu3  ;;  %v4953_v52 = vpop.f32.mrf.mxu2 }
 0x436   : > { %v4897_v14 = vadd.f32 %v4896_v46, %v4878_v63  ;;  %v4954_v35 = vadd.f32 %v4953_v52, %v4935_v24  ;;  %v4107_v46 = vperm.slane %v10347_v29, 3  ;;  %v4991_v1 = vpop.f32.mrf.mxu0 }
 0x438   : > { %vm5061_vm2 = vcmp.ge.f32.partialorder %v4897_v14, 0.0  ;;  %v5077_v61 = vmul.f32 0.2, %v4897_v14  ;;  %v4992_v49 = vadd.f32 %v4991_v1, %v4107_v46 }
 0x43a   : > { %v5093_v16 = vsel %vm5061_vm2, %v4897_v14, %v5077_v61  ;;  %v4990_v61 = vadd.f32 %v4989_v39, %v4107_v46 }
 0x43b   : > { %v5109_v20 = vmul.f32 1.4142135, %v5093_v16 }
 0x43c   : > { %v5009_v16 = vadd.f32 %v5008_v33, %v4990_v61 }
 0x43d   : > { %5125 = vst [vmem:[%s10355_s18 + $0x28] sm:$0xff] %v5109_v20  ;;  %v4899_v56 = vpop.f32.mrf.mxu3  ;;  %v4956_v57 = vpop.f32.mrf.mxu2 }
 0x43e   : > { %v4900_v36 = vadd.f32 %v4899_v56, %v4881_v23  ;;  %v4957_v17 = vadd.f32 %v4956_v57, %v4938_v8  ;;  %v5010_v20 = vpop.f32.mrf.mxu1  ;;  %v4994_v44 = vpop.f32.mrf.mxu0 }
 0x43f   : > { %v5011_v28 = vadd.f32 %v5010_v20, %v4992_v49  ;;  %v4995_v38 = vadd.f32 %v4994_v44, %v4107_v46 }
 0x440   : > { %vm5065_vm3 = vcmp.ge.f32.partialorder %v4900_v36, 0.0  ;;  %v5081_v21 = vmul.f32 0.2, %v4900_v36 }
 0x442   : > { %v5097_v60 = vsel %vm5065_vm3, %v4900_v36, %v5081_v21 }
 0x443   : > { %v5113_v51 = vmul.f32 1.4142135, %v5097_v60 }
 0x445   : > { %5129 = vst [vmem:[%s10355_s18 + $0x48] sm:$0xff] %v5113_v51  ;;  %v4901_v7 = vpop.f32.mrf.mxu3  ;;  %v4958_v59 = vpop.f32.mrf.mxu2 }
 0x446   : > { %v4902_v0 = vadd.f32 %v4901_v7, %v4883_v11  ;;  %v4959_v14 = vadd.f32 %v4958_v59, %v4940_v34  ;;  %v5013_v11 = vpop.f32.mrf.mxu1 }
 0x447   : > { %v5014_v55 = vadd.f32 %v5013_v11, %v4995_v38 }
 0x448   : > { %vm5069_vm4 = vcmp.ge.f32.partialorder %v4902_v0, 0.0  ;;  %v5085_v15 = vmul.f32 0.2, %v4902_v0 }
 0x44a   : > { %v5101_v3 = vsel %vm5069_vm4, %v4902_v0, %v5085_v15 }
 0x44b   : > { %v5117_v22 = vmul.f32 1.4142135, %v5101_v3 }
 0x44d   : > { %5133 = vst [vmem:[%s10355_s18 + $0x68] sm:$0xff] %v5117_v22  ;;  %v4970_v42 = vpop.f32.mrf.mxu3  ;;  %v5027_v41 = vpop.f32.mrf.mxu2 }
 0x44e   : > { %v4971_v54 = vadd.f32 %v4970_v42, %v4952_v26  ;;  %v5028_v56 = vadd.f32 %v5027_v41, %v5009_v16  ;;  %v4996_v26 = vpop.f32.mrf.mxu0 }
 0x44f   : > { %v4997_v57 = vadd.f32 %v4996_v26, %v4107_v46 }
 0x450   : > { %vm5058_vm5 = vcmp.ge.f32.partialorder %v4971_v54, 0.0  ;;  %v5074_v37 = vmul.f32 0.2, %v4971_v54 }
 0x452   : > { %v5090_v19 = vsel %vm5058_vm5, %v4971_v54, %v5074_v37  ;;  %v5015_v54 = vpop.f32.mrf.mxu1 }
 0x453   : > { %v5106_v31 = vmul.f32 1.4142135, %v5090_v19  ;;  %v5016_v24 = vadd.f32 %v5015_v54, %v4997_v57 }
 0x455   : > { %5122 = vst [vmem:[%s10355_s18 + $0x10] sm:$0xff] %v5106_v31  ;;  %v4972_v18 = vpop.f32.mrf.mxu3  ;;  %v5029_v36 = vpop.f32.mrf.mxu2 }
 0x456   : > { %v4973_v4 = vadd.f32 %v4972_v18, %v4954_v35  ;;  %v5030_v12 = vadd.f32 %v5029_v36, %v5011_v28 }
 0x458   : > { %vm5062_vm6 = vcmp.ge.f32.partialorder %v4973_v4, 0.0  ;;  %v5078_v30 = vmul.f32 0.2, %v4973_v4 }
 0x45a   : > { %v5094_v53 = vsel %vm5062_vm6, %v4973_v4, %v5078_v30 }
 0x45b   : > { %v5110_v6 = vmul.f32 1.4142135, %v5094_v53 }
 0x45d   : > { %5126 = vst [vmem:[%s10355_s18 + $0x30] sm:$0xff] %v5110_v6  ;;  %v4975_v32 = vpop.f32.mrf.mxu3  ;;  %v5032_v0 = vpop.f32.mrf.mxu2 }
 0x45e   : > { %v4976_v47 = vadd.f32 %v4975_v32, %v4957_v17  ;;  %v5033_v22 = vadd.f32 %v5032_v0, %v5014_v55 }
 0x460   : > { %vm5066_vm7 = vcmp.ge.f32.partialorder %v4976_v47, 0.0  ;;  %v5082_v62 = vmul.f32 0.2, %v4976_v47 }
 0x462   : > { %v5098_v5 = vsel %vm5066_vm7, %v4976_v47, %v5082_v62 }
 0x463   : > { %v5114_v63 = vmul.f32 1.4142135, %v5098_v5 }
 0x465   : > { %5130 = vst [vmem:[%s10355_s18 + $0x50] sm:$0xff] %v5114_v63  ;;  %v4977_v45 = vpop.f32.mrf.mxu3  ;;  %v5034_v37 = vpop.f32.mrf.mxu2 }
 0x466   : > { %v4978_v50 = vadd.f32 %v4977_v45, %v4959_v14  ;;  %v5035_v35 = vadd.f32 %v5034_v37, %v5016_v24 }
 0x468   : > { %vm5070_vm8 = vcmp.ge.f32.partialorder %v4978_v50, 0.0  ;;  %v5086_v58 = vmul.f32 0.2, %v4978_v50 }
 0x46a   : > { %v5102_v48 = vsel %vm5070_vm8, %v4978_v50, %v5086_v58 }
 0x46b   : > { %v5118_v23 = vmul.f32 1.4142135, %v5102_v48 }
 0x46d   : > { %5134 = vst [vmem:[%s10355_s18 + $0x70] sm:$0xff] %v5118_v23  ;;  %v5046_v43 = vpop.f32.mrf.mxu3 }
 0x46e   : > { %v5047_v21 = vadd.f32 %v5046_v43, %v5028_v56 }
 0x470   : > { %vm5059_vm9 = vcmp.ge.f32.partialorder %v5047_v21, 0.0  ;;  %v5075_v29 = vmul.f32 0.2, %v5047_v21 }
 0x472   : > { %v5091_v60 = vsel %vm5059_vm9, %v5047_v21, %v5075_v29 }
 0x473   : > { %v5107_v51 = vmul.f32 1.4142135, %v5091_v60 }
 0x475   : > { %5123 = vst [vmem:[%s10355_s18 + $0x18] sm:$0xff] %v5107_v51  ;;  %v5048_v52 = vpop.f32.mrf.mxu3 }
 0x476   : > { %v5049_v7 = vadd.f32 %v5048_v52, %v5030_v12 }
 0x478   : > { %vm5063_vm10 = vcmp.ge.f32.partialorder %v5049_v7, 0.0  ;;  %v5079_v15 = vmul.f32 0.2, %v5049_v7 }
 0x47a   : > { %v5095_v3 = vsel %vm5063_vm10, %v5049_v7, %v5079_v15 }
 0x47b   : > { %v5111_v2 = vmul.f32 1.4142135, %v5095_v3 }
 0x47d   : > { %5127 = vst [vmem:[%s10355_s18 + $0x38] sm:$0xff] %v5111_v2  ;;  %v5051_v40 = vpop.f32.mrf.mxu3 }
 0x47e   : > { %v5052_v42 = vadd.f32 %v5051_v40, %v5033_v22 }
 0x480   : > { %vm5067_vm11 = vcmp.ge.f32.partialorder %v5052_v42, 0.0  ;;  %v5083_v25 = vmul.f32 0.2, %v5052_v42 }
 0x482   : > { %v5099_v19 = vsel %vm5067_vm11, %v5052_v42, %v5083_v25 }
 0x483   : > { %v5115_v31 = vmul.f32 1.4142135, %v5099_v19 }
 0x485   : > { %5131 = vst [vmem:[%s10355_s18 + $0x58] sm:$0xff] %v5115_v31  ;;  %v5053_v13 = vpop.f32.mrf.mxu3 }
 0x486   : > { %v5054_v18 = vadd.f32 %v5053_v13, %v5035_v35 }
 0x488   : > { %vm5071_vm12 = vcmp.ge.f32.partialorder %v5054_v18, 0.0  ;;  %v5087_v4 = vmul.f32 0.2, %v5054_v18 }
 0x48a   : > { %v5103_v10 = vsel %vm5071_vm12, %v5054_v18, %v5087_v4 }
 0x48b   : > { %v5119_v9 = vmul.f32 1.4142135, %v5103_v10 }
 0x48d   : > { %5135 = vst [vmem:[%s10355_s18 + $0x78] sm:$0xff] %v5119_v9 }
 0x48e PF: > { %p25_p8 = scmp.ge.s32.totalorder %s8447_s23, 5   ;;  %s10404_s19 = smov %s8381_s20 }
 0x48f   : > { %s10405_s20 = smov %s8385_s21  ;;  %s10406_s21 = smov %s8457_s26 }
 0x490   : > { %s10407_s22 = smov %s8447_s23  ;;  %27 = sbr.rel (!%p25_p8) target bundleno = 11 (0xb), region = 94 }
 0x495   :  { %5157 = vsyncpa [#allocation5], 1 }
 0x496   :  { %5159 = vsyncpa [#allocation5 + $0x1], 1 }
 0x497   :  { %5160 = vsyncpa [#allocation7], 1 }
 0x498   :  { %5162 = vsyncpa [#allocation7 + $0x1], 1 }

</bundles_post_ra>
